<compile_context>
chip_gen: v5e
topology: v5e:2x2
jax: 0.10.0
libtpu: 0.0.40
codegen_flags: <defaults>
</compile_context>

<pallas_src>
import functools

import jax
import jax.numpy as jnp
from jax import lax
from jax.experimental import pallas as pl
from jax.experimental.pallas import tpu as pltpu


# ----------------------------- Pallas kernel --------------------------------

def _seld_decoder_kernel(
    x_ref,                                       # (T*Bt, F, C)   time-major rows
    wih1_ref, whh1_ref, bi1_ref, bhn1_ref,       # (3,C,H) (3,H,H) (3,1,H) (1,H)
    wih2_ref, whh2_ref, bi2_ref, bhn2_ref,       # (3,H,H) (3,H,H) (3,1,H) (1,H)
    w1_ref, b1_ref, w2_ref, b2_ref,              # (H,4*H2) (1,4*H2) (4*H2,P) (1,P)
    out_ref,                                     # (T*Bt, P)  P = 128-padded 4*K
    gir_ref, giz_ref, gin_ref,                   # scratch: hoisted gates (T*Bt, H)
    seq1_ref, seq2_ref,                          # scratch: layer outputs (T*Bt, H)
    *, n_classes, n_frames, batch_tile,
):
    T = n_frames
    Bt = batch_tile
    K = n_classes
    H = whh1_ref.shape[1]

    # ---- freq_pool == 'avg': F on sublanes, C on lanes -> sublane reduce ----
    pooled = jnp.mean(x_ref[...].astype(jnp.float32), axis=1)       # (T*Bt, C)

    # ---- one GRU layer: hoisted input projection + unrolled recurrence ----
    def run_layer(x_in, wih_ref, whh_ref, bi_ref, bhn_ref, out_seq_ref):
        # Hoisted input projections (off the recurrence critical path).
        # bi[0] = b_ir + b_hr, bi[1] = b_iz + b_hz, bi[2] = b_in  (folded in wrapper)
        gir_ref[...] = jnp.dot(x_in, wih_ref[0],
                               preferred_element_type=jnp.float32) + bi_ref[0]
        giz_ref[...] = jnp.dot(x_in, wih_ref[1],
                               preferred_element_type=jnp.float32) + bi_ref[1]
        gin_ref[...] = jnp.dot(x_in, wih_ref[2],
                               preferred_element_type=jnp.float32) + bi_ref[2]

        # Per-gate hidden weights, loaded once (lane-offset-0, width H).
        whr = whh_ref[0]
        whz = whh_ref[1]
        whn = whh_ref[2]
        bhn = bhn_ref[...]                                           # (1, H)

        def step(t, h):
            s = t * Bt
            g_r = gir_ref[pl.ds(s, Bt), :]
            g_z = giz_ref[pl.ds(s, Bt), :]
            g_n = gin_ref[pl.ds(s, Bt), :]
            hr = jnp.dot(h, whr, preferred_element_type=jnp.float32)
            hz = jnp.dot(h, whz, preferred_element_type=jnp.float32)
            hn = jnp.dot(h, whn, preferred_element_type=jnp.float32) + bhn
            r = jax.nn.sigmoid(g_r + hr)
            z = jax.nn.sigmoid(g_z + hz)
            n = jnp.tanh(g_n + r * hn)
            h_new = (1.0 - z) * n + z * h
            out_seq_ref[pl.ds(s, Bt), :] = h_new
            return h_new

        h0 = jnp.zeros((Bt, H), jnp.float32)
        # T is small & static: fully unroll so the LLO scheduler can overlap
        # step t's VPU gate math with step t+1's MXU pushes.
        lax.fori_loop(0, T, step, h0, unroll=True)

    run_layer(pooled, wih1_ref, whh1_ref, bi1_ref, bhn1_ref, seq1_ref)
    # dropout(p=0.3) between GRU layers is identity in eval mode.
    run_layer(seq1_ref[...], wih2_ref, whh2_ref, bi2_ref, bhn2_ref, seq2_ref)

    # ---- fused FC heads: [event | x | y | z], 2 matmuls, lane-dense output ----
    seq = seq2_ref[...]                                              # (T*Bt, H)
    h1 = jnp.maximum(
        jnp.dot(seq, w1_ref[...], preferred_element_type=jnp.float32) + b1_ref[...],
        0.0)                                                         # (T*Bt, 4*H2)
    o = jnp.dot(h1, w2_ref[...], preferred_element_type=jnp.float32) + b2_ref[...]
    # tanh only on the x/y/z lane range [K, 4K); event logits & zero-padding untouched.
    lane = lax.broadcasted_iota(jnp.int32, o.shape, 1)
    o = jnp.where((lane >= K) & (lane < 4 * K), jnp.tanh(o), o)
    out_ref[...] = o                                                 # (T*Bt, P)


# ------------------------------- wrapper -------------------------------------

def seld_decoder_forward(x, params, *, n_classes, decoder_size, batch_tile=None):
    """x: (B, C, T, F) float32.  Returns dict like the PyTorch module.

    batch_tile: batch elements per grid program. Default B (one program; best on
    single-TC v5e/v6e). On v7x use batch_tile = B // 2 to shard the batch-parallel
    decoder across the two TensorCores (dimension_semantics is already "parallel").
    """
    B, C, T, F = x.shape
    H = decoder_size
    K = n_classes
    H2 = params["w_e1"].shape[1]
    f32 = jnp.float32

    if batch_tile is None:
        batch_tile = B
    assert B % batch_tile == 0, "batch_tile must divide batch size"
    Bt = batch_tile
    nt = B // Bt
    TBt = T * Bt

    # ---- layout plumbing: (B,C,T,F) -> (nt, T*Bt, F, C), time-major within tile.
    xr = jnp.transpose(x, (2, 0, 3, 1)).astype(f32)          # (T, B, F, C)
    xr = xr.reshape(T, nt, Bt, F, C)
    xr = jnp.transpose(xr, (1, 0, 2, 3, 4)).reshape(nt, TBt, F, C)

    # ---- GRU param packing: per-gate (r, z, n) split, biases folded ----
    def pack_gru(wih, whh, bih, bhh):
        wih3 = jnp.stack([wih[:, :H], wih[:, H:2 * H], wih[:, 2 * H:]], 0)   # (3,in,H)
        whh3 = jnp.stack([whh[:, :H], whh[:, H:2 * H], whh[:, 2 * H:]], 0)   # (3,H,H)
        bi3 = jnp.stack([bih[:, :H] + bhh[:, :H],
                         bih[:, H:2 * H] + bhh[:, H:2 * H],
                         bih[:, 2 * H:]], 0)                                 # (3,1,H)
        bhn = bhh[:, 2 * H:]                                                 # (1,H)
        return (wih3.astype(f32), whh3.astype(f32),
                bi3.astype(f32), bhn.astype(f32))

    g1 = pack_gru(params["wih1"], params["whh1"], params["bih1"], params["bhh1"])
    g2 = pack_gru(params["wih2"], params["whh2"], params["bih2"], params["bhh2"])

    # ---- fused FC heads: concat first layers, block-diag second, pad to 128 lanes.
    OUT = 4 * K
    P = ((OUT + 127) // 128) * 128
    w1_all = jnp.concatenate([params["w_e1"], params["w_x1"],
                              params["w_y1"], params["w_z1"]], axis=1).astype(f32)
    b1_all = jnp.concatenate([params["b_e1"], params["b_x1"],
                              params["b_y1"], params["b_z1"]], axis=1).astype(f32)
    zer = jnp.zeros((H2, K), f32)
    w2s = [params["w_e2"], params["w_x2"], params["w_y2"], params["w_z2"]]
    w2_blk = jnp.concatenate(
        [jnp.concatenate([w2s[i].astype(f32) if j == i else zer for j in range(4)],
                         axis=1) for i in range(4)], axis=0)                 # (4H2,4K)
    w2_pad = jnp.zeros((4 * H2, P), f32).at[:, :OUT].set(w2_blk)
    b2_all = jnp.concatenate([params["b_e2"], params["b_x2"],
                              params["b_y2"], params["b_z2"]], axis=1).astype(f32)
    b2_pad = jnp.zeros((1, P), f32).at[:, :OUT].set(b2_all)

    inputs = [xr, *g1, *g2, w1_all, b1_all, w2_pad, b2_pad]

    # ---- specs ----
    in_specs = [pl.BlockSpec((None, TBt, F, C), lambda i: (i, 0, 0, 0))]
    for a in inputs[1:]:
        in_specs.append(pl.BlockSpec(a.shape, lambda i, nd=a.ndim: (0,) * nd))
    out_spec = pl.BlockSpec((None, TBt, P), lambda i: (i, 0, 0))

    kern = functools.partial(_seld_decoder_kernel,
                             n_classes=K, n_frames=T, batch_tile=Bt)

    # NOTE: at production T/B sizes on v7x (64 MiB VMEM), raise/verify the VMEM plan
    # via pltpu.CompilerParams(vmem_limit_bytes=...) and tile T if needed; at these
    # sizes everything fits comfortably in the scoped default.
    out = pl.pallas_call(
        kern,
        out_shape=jax.ShapeDtypeStruct((nt, TBt, P), f32),
        grid=(nt,),
        in_specs=in_specs,
        out_specs=out_spec,
        scratch_shapes=[pltpu.VMEM((TBt, H), f32) for _ in range(5)],
        compiler_params=pltpu.CompilerParams(dimension_semantics=("parallel",)),
    )(*inputs)

    # ---- wrapper-side unpack (free layout plumbing) ----
    out = out[..., :OUT]                                  # (nt, T*Bt, 4K)
    out = out.reshape(nt, T, Bt, OUT)
    out = jnp.transpose(out, (0, 2, 1, 3)).reshape(B, T, OUT)
    return {
        "event_frame_logit": out[..., :K],                # (B, T, K)
        "doa_frame_output": out[..., K:],                 # (B, T, 3K)  = [x|y|z]
    }


# ----------------------- pure-JAX reference (for checking) -------------------

def _ref_forward(x, params):
    H = params["whh1"].shape[0]
    xm = jnp.mean(x, axis=3)                   # (B, C, T)   freq_pool='avg'
    seq = jnp.transpose(xm, (0, 2, 1))         # (B, T, C)

    def gru_layer(inp, wih, whh, bih, bhh):
        def step(h, xt):
            gi = xt @ wih + bih
            gh = h @ whh + bhh
            r = jax.nn.sigmoid(gi[:, :H] + gh[:, :H])
            z = jax.nn.sigmoid(gi[:, H:2 * H] + gh[:, H:2 * H])
            n = jnp.tanh(gi[:, 2 * H:] + r * gh[:, 2 * H:])
            h_new = (1.0 - z) * n + z * h
            return h_new, h_new
        h0 = jnp.zeros((inp.shape[0], H), jnp.float32)
        _, ys = lax.scan(step, h0, jnp.transpose(inp, (1, 0, 2)))
        return jnp.transpose(ys, (1, 0, 2))

    h = gru_layer(seq, params["wih1"], params["whh1"], params["bih1"], params["bhh1"])
    h = gru_layer(h, params["wih2"], params["whh2"], params["bih2"], params["bhh2"])

    def head(w1, b1, w2, b2):
        t = jnp.maximum(h @ w1 + b1, 0.0)
        return t @ w2 + b2

    evt = head(params["w_e1"], params["b_e1"], params["w_e2"], params["b_e2"])
    xo = jnp.tanh(head(params["w_x1"], params["b_x1"], params["w_x2"], params["b_x2"]))
    yo = jnp.tanh(head(params["w_y1"], params["b_y1"], params["w_y2"], params["b_y2"]))
    zo = jnp.tanh(head(params["w_z1"], params["b_z1"], params["w_z2"], params["b_z2"]))
    return {
        "event_frame_logit": evt,
        "doa_frame_output": jnp.concatenate([xo, yo, zo], axis=-1),
    }


# --------------------------------- main ---------------------------------------

if __name__ == "__main__":
    # Shapes consistent with the module:
    #   n_output_channels (C) = 32, decoder_size (H) = 32, n_classes = 12
    B, C, T, F = 2, 32, 8, 4
    H, K = 32, 12
    H2 = H // 2   # fc_size // 2

    key = jax.random.PRNGKey(0)

    def u(k, shape):
        return jax.random.uniform(k, shape, jnp.float32, -0.1, 0.1)

    keys = jax.random.split(key, 32)
    ki = iter(keys)

    x = jax.random.normal(next(ki), (B, C, T, F), jnp.float32)

    params = {
        # GRU layer 1 (input C -> hidden H); PyTorch weight_ih_l0 is (3H,C), stored transposed.
        "wih1": u(next(ki), (C, 3 * H)), "whh1": u(next(ki), (H, 3 * H)),
        "bih1": u(next(ki), (1, 3 * H)), "bhh1": u(next(ki), (1, 3 * H)),
        # GRU layer 2 (H -> H)
        "wih2": u(next(ki), (H, 3 * H)), "whh2": u(next(ki), (H, 3 * H)),
        "bih2": u(next(ki), (1, 3 * H)), "bhh2": u(next(ki), (1, 3 * H)),
        # event head
        "w_e1": u(next(ki), (H, H2)), "b_e1": u(next(ki), (1, H2)),
        "w_e2": u(next(ki), (H2, K)), "b_e2": u(next(ki), (1, K)),
        # doa heads
        "w_x1": u(next(ki), (H, H2)), "b_x1": u(next(ki), (1, H2)),
        "w_x2": u(next(ki), (H2, K)), "b_x2": u(next(ki), (1, K)),
        "w_y1": u(next(ki), (H, H2)), "b_y1": u(next(ki), (1, H2)),
        "w_y2": u(next(ki), (H2, K)), "b_y2": u(next(ki), (1, K)),
        "w_z1": u(next(ki), (H, H2)), "b_z1": u(next(ki), (1, H2)),
        "w_z2": u(next(ki), (H2, K)), "b_z2": u(next(ki), (1, K)),
    }

    ref = _ref_forward(x, params)

    # Default: single program (batch_tile = B) — best on single-TC v5e/v6e.
    fwd = jax.jit(functools.partial(seld_decoder_forward,
                                    n_classes=K, decoder_size=H))
    out = fwd(x, params)
    jax.block_until_ready(out)
    assert out["event_frame_logit"].shape == (B, T, K)
    assert out["doa_frame_output"].shape == (B, T, 3 * K)
    for name in ("event_frame_logit", "doa_frame_output"):
        err = jnp.max(jnp.abs(out[name] - ref[name]))
        assert err < 1e-3, f"{name} mismatch (batch_tile=B), max abs err = {err}"

    # Batch-parallel grid path (batch_tile=1 -> grid=(2,)), as used to shard across
    # the two v7x TensorCores; verified for correctness here on any chip.
    fwd_grid = jax.jit(functools.partial(seld_decoder_forward,
                                         n_classes=K, decoder_size=H, batch_tile=1))
    out_g = fwd_grid(x, params)
    jax.block_until_ready(out_g)
    for name in ("event_frame_logit", "doa_frame_output"):
        err = jnp.max(jnp.abs(out_g[name] - ref[name]))
        assert err < 1e-3, f"{name} mismatch (batch_tile=1), max abs err = {err}"

    print("KERNEL_OK")
</pallas_src>

<mosaic_0001>
module attributes {stable_mosaic.version = 11 : i64} {
  func.func @_seld_decoder_kernel(%arg0: i32, %arg1: memref<1x16x4x32xf32, #tpu.memory_space<vmem>>, %arg2: memref<3x32x32xf32, #tpu.memory_space<vmem>>, %arg3: memref<3x32x32xf32, #tpu.memory_space<vmem>>, %arg4: memref<3x1x32xf32, #tpu.memory_space<vmem>>, %arg5: memref<1x32xf32, #tpu.memory_space<vmem>>, %arg6: memref<3x32x32xf32, #tpu.memory_space<vmem>>, %arg7: memref<3x32x32xf32, #tpu.memory_space<vmem>>, %arg8: memref<3x1x32xf32, #tpu.memory_space<vmem>>, %arg9: memref<1x32xf32, #tpu.memory_space<vmem>>, %arg10: memref<32x64xf32, #tpu.memory_space<vmem>>, %arg11: memref<1x64xf32, #tpu.memory_space<vmem>>, %arg12: memref<64x128xf32, #tpu.memory_space<vmem>>, %arg13: memref<1x128xf32, #tpu.memory_space<vmem>>, %arg14: memref<1x16x128xf32, #tpu.memory_space<vmem>>, %arg15: memref<16x32xf32, #tpu.memory_space<vmem>>, %arg16: memref<16x32xf32, #tpu.memory_space<vmem>>, %arg17: memref<16x32xf32, #tpu.memory_space<vmem>>, %arg18: memref<16x32xf32, #tpu.memory_space<vmem>>, %arg19: memref<16x32xf32, #tpu.memory_space<vmem>>) attributes {dimension_semantics = [#tpu.dimension_semantics<parallel>], iteration_bounds = array<i64: 1>, scalar_prefetch = 0 : i64, scratch_operands = 5 : i64, tpu.core_type = #tpu.core_type<tc>, window_params = [{transform_indices = @transform_0, window_bounds = array<i64: 1, 16, 4, 32>}, {pipeline_mode = #tpu.pipeline_mode<synchronous>, transform_indices = @transform_1, window_bounds = array<i64: 3, 32, 32>}, {pipeline_mode = #tpu.pipeline_mode<synchronous>, transform_indices = @transform_2, window_bounds = array<i64: 3, 32, 32>}, {pipeline_mode = #tpu.pipeline_mode<synchronous>, transform_indices = @transform_3, window_bounds = array<i64: 3, 1, 32>}, {pipeline_mode = #tpu.pipeline_mode<synchronous>, transform_indices = @transform_4, window_bounds = array<i64: 1, 32>}, {pipeline_mode = #tpu.pipeline_mode<synchronous>, transform_indices = @transform_5, window_bounds = array<i64: 3, 32, 32>}, {pipeline_mode = #tpu.pipeline_mode<synchronous>, transform_indices = @transform_6, window_bounds = array<i64: 3, 32, 32>}, {pipeline_mode = #tpu.pipeline_mode<synchronous>, transform_indices = @transform_7, window_bounds = array<i64: 3, 1, 32>}, {pipeline_mode = #tpu.pipeline_mode<synchronous>, transform_indices = @transform_8, window_bounds = array<i64: 1, 32>}, {pipeline_mode = #tpu.pipeline_mode<synchronous>, transform_indices = @transform_9, window_bounds = array<i64: 32, 64>}, {pipeline_mode = #tpu.pipeline_mode<synchronous>, transform_indices = @transform_10, window_bounds = array<i64: 1, 64>}, {pipeline_mode = #tpu.pipeline_mode<synchronous>, transform_indices = @transform_11, window_bounds = array<i64: 64, 128>}, {pipeline_mode = #tpu.pipeline_mode<synchronous>, transform_indices = @transform_12, window_bounds = array<i64: 1, 128>}, {transform_indices = @transform_13, window_bounds = array<i64: 1, 16, 128>}]} {
    %c0 = arith.constant 0 : index
    %c0_0 = arith.constant 0 : index
    %c0_1 = arith.constant 0 : index
    %c0_2 = arith.constant 0 : index
    %0 = vector.load %arg1[%c0, %c0_0, %c0_1, %c0_2] : memref<1x16x4x32xf32, #tpu.memory_space<vmem>>, vector<1x16x4x32xf32>
    %1 = vector.shape_cast %0 : vector<1x16x4x32xf32> to vector<16x4x32xf32>
    %cst = arith.constant dense<0.000000e+00> : vector<16x32xf32>
    %2 = vector.multi_reduction <add>, %1, %cst [1] : vector<16x4x32xf32> to vector<16x32xf32>
    %cst_3 = arith.constant 4.000000e+00 : f32
    %3 = vector.broadcast %cst_3 : f32 to vector<16x32xf32>
    %4 = arith.divf %2, %3 : vector<16x32xf32>
    %c0_4 = arith.constant 0 : index
    %c0_5 = arith.constant 0 : index
    %c0_6 = arith.constant 0 : index
    %5 = vector.load %arg2[%c0_4, %c0_5, %c0_6] : memref<3x32x32xf32, #tpu.memory_space<vmem>>, vector<1x32x32xf32>
    %6 = vector.shape_cast %5 : vector<1x32x32xf32> to vector<32x32xf32>
    %cst_7 = arith.constant dense<0.000000e+00> : vector<16x32xf32>
    %7 = tpu.matmul %4, %6, %cst_7 {dimension_numbers = #tpu.dot_dimension_numbers<[1], [0], [0], [1], [0, 0, 1, 1], [], []>} : vector<16x32xf32>, vector<32x32xf32>, vector<16x32xf32> -> vector<16x32xf32>
    %c0_8 = arith.constant 0 : index
    %c0_9 = arith.constant 0 : index
    %c0_10 = arith.constant 0 : index
    %8 = vector.load %arg4[%c0_8, %c0_9, %c0_10] : memref<3x1x32xf32, #tpu.memory_space<vmem>>, vector<1x1x32xf32>
    %9 = vector.shape_cast %8 : vector<1x1x32xf32> to vector<1x32xf32>
    %10 = vector.broadcast %9 : vector<1x32xf32> to vector<16x32xf32>
    %11 = arith.addf %7, %10 : vector<16x32xf32>
    %c0_11 = arith.constant 0 : index
    %c0_12 = arith.constant 0 : index
    %12 = vector.load %arg15[%c0_11, %c0_12] : memref<16x32xf32, #tpu.memory_space<vmem>>, vector<16x32xf32>
    tpu.vector_store %arg15[%c0_11, %c0_12], %11 {strides = array<i32>} : memref<16x32xf32, #tpu.memory_space<vmem>>, vector<16x32xf32>,
    %c1 = arith.constant 1 : index
    %c0_13 = arith.constant 0 : index
    %c0_14 = arith.constant 0 : index
    %13 = vector.load %arg2[%c1, %c0_13, %c0_14] : memref<3x32x32xf32, #tpu.memory_space<vmem>>, vector<1x32x32xf32>
    %14 = vector.shape_cast %13 : vector<1x32x32xf32> to vector<32x32xf32>
    %cst_15 = arith.constant dense<0.000000e+00> : vector<16x32xf32>
    %15 = tpu.matmul %4, %14, %cst_15 {dimension_numbers = #tpu.dot_dimension_numbers<[1], [0], [0], [1], [0, 0, 1, 1], [], []>} : vector<16x32xf32>, vector<32x32xf32>, vector<16x32xf32> -> vector<16x32xf32>
    %c1_16 = arith.constant 1 : index
    %c0_17 = arith.constant 0 : index
    %c0_18 = arith.constant 0 : index
    %16 = vector.load %arg4[%c1_16, %c0_17, %c0_18] : memref<3x1x32xf32, #tpu.memory_space<vmem>>, vector<1x1x32xf32>
    %17 = vector.shape_cast %16 : vector<1x1x32xf32> to vector<1x32xf32>
    %18 = vector.broadcast %17 : vector<1x32xf32> to vector<16x32xf32>
    %19 = arith.addf %15, %18 : vector<16x32xf32>
    %c0_19 = arith.constant 0 : index
    %c0_20 = arith.constant 0 : index
    %20 = vector.load %arg16[%c0_19, %c0_20] : memref<16x32xf32, #tpu.memory_space<vmem>>, vector<16x32xf32>
    tpu.vector_store %arg16[%c0_19, %c0_20], %19 {strides = array<i32>} : memref<16x32xf32, #tpu.memory_space<vmem>>, vector<16x32xf32>,
    %c2 = arith.constant 2 : index
    %c0_21 = arith.constant 0 : index
    %c0_22 = arith.constant 0 : index
    %21 = vector.load %arg2[%c2, %c0_21, %c0_22] : memref<3x32x32xf32, #tpu.memory_space<vmem>>, vector<1x32x32xf32>
    %22 = vector.shape_cast %21 : vector<1x32x32xf32> to vector<32x32xf32>
    %cst_23 = arith.constant dense<0.000000e+00> : vector<16x32xf32>
    %23 = tpu.matmul %4, %22, %cst_23 {dimension_numbers = #tpu.dot_dimension_numbers<[1], [0], [0], [1], [0, 0, 1, 1], [], []>} : vector<16x32xf32>, vector<32x32xf32>, vector<16x32xf32> -> vector<16x32xf32>
    %c2_24 = arith.constant 2 : index
    %c0_25 = arith.constant 0 : index
    %c0_26 = arith.constant 0 : index
    %24 = vector.load %arg4[%c2_24, %c0_25, %c0_26] : memref<3x1x32xf32, #tpu.memory_space<vmem>>, vector<1x1x32xf32>
    %25 = vector.shape_cast %24 : vector<1x1x32xf32> to vector<1x32xf32>
    %26 = vector.broadcast %25 : vector<1x32xf32> to vector<16x32xf32>
    %27 = arith.addf %23, %26 : vector<16x32xf32>
    %c0_27 = arith.constant 0 : index
    %c0_28 = arith.constant 0 : index
    %28 = vector.load %arg17[%c0_27, %c0_28] : memref<16x32xf32, #tpu.memory_space<vmem>>, vector<16x32xf32>
    tpu.vector_store %arg17[%c0_27, %c0_28], %27 {strides = array<i32>} : memref<16x32xf32, #tpu.memory_space<vmem>>, vector<16x32xf32>,
    %c0_29 = arith.constant 0 : index
    %c0_30 = arith.constant 0 : index
    %c0_31 = arith.constant 0 : index
    %29 = vector.load %arg3[%c0_29, %c0_30, %c0_31] : memref<3x32x32xf32, #tpu.memory_space<vmem>>, vector<1x32x32xf32>
    %30 = vector.shape_cast %29 : vector<1x32x32xf32> to vector<32x32xf32>
    %c1_32 = arith.constant 1 : index
    %c0_33 = arith.constant 0 : index
    %c0_34 = arith.constant 0 : index
    %31 = vector.load %arg3[%c1_32, %c0_33, %c0_34] : memref<3x32x32xf32, #tpu.memory_space<vmem>>, vector<1x32x32xf32>
    %32 = vector.shape_cast %31 : vector<1x32x32xf32> to vector<32x32xf32>
    %c2_35 = arith.constant 2 : index
    %c0_36 = arith.constant 0 : index
    %c0_37 = arith.constant 0 : index
    %33 = vector.load %arg3[%c2_35, %c0_36, %c0_37] : memref<3x32x32xf32, #tpu.memory_space<vmem>>, vector<1x32x32xf32>
    %34 = vector.shape_cast %33 : vector<1x32x32xf32> to vector<32x32xf32>
    %c0_38 = arith.constant 0 : index
    %c0_39 = arith.constant 0 : index
    %35 = vector.load %arg5[%c0_38, %c0_39] : memref<1x32xf32, #tpu.memory_space<vmem>>, vector<1x32xf32>
    %cst_40 = arith.constant 0.000000e+00 : f32
    %36 = vector.broadcast %cst_40 : f32 to vector<2x32xf32>
    %c0_i32 = arith.constant 0 : i32
    %c2_i32 = arith.constant 2 : i32
    %37 = arith.muli %c0_i32, %c2_i32 : i32
    %38 = arith.index_cast %37 : i32 to index
    %c0_41 = arith.constant 0 : index
    %39 = vector.load %arg15[%38, %c0_41] : memref<16x32xf32, #tpu.memory_space<vmem>>, vector<2x32xf32>
    %40 = arith.index_cast %37 : i32 to index
    %c0_42 = arith.constant 0 : index
    %41 = vector.load %arg16[%40, %c0_42] : memref<16x32xf32, #tpu.memory_space<vmem>>, vector<2x32xf32>
    %42 = arith.index_cast %37 : i32 to index
    %c0_43 = arith.constant 0 : index
    %43 = vector.load %arg17[%42, %c0_43] : memref<16x32xf32, #tpu.memory_space<vmem>>, vector<2x32xf32>
    %cst_44 = arith.constant dense<0.000000e+00> : vector<2x32xf32>
    %44 = tpu.matmul %36, %30, %cst_44 {dimension_numbers = #tpu.dot_dimension_numbers<[1], [0], [0], [1], [0, 0, 1, 1], [], []>} : vector<2x32xf32>, vector<32x32xf32>, vector<2x32xf32> -> vector<2x32xf32>
    %cst_45 = arith.constant dense<0.000000e+00> : vector<2x32xf32>
    %45 = tpu.matmul %36, %32, %cst_45 {dimension_numbers = #tpu.dot_dimension_numbers<[1], [0], [0], [1], [0, 0, 1, 1], [], []>} : vector<2x32xf32>, vector<32x32xf32>, vector<2x32xf32> -> vector<2x32xf32>
    %cst_46 = arith.constant dense<0.000000e+00> : vector<2x32xf32>
    %46 = tpu.matmul %36, %34, %cst_46 {dimension_numbers = #tpu.dot_dimension_numbers<[1], [0], [0], [1], [0, 0, 1, 1], [], []>} : vector<2x32xf32>, vector<32x32xf32>, vector<2x32xf32> -> vector<2x32xf32>
    %47 = vector.broadcast %35 : vector<1x32xf32> to vector<2x32xf32>
    %48 = arith.addf %46, %47 : vector<2x32xf32>
    %49 = arith.addf %39, %44 : vector<2x32xf32>
    %50 = arith.negf %49 : vector<2x32xf32>
    %51 = math.exp %50 : vector<2x32xf32>
    %cst_47 = arith.constant 1.000000e+00 : f32
    %52 = vector.broadcast %cst_47 : f32 to vector<2x32xf32>
    %53 = arith.addf %52, %51 : vector<2x32xf32>
    %54 = arith.divf %52, %53 : vector<2x32xf32>
    %55 = arith.addf %41, %45 : vector<2x32xf32>
    %56 = arith.negf %55 : vector<2x32xf32>
    %57 = math.exp %56 : vector<2x32xf32>
    %cst_48 = arith.constant 1.000000e+00 : f32
    %58 = vector.broadcast %cst_48 : f32 to vector<2x32xf32>
    %59 = arith.addf %58, %57 : vector<2x32xf32>
    %60 = arith.divf %58, %59 : vector<2x32xf32>
    %61 = arith.mulf %54, %48 : vector<2x32xf32>
    %62 = arith.addf %43, %61 : vector<2x32xf32>
    %63 = math.tanh %62 : vector<2x32xf32>
    %cst_49 = arith.constant 1.000000e+00 : f32
    %64 = vector.broadcast %cst_49 : f32 to vector<2x32xf32>
    %65 = arith.subf %64, %60 : vector<2x32xf32>
    %66 = arith.mulf %65, %63 : vector<2x32xf32>
    %67 = arith.mulf %60, %36 : vector<2x32xf32>
    %68 = arith.addf %66, %67 : vector<2x32xf32>
    %69 = arith.index_cast %37 : i32 to index
    %c0_50 = arith.constant 0 : index
    %70 = vector.load %arg18[%69, %c0_50] : memref<16x32xf32, #tpu.memory_space<vmem>>, vector<2x32xf32>
    tpu.vector_store %arg18[%69, %c0_50], %68 {strides = array<i32>} : memref<16x32xf32, #tpu.memory_space<vmem>>, vector<2x32xf32>,
    %c1_i32 = arith.constant 1 : i32
    %c2_i32_51 = arith.constant 2 : i32
    %71 = arith.muli %c1_i32, %c2_i32_51 : i32
    %72 = arith.index_cast %71 : i32 to index
    %c0_52 = arith.constant 0 : index
    %73 = vector.load %arg15[%72, %c0_52] : memref<16x32xf32, #tpu.memory_space<vmem>>, vector<2x32xf32>
    %74 = arith.index_cast %71 : i32 to index
    %c0_53 = arith.constant 0 : index
    %75 = vector.load %arg16[%74, %c0_53] : memref<16x32xf32, #tpu.memory_space<vmem>>, vector<2x32xf32>
    %76 = arith.index_cast %71 : i32 to index
    %c0_54 = arith.constant 0 : index
    %77 = vector.load %arg17[%76, %c0_54] : memref<16x32xf32, #tpu.memory_space<vmem>>, vector<2x32xf32>
    %cst_55 = arith.constant dense<0.000000e+00> : vector<2x32xf32>
    %78 = tpu.matmul %68, %30, %cst_55 {dimension_numbers = #tpu.dot_dimension_numbers<[1], [0], [0], [1], [0, 0, 1, 1], [], []>} : vector<2x32xf32>, vector<32x32xf32>, vector<2x32xf32> -> vector<2x32xf32>
    %cst_56 = arith.constant dense<0.000000e+00> : vector<2x32xf32>
    %79 = tpu.matmul %68, %32, %cst_56 {dimension_numbers = #tpu.dot_dimension_numbers<[1], [0], [0], [1], [0, 0, 1, 1], [], []>} : vector<2x32xf32>, vector<32x32xf32>, vector<2x32xf32> -> vector<2x32xf32>
    %cst_57 = arith.constant dense<0.000000e+00> : vector<2x32xf32>
    %80 = tpu.matmul %68, %34, %cst_57 {dimension_numbers = #tpu.dot_dimension_numbers<[1], [0], [0], [1], [0, 0, 1, 1], [], []>} : vector<2x32xf32>, vector<32x32xf32>, vector<2x32xf32> -> vector<2x32xf32>
    %81 = vector.broadcast %35 : vector<1x32xf32> to vector<2x32xf32>
    %82 = arith.addf %80, %81 : vector<2x32xf32>
    %83 = arith.addf %73, %78 : vector<2x32xf32>
    %84 = arith.negf %83 : vector<2x32xf32>
    %85 = math.exp %84 : vector<2x32xf32>
    %cst_58 = arith.constant 1.000000e+00 : f32
    %86 = vector.broadcast %cst_58 : f32 to vector<2x32xf32>
    %87 = arith.addf %86, %85 : vector<2x32xf32>
    %88 = arith.divf %86, %87 : vector<2x32xf32>
    %89 = arith.addf %75, %79 : vector<2x32xf32>
    %90 = arith.negf %89 : vector<2x32xf32>
    %91 = math.exp %90 : vector<2x32xf32>
    %cst_59 = arith.constant 1.000000e+00 : f32
    %92 = vector.broadcast %cst_59 : f32 to vector<2x32xf32>
    %93 = arith.addf %92, %91 : vector<2x32xf32>
    %94 = arith.divf %92, %93 : vector<2x32xf32>
    %95 = arith.mulf %88, %82 : vector<2x32xf32>
    %96 = arith.addf %77, %95 : vector<2x32xf32>
    %97 = math.tanh %96 : vector<2x32xf32>
    %cst_60 = arith.constant 1.000000e+00 : f32
    %98 = vector.broadcast %cst_60 : f32 to vector<2x32xf32>
    %99 = arith.subf %98, %94 : vector<2x32xf32>
    %100 = arith.mulf %99, %97 : vector<2x32xf32>
    %101 = arith.mulf %94, %68 : vector<2x32xf32>
    %102 = arith.addf %100, %101 : vector<2x32xf32>
    %103 = arith.index_cast %71 : i32 to index
    %c0_61 = arith.constant 0 : index
    %104 = vector.load %arg18[%103, %c0_61] : memref<16x32xf32, #tpu.memory_space<vmem>>, vector<2x32xf32>
    tpu.vector_store %arg18[%103, %c0_61], %102 {strides = array<i32>} : memref<16x32xf32, #tpu.memory_space<vmem>>, vector<2x32xf32>,
    %c2_i32_62 = arith.constant 2 : i32
    %c2_i32_63 = arith.constant 2 : i32
    %105 = arith.muli %c2_i32_62, %c2_i32_63 : i32
    %106 = arith.index_cast %105 : i32 to index
    %c0_64 = arith.constant 0 : index
    %107 = vector.load %arg15[%106, %c0_64] : memref<16x32xf32, #tpu.memory_space<vmem>>, vector<2x32xf32>
    %108 = arith.index_cast %105 : i32 to index
    %c0_65 = arith.constant 0 : index
    %109 = vector.load %arg16[%108, %c0_65] : memref<16x32xf32, #tpu.memory_space<vmem>>, vector<2x32xf32>
    %110 = arith.index_cast %105 : i32 to index
    %c0_66 = arith.constant 0 : index
    %111 = vector.load %arg17[%110, %c0_66] : memref<16x32xf32, #tpu.memory_space<vmem>>, vector<2x32xf32>
    %cst_67 = arith.constant dense<0.000000e+00> : vector<2x32xf32>
    %112 = tpu.matmul %102, %30, %cst_67 {dimension_numbers = #tpu.dot_dimension_numbers<[1], [0], [0], [1], [0, 0, 1, 1], [], []>} : vector<2x32xf32>, vector<32x32xf32>, vector<2x32xf32> -> vector<2x32xf32>
    %cst_68 = arith.constant dense<0.000000e+00> : vector<2x32xf32>
    %113 = tpu.matmul %102, %32, %cst_68 {dimension_numbers = #tpu.dot_dimension_numbers<[1], [0], [0], [1], [0, 0, 1, 1], [], []>} : vector<2x32xf32>, vector<32x32xf32>, vector<2x32xf32> -> vector<2x32xf32>
    %cst_69 = arith.constant dense<0.000000e+00> : vector<2x32xf32>
    %114 = tpu.matmul %102, %34, %cst_69 {dimension_numbers = #tpu.dot_dimension_numbers<[1], [0], [0], [1], [0, 0, 1, 1], [], []>} : vector<2x32xf32>, vector<32x32xf32>, vector<2x32xf32> -> vector<2x32xf32>
    %115 = vector.broadcast %35 : vector<1x32xf32> to vector<2x32xf32>
    %116 = arith.addf %114, %115 : vector<2x32xf32>
    %117 = arith.addf %107, %112 : vector<2x32xf32>
    %118 = arith.negf %117 : vector<2x32xf32>
    %119 = math.exp %118 : vector<2x32xf32>
    %cst_70 = arith.constant 1.000000e+00 : f32
    %120 = vector.broadcast %cst_70 : f32 to vector<2x32xf32>
    %121 = arith.addf %120, %119 : vector<2x32xf32>
    %122 = arith.divf %120, %121 : vector<2x32xf32>
    %123 = arith.addf %109, %113 : vector<2x32xf32>
    %124 = arith.negf %123 : vector<2x32xf32>
    %125 = math.exp %124 : vector<2x32xf32>
    %cst_71 = arith.constant 1.000000e+00 : f32
    %126 = vector.broadcast %cst_71 : f32 to vector<2x32xf32>
    %127 = arith.addf %126, %125 : vector<2x32xf32>
    %128 = arith.divf %126, %127 : vector<2x32xf32>
    %129 = arith.mulf %122, %116 : vector<2x32xf32>
    %130 = arith.addf %111, %129 : vector<2x32xf32>
    %131 = math.tanh %130 : vector<2x32xf32>
    %cst_72 = arith.constant 1.000000e+00 : f32
    %132 = vector.broadcast %cst_72 : f32 to vector<2x32xf32>
    %133 = arith.subf %132, %128 : vector<2x32xf32>
    %134 = arith.mulf %133, %131 : vector<2x32xf32>
    %135 = arith.mulf %128, %102 : vector<2x32xf32>
    %136 = arith.addf %134, %135 : vector<2x32xf32>
    %137 = arith.index_cast %105 : i32 to index
    %c0_73 = arith.constant 0 : index
    %138 = vector.load %arg18[%137, %c0_73] : memref<16x32xf32, #tpu.memory_space<vmem>>, vector<2x32xf32>
    tpu.vector_store %arg18[%137, %c0_73], %136 {strides = array<i32>} : memref<16x32xf32, #tpu.memory_space<vmem>>, vector<2x32xf32>,
    %c3_i32 = arith.constant 3 : i32
    %c2_i32_74 = arith.constant 2 : i32
    %139 = arith.muli %c3_i32, %c2_i32_74 : i32
    %140 = arith.index_cast %139 : i32 to index
    %c0_75 = arith.constant 0 : index
    %141 = vector.load %arg15[%140, %c0_75] : memref<16x32xf32, #tpu.memory_space<vmem>>, vector<2x32xf32>
    %142 = arith.index_cast %139 : i32 to index
    %c0_76 = arith.constant 0 : index
    %143 = vector.load %arg16[%142, %c0_76] : memref<16x32xf32, #tpu.memory_space<vmem>>, vector<2x32xf32>
    %144 = arith.index_cast %139 : i32 to index
    %c0_77 = arith.constant 0 : index
    %145 = vector.load %arg17[%144, %c0_77] : memref<16x32xf32, #tpu.memory_space<vmem>>, vector<2x32xf32>
    %cst_78 = arith.constant dense<0.000000e+00> : vector<2x32xf32>
    %146 = tpu.matmul %136, %30, %cst_78 {dimension_numbers = #tpu.dot_dimension_numbers<[1], [0], [0], [1], [0, 0, 1, 1], [], []>} : vector<2x32xf32>, vector<32x32xf32>, vector<2x32xf32> -> vector<2x32xf32>
    %cst_79 = arith.constant dense<0.000000e+00> : vector<2x32xf32>
    %147 = tpu.matmul %136, %32, %cst_79 {dimension_numbers = #tpu.dot_dimension_numbers<[1], [0], [0], [1], [0, 0, 1, 1], [], []>} : vector<2x32xf32>, vector<32x32xf32>, vector<2x32xf32> -> vector<2x32xf32>
    %cst_80 = arith.constant dense<0.000000e+00> : vector<2x32xf32>
    %148 = tpu.matmul %136, %34, %cst_80 {dimension_numbers = #tpu.dot_dimension_numbers<[1], [0], [0], [1], [0, 0, 1, 1], [], []>} : vector<2x32xf32>, vector<32x32xf32>, vector<2x32xf32> -> vector<2x32xf32>
    %149 = vector.broadcast %35 : vector<1x32xf32> to vector<2x32xf32>
    %150 = arith.addf %148, %149 : vector<2x32xf32>
    %151 = arith.addf %141, %146 : vector<2x32xf32>
    %152 = arith.negf %151 : vector<2x32xf32>
    %153 = math.exp %152 : vector<2x32xf32>
    %cst_81 = arith.constant 1.000000e+00 : f32
    %154 = vector.broadcast %cst_81 : f32 to vector<2x32xf32>
    %155 = arith.addf %154, %153 : vector<2x32xf32>
    %156 = arith.divf %154, %155 : vector<2x32xf32>
    %157 = arith.addf %143, %147 : vector<2x32xf32>
    %158 = arith.negf %157 : vector<2x32xf32>
    %159 = math.exp %158 : vector<2x32xf32>
    %cst_82 = arith.constant 1.000000e+00 : f32
    %160 = vector.broadcast %cst_82 : f32 to vector<2x32xf32>
    %161 = arith.addf %160, %159 : vector<2x32xf32>
    %162 = arith.divf %160, %161 : vector<2x32xf32>
    %163 = arith.mulf %156, %150 : vector<2x32xf32>
    %164 = arith.addf %145, %163 : vector<2x32xf32>
    %165 = math.tanh %164 : vector<2x32xf32>
    %cst_83 = arith.constant 1.000000e+00 : f32
    %166 = vector.broadcast %cst_83 : f32 to vector<2x32xf32>
    %167 = arith.subf %166, %162 : vector<2x32xf32>
    %168 = arith.mulf %167, %165 : vector<2x32xf32>
    %169 = arith.mulf %162, %136 : vector<2x32xf32>
    %170 = arith.addf %168, %169 : vector<2x32xf32>
    %171 = arith.index_cast %139 : i32 to index
    %c0_84 = arith.constant 0 : index
    %172 = vector.load %arg18[%171, %c0_84] : memref<16x32xf32, #tpu.memory_space<vmem>>, vector<2x32xf32>
    tpu.vector_store %arg18[%171, %c0_84], %170 {strides = array<i32>} : memref<16x32xf32, #tpu.memory_space<vmem>>, vector<2x32xf32>,
    %c4_i32 = arith.constant 4 : i32
    %c2_i32_85 = arith.constant 2 : i32
    %173 = arith.muli %c4_i32, %c2_i32_85 : i32
    %174 = arith.index_cast %173 : i32 to index
    %c0_86 = arith.constant 0 : index
    %175 = vector.load %arg15[%174, %c0_86] : memref<16x32xf32, #tpu.memory_space<vmem>>, vector<2x32xf32>
    %176 = arith.index_cast %173 : i32 to index
    %c0_87 = arith.constant 0 : index
    %177 = vector.load %arg16[%176, %c0_87] : memref<16x32xf32, #tpu.memory_space<vmem>>, vector<2x32xf32>
    %178 = arith.index_cast %173 : i32 to index
    %c0_88 = arith.constant 0 : index
    %179 = vector.load %arg17[%178, %c0_88] : memref<16x32xf32, #tpu.memory_space<vmem>>, vector<2x32xf32>
    %cst_89 = arith.constant dense<0.000000e+00> : vector<2x32xf32>
    %180 = tpu.matmul %170, %30, %cst_89 {dimension_numbers = #tpu.dot_dimension_numbers<[1], [0], [0], [1], [0, 0, 1, 1], [], []>} : vector<2x32xf32>, vector<32x32xf32>, vector<2x32xf32> -> vector<2x32xf32>
    %cst_90 = arith.constant dense<0.000000e+00> : vector<2x32xf32>
    %181 = tpu.matmul %170, %32, %cst_90 {dimension_numbers = #tpu.dot_dimension_numbers<[1], [0], [0], [1], [0, 0, 1, 1], [], []>} : vector<2x32xf32>, vector<32x32xf32>, vector<2x32xf32> -> vector<2x32xf32>
    %cst_91 = arith.constant dense<0.000000e+00> : vector<2x32xf32>
    %182 = tpu.matmul %170, %34, %cst_91 {dimension_numbers = #tpu.dot_dimension_numbers<[1], [0], [0], [1], [0, 0, 1, 1], [], []>} : vector<2x32xf32>, vector<32x32xf32>, vector<2x32xf32> -> vector<2x32xf32>
    %183 = vector.broadcast %35 : vector<1x32xf32> to vector<2x32xf32>
    %184 = arith.addf %182, %183 : vector<2x32xf32>
    %185 = arith.addf %175, %180 : vector<2x32xf32>
    %186 = arith.negf %185 : vector<2x32xf32>
    %187 = math.exp %186 : vector<2x32xf32>
    %cst_92 = arith.constant 1.000000e+00 : f32
    %188 = vector.broadcast %cst_92 : f32 to vector<2x32xf32>
    %189 = arith.addf %188, %187 : vector<2x32xf32>
    %190 = arith.divf %188, %189 : vector<2x32xf32>
    %191 = arith.addf %177, %181 : vector<2x32xf32>
    %192 = arith.negf %191 : vector<2x32xf32>
    %193 = math.exp %192 : vector<2x32xf32>
    %cst_93 = arith.constant 1.000000e+00 : f32
    %194 = vector.broadcast %cst_93 : f32 to vector<2x32xf32>
    %195 = arith.addf %194, %193 : vector<2x32xf32>
    %196 = arith.divf %194, %195 : vector<2x32xf32>
    %197 = arith.mulf %190, %184 : vector<2x32xf32>
    %198 = arith.addf %179, %197 : vector<2x32xf32>
    %199 = math.tanh %198 : vector<2x32xf32>
    %cst_94 = arith.constant 1.000000e+00 : f32
    %200 = vector.broadcast %cst_94 : f32 to vector<2x32xf32>
    %201 = arith.subf %200, %196 : vector<2x32xf32>
    %202 = arith.mulf %201, %199 : vector<2x32xf32>
    %203 = arith.mulf %196, %170 : vector<2x32xf32>
    %204 = arith.addf %202, %203 : vector<2x32xf32>
    %205 = arith.index_cast %173 : i32 to index
    %c0_95 = arith.constant 0 : index
    %206 = vector.load %arg18[%205, %c0_95] : memref<16x32xf32, #tpu.memory_space<vmem>>, vector<2x32xf32>
    tpu.vector_store %arg18[%205, %c0_95], %204 {strides = array<i32>} : memref<16x32xf32, #tpu.memory_space<vmem>>, vector<2x32xf32>,
    %c5_i32 = arith.constant 5 : i32
    %c2_i32_96 = arith.constant 2 : i32
    %207 = arith.muli %c5_i32, %c2_i32_96 : i32
    %208 = arith.index_cast %207 : i32 to index
    %c0_97 = arith.constant 0 : index
    %209 = vector.load %arg15[%208, %c0_97] : memref<16x32xf32, #tpu.memory_space<vmem>>, vector<2x32xf32>
    %210 = arith.index_cast %207 : i32 to index
    %c0_98 = arith.constant 0 : index
    %211 = vector.load %arg16[%210, %c0_98] : memref<16x32xf32, #tpu.memory_space<vmem>>, vector<2x32xf32>
    %212 = arith.index_cast %207 : i32 to index
    %c0_99 = arith.constant 0 : index
    %213 = vector.load %arg17[%212, %c0_99] : memref<16x32xf32, #tpu.memory_space<vmem>>, vector<2x32xf32>
    %cst_100 = arith.constant dense<0.000000e+00> : vector<2x32xf32>
    %214 = tpu.matmul %204, %30, %cst_100 {dimension_numbers = #tpu.dot_dimension_numbers<[1], [0], [0], [1], [0, 0, 1, 1], [], []>} : vector<2x32xf32>, vector<32x32xf32>, vector<2x32xf32> -> vector<2x32xf32>
    %cst_101 = arith.constant dense<0.000000e+00> : vector<2x32xf32>
    %215 = tpu.matmul %204, %32, %cst_101 {dimension_numbers = #tpu.dot_dimension_numbers<[1], [0], [0], [1], [0, 0, 1, 1], [], []>} : vector<2x32xf32>, vector<32x32xf32>, vector<2x32xf32> -> vector<2x32xf32>
    %cst_102 = arith.constant dense<0.000000e+00> : vector<2x32xf32>
    %216 = tpu.matmul %204, %34, %cst_102 {dimension_numbers = #tpu.dot_dimension_numbers<[1], [0], [0], [1], [0, 0, 1, 1], [], []>} : vector<2x32xf32>, vector<32x32xf32>, vector<2x32xf32> -> vector<2x32xf32>
    %217 = vector.broadcast %35 : vector<1x32xf32> to vector<2x32xf32>
    %218 = arith.addf %216, %217 : vector<2x32xf32>
    %219 = arith.addf %209, %214 : vector<2x32xf32>
    %220 = arith.negf %219 : vector<2x32xf32>
    %221 = math.exp %220 : vector<2x32xf32>
    %cst_103 = arith.constant 1.000000e+00 : f32
    %222 = vector.broadcast %cst_103 : f32 to vector<2x32xf32>
    %223 = arith.addf %222, %221 : vector<2x32xf32>
    %224 = arith.divf %222, %223 : vector<2x32xf32>
    %225 = arith.addf %211, %215 : vector<2x32xf32>
    %226 = arith.negf %225 : vector<2x32xf32>
    %227 = math.exp %226 : vector<2x32xf32>
    %cst_104 = arith.constant 1.000000e+00 : f32
    %228 = vector.broadcast %cst_104 : f32 to vector<2x32xf32>
    %229 = arith.addf %228, %227 : vector<2x32xf32>
    %230 = arith.divf %228, %229 : vector<2x32xf32>
    %231 = arith.mulf %224, %218 : vector<2x32xf32>
    %232 = arith.addf %213, %231 : vector<2x32xf32>
    %233 = math.tanh %232 : vector<2x32xf32>
    %cst_105 = arith.constant 1.000000e+00 : f32
    %234 = vector.broadcast %cst_105 : f32 to vector<2x32xf32>
    %235 = arith.subf %234, %230 : vector<2x32xf32>
    %236 = arith.mulf %235, %233 : vector<2x32xf32>
    %237 = arith.mulf %230, %204 : vector<2x32xf32>
    %238 = arith.addf %236, %237 : vector<2x32xf32>
    %239 = arith.index_cast %207 : i32 to index
    %c0_106 = arith.constant 0 : index
    %240 = vector.load %arg18[%239, %c0_106] : memref<16x32xf32, #tpu.memory_space<vmem>>, vector<2x32xf32>
    tpu.vector_store %arg18[%239, %c0_106], %238 {strides = array<i32>} : memref<16x32xf32, #tpu.memory_space<vmem>>, vector<2x32xf32>,
    %c6_i32 = arith.constant 6 : i32
    %c2_i32_107 = arith.constant 2 : i32
    %241 = arith.muli %c6_i32, %c2_i32_107 : i32
    %242 = arith.index_cast %241 : i32 to index
    %c0_108 = arith.constant 0 : index
    %243 = vector.load %arg15[%242, %c0_108] : memref<16x32xf32, #tpu.memory_space<vmem>>, vector<2x32xf32>
    %244 = arith.index_cast %241 : i32 to index
    %c0_109 = arith.constant 0 : index
    %245 = vector.load %arg16[%244, %c0_109] : memref<16x32xf32, #tpu.memory_space<vmem>>, vector<2x32xf32>
    %246 = arith.index_cast %241 : i32 to index
    %c0_110 = arith.constant 0 : index
    %247 = vector.load %arg17[%246, %c0_110] : memref<16x32xf32, #tpu.memory_space<vmem>>, vector<2x32xf32>
    %cst_111 = arith.constant dense<0.000000e+00> : vector<2x32xf32>
    %248 = tpu.matmul %238, %30, %cst_111 {dimension_numbers = #tpu.dot_dimension_numbers<[1], [0], [0], [1], [0, 0, 1, 1], [], []>} : vector<2x32xf32>, vector<32x32xf32>, vector<2x32xf32> -> vector<2x32xf32>
    %cst_112 = arith.constant dense<0.000000e+00> : vector<2x32xf32>
    %249 = tpu.matmul %238, %32, %cst_112 {dimension_numbers = #tpu.dot_dimension_numbers<[1], [0], [0], [1], [0, 0, 1, 1], [], []>} : vector<2x32xf32>, vector<32x32xf32>, vector<2x32xf32> -> vector<2x32xf32>
    %cst_113 = arith.constant dense<0.000000e+00> : vector<2x32xf32>
    %250 = tpu.matmul %238, %34, %cst_113 {dimension_numbers = #tpu.dot_dimension_numbers<[1], [0], [0], [1], [0, 0, 1, 1], [], []>} : vector<2x32xf32>, vector<32x32xf32>, vector<2x32xf32> -> vector<2x32xf32>
    %251 = vector.broadcast %35 : vector<1x32xf32> to vector<2x32xf32>
    %252 = arith.addf %250, %251 : vector<2x32xf32>
    %253 = arith.addf %243, %248 : vector<2x32xf32>
    %254 = arith.negf %253 : vector<2x32xf32>
    %255 = math.exp %254 : vector<2x32xf32>
    %cst_114 = arith.constant 1.000000e+00 : f32
    %256 = vector.broadcast %cst_114 : f32 to vector<2x32xf32>
    %257 = arith.addf %256, %255 : vector<2x32xf32>
    %258 = arith.divf %256, %257 : vector<2x32xf32>
    %259 = arith.addf %245, %249 : vector<2x32xf32>
    %260 = arith.negf %259 : vector<2x32xf32>
    %261 = math.exp %260 : vector<2x32xf32>
    %cst_115 = arith.constant 1.000000e+00 : f32
    %262 = vector.broadcast %cst_115 : f32 to vector<2x32xf32>
    %263 = arith.addf %262, %261 : vector<2x32xf32>
    %264 = arith.divf %262, %263 : vector<2x32xf32>
    %265 = arith.mulf %258, %252 : vector<2x32xf32>
    %266 = arith.addf %247, %265 : vector<2x32xf32>
    %267 = math.tanh %266 : vector<2x32xf32>
    %cst_116 = arith.constant 1.000000e+00 : f32
    %268 = vector.broadcast %cst_116 : f32 to vector<2x32xf32>
    %269 = arith.subf %268, %264 : vector<2x32xf32>
    %270 = arith.mulf %269, %267 : vector<2x32xf32>
    %271 = arith.mulf %264, %238 : vector<2x32xf32>
    %272 = arith.addf %270, %271 : vector<2x32xf32>
    %273 = arith.index_cast %241 : i32 to index
    %c0_117 = arith.constant 0 : index
    %274 = vector.load %arg18[%273, %c0_117] : memref<16x32xf32, #tpu.memory_space<vmem>>, vector<2x32xf32>
    tpu.vector_store %arg18[%273, %c0_117], %272 {strides = array<i32>} : memref<16x32xf32, #tpu.memory_space<vmem>>, vector<2x32xf32>,
    %c7_i32 = arith.constant 7 : i32
    %c2_i32_118 = arith.constant 2 : i32
    %275 = arith.muli %c7_i32, %c2_i32_118 : i32
    %276 = arith.index_cast %275 : i32 to index
    %c0_119 = arith.constant 0 : index
    %277 = vector.load %arg15[%276, %c0_119] : memref<16x32xf32, #tpu.memory_space<vmem>>, vector<2x32xf32>
    %278 = arith.index_cast %275 : i32 to index
    %c0_120 = arith.constant 0 : index
    %279 = vector.load %arg16[%278, %c0_120] : memref<16x32xf32, #tpu.memory_space<vmem>>, vector<2x32xf32>
    %280 = arith.index_cast %275 : i32 to index
    %c0_121 = arith.constant 0 : index
    %281 = vector.load %arg17[%280, %c0_121] : memref<16x32xf32, #tpu.memory_space<vmem>>, vector<2x32xf32>
    %cst_122 = arith.constant dense<0.000000e+00> : vector<2x32xf32>
    %282 = tpu.matmul %272, %30, %cst_122 {dimension_numbers = #tpu.dot_dimension_numbers<[1], [0], [0], [1], [0, 0, 1, 1], [], []>} : vector<2x32xf32>, vector<32x32xf32>, vector<2x32xf32> -> vector<2x32xf32>
    %cst_123 = arith.constant dense<0.000000e+00> : vector<2x32xf32>
    %283 = tpu.matmul %272, %32, %cst_123 {dimension_numbers = #tpu.dot_dimension_numbers<[1], [0], [0], [1], [0, 0, 1, 1], [], []>} : vector<2x32xf32>, vector<32x32xf32>, vector<2x32xf32> -> vector<2x32xf32>
    %cst_124 = arith.constant dense<0.000000e+00> : vector<2x32xf32>
    %284 = tpu.matmul %272, %34, %cst_124 {dimension_numbers = #tpu.dot_dimension_numbers<[1], [0], [0], [1], [0, 0, 1, 1], [], []>} : vector<2x32xf32>, vector<32x32xf32>, vector<2x32xf32> -> vector<2x32xf32>
    %285 = vector.broadcast %35 : vector<1x32xf32> to vector<2x32xf32>
    %286 = arith.addf %284, %285 : vector<2x32xf32>
    %287 = arith.addf %277, %282 : vector<2x32xf32>
    %288 = arith.negf %287 : vector<2x32xf32>
    %289 = math.exp %288 : vector<2x32xf32>
    %cst_125 = arith.constant 1.000000e+00 : f32
    %290 = vector.broadcast %cst_125 : f32 to vector<2x32xf32>
    %291 = arith.addf %290, %289 : vector<2x32xf32>
    %292 = arith.divf %290, %291 : vector<2x32xf32>
    %293 = arith.addf %279, %283 : vector<2x32xf32>
    %294 = arith.negf %293 : vector<2x32xf32>
    %295 = math.exp %294 : vector<2x32xf32>
    %cst_126 = arith.constant 1.000000e+00 : f32
    %296 = vector.broadcast %cst_126 : f32 to vector<2x32xf32>
    %297 = arith.addf %296, %295 : vector<2x32xf32>
    %298 = arith.divf %296, %297 : vector<2x32xf32>
    %299 = arith.mulf %292, %286 : vector<2x32xf32>
    %300 = arith.addf %281, %299 : vector<2x32xf32>
    %301 = math.tanh %300 : vector<2x32xf32>
    %cst_127 = arith.constant 1.000000e+00 : f32
    %302 = vector.broadcast %cst_127 : f32 to vector<2x32xf32>
    %303 = arith.subf %302, %298 : vector<2x32xf32>
    %304 = arith.mulf %303, %301 : vector<2x32xf32>
    %305 = arith.mulf %298, %272 : vector<2x32xf32>
    %306 = arith.addf %304, %305 : vector<2x32xf32>
    %307 = arith.index_cast %275 : i32 to index
    %c0_128 = arith.constant 0 : index
    %308 = vector.load %arg18[%307, %c0_128] : memref<16x32xf32, #tpu.memory_space<vmem>>, vector<2x32xf32>
    tpu.vector_store %arg18[%307, %c0_128], %306 {strides = array<i32>} : memref<16x32xf32, #tpu.memory_space<vmem>>, vector<2x32xf32>,
    %c8_i32 = arith.constant 8 : i32
    %c0_129 = arith.constant 0 : index
    %c0_130 = arith.constant 0 : index
    %309 = vector.load %arg18[%c0_129, %c0_130] : memref<16x32xf32, #tpu.memory_space<vmem>>, vector<16x32xf32>
    %c0_131 = arith.constant 0 : index
    %c0_132 = arith.constant 0 : index
    %c0_133 = arith.constant 0 : index
    %310 = vector.load %arg6[%c0_131, %c0_132, %c0_133] : memref<3x32x32xf32, #tpu.memory_space<vmem>>, vector<1x32x32xf32>
    %311 = vector.shape_cast %310 : vector<1x32x32xf32> to vector<32x32xf32>
    %cst_134 = arith.constant dense<0.000000e+00> : vector<16x32xf32>
    %312 = tpu.matmul %309, %311, %cst_134 {dimension_numbers = #tpu.dot_dimension_numbers<[1], [0], [0], [1], [0, 0, 1, 1], [], []>} : vector<16x32xf32>, vector<32x32xf32>, vector<16x32xf32> -> vector<16x32xf32>
    %c0_135 = arith.constant 0 : index
    %c0_136 = arith.constant 0 : index
    %c0_137 = arith.constant 0 : index
    %313 = vector.load %arg8[%c0_135, %c0_136, %c0_137] : memref<3x1x32xf32, #tpu.memory_space<vmem>>, vector<1x1x32xf32>
    %314 = vector.shape_cast %313 : vector<1x1x32xf32> to vector<1x32xf32>
    %315 = vector.broadcast %314 : vector<1x32xf32> to vector<16x32xf32>
    %316 = arith.addf %312, %315 : vector<16x32xf32>
    %c0_138 = arith.constant 0 : index
    %c0_139 = arith.constant 0 : index
    %317 = vector.load %arg15[%c0_138, %c0_139] : memref<16x32xf32, #tpu.memory_space<vmem>>, vector<16x32xf32>
    tpu.vector_store %arg15[%c0_138, %c0_139], %316 {strides = array<i32>} : memref<16x32xf32, #tpu.memory_space<vmem>>, vector<16x32xf32>,
    %c1_140 = arith.constant 1 : index
    %c0_141 = arith.constant 0 : index
    %c0_142 = arith.constant 0 : index
    %318 = vector.load %arg6[%c1_140, %c0_141, %c0_142] : memref<3x32x32xf32, #tpu.memory_space<vmem>>, vector<1x32x32xf32>
    %319 = vector.shape_cast %318 : vector<1x32x32xf32> to vector<32x32xf32>
    %cst_143 = arith.constant dense<0.000000e+00> : vector<16x32xf32>
    %320 = tpu.matmul %309, %319, %cst_143 {dimension_numbers = #tpu.dot_dimension_numbers<[1], [0], [0], [1], [0, 0, 1, 1], [], []>} : vector<16x32xf32>, vector<32x32xf32>, vector<16x32xf32> -> vector<16x32xf32>
    %c1_144 = arith.constant 1 : index
    %c0_145 = arith.constant 0 : index
    %c0_146 = arith.constant 0 : index
    %321 = vector.load %arg8[%c1_144, %c0_145, %c0_146] : memref<3x1x32xf32, #tpu.memory_space<vmem>>, vector<1x1x32xf32>
    %322 = vector.shape_cast %321 : vector<1x1x32xf32> to vector<1x32xf32>
    %323 = vector.broadcast %322 : vector<1x32xf32> to vector<16x32xf32>
    %324 = arith.addf %320, %323 : vector<16x32xf32>
    %c0_147 = arith.constant 0 : index
    %c0_148 = arith.constant 0 : index
    %325 = vector.load %arg16[%c0_147, %c0_148] : memref<16x32xf32, #tpu.memory_space<vmem>>, vector<16x32xf32>
    tpu.vector_store %arg16[%c0_147, %c0_148], %324 {strides = array<i32>} : memref<16x32xf32, #tpu.memory_space<vmem>>, vector<16x32xf32>,
    %c2_149 = arith.constant 2 : index
    %c0_150 = arith.constant 0 : index
    %c0_151 = arith.constant 0 : index
    %326 = vector.load %arg6[%c2_149, %c0_150, %c0_151] : memref<3x32x32xf32, #tpu.memory_space<vmem>>, vector<1x32x32xf32>
    %327 = vector.shape_cast %326 : vector<1x32x32xf32> to vector<32x32xf32>
    %cst_152 = arith.constant dense<0.000000e+00> : vector<16x32xf32>
    %328 = tpu.matmul %309, %327, %cst_152 {dimension_numbers = #tpu.dot_dimension_numbers<[1], [0], [0], [1], [0, 0, 1, 1], [], []>} : vector<16x32xf32>, vector<32x32xf32>, vector<16x32xf32> -> vector<16x32xf32>
    %c2_153 = arith.constant 2 : index
    %c0_154 = arith.constant 0 : index
    %c0_155 = arith.constant 0 : index
    %329 = vector.load %arg8[%c2_153, %c0_154, %c0_155] : memref<3x1x32xf32, #tpu.memory_space<vmem>>, vector<1x1x32xf32>
    %330 = vector.shape_cast %329 : vector<1x1x32xf32> to vector<1x32xf32>
    %331 = vector.broadcast %330 : vector<1x32xf32> to vector<16x32xf32>
    %332 = arith.addf %328, %331 : vector<16x32xf32>
    %c0_156 = arith.constant 0 : index
    %c0_157 = arith.constant 0 : index
    %333 = vector.load %arg17[%c0_156, %c0_157] : memref<16x32xf32, #tpu.memory_space<vmem>>, vector<16x32xf32>
    tpu.vector_store %arg17[%c0_156, %c0_157], %332 {strides = array<i32>} : memref<16x32xf32, #tpu.memory_space<vmem>>, vector<16x32xf32>,
    %c0_158 = arith.constant 0 : index
    %c0_159 = arith.constant 0 : index
    %c0_160 = arith.constant 0 : index
    %334 = vector.load %arg7[%c0_158, %c0_159, %c0_160] : memref<3x32x32xf32, #tpu.memory_space<vmem>>, vector<1x32x32xf32>
    %335 = vector.shape_cast %334 : vector<1x32x32xf32> to vector<32x32xf32>
    %c1_161 = arith.constant 1 : index
    %c0_162 = arith.constant 0 : index
    %c0_163 = arith.constant 0 : index
    %336 = vector.load %arg7[%c1_161, %c0_162, %c0_163] : memref<3x32x32xf32, #tpu.memory_space<vmem>>, vector<1x32x32xf32>
    %337 = vector.shape_cast %336 : vector<1x32x32xf32> to vector<32x32xf32>
    %c2_164 = arith.constant 2 : index
    %c0_165 = arith.constant 0 : index
    %c0_166 = arith.constant 0 : index
    %338 = vector.load %arg7[%c2_164, %c0_165, %c0_166] : memref<3x32x32xf32, #tpu.memory_space<vmem>>, vector<1x32x32xf32>
    %339 = vector.shape_cast %338 : vector<1x32x32xf32> to vector<32x32xf32>
    %c0_167 = arith.constant 0 : index
    %c0_168 = arith.constant 0 : index
    %340 = vector.load %arg9[%c0_167, %c0_168] : memref<1x32xf32, #tpu.memory_space<vmem>>, vector<1x32xf32>
    %cst_169 = arith.constant 0.000000e+00 : f32
    %341 = vector.broadcast %cst_169 : f32 to vector<2x32xf32>
    %c0_i32_170 = arith.constant 0 : i32
    %c2_i32_171 = arith.constant 2 : i32
    %342 = arith.muli %c0_i32_170, %c2_i32_171 : i32
    %343 = arith.index_cast %342 : i32 to index
    %c0_172 = arith.constant 0 : index
    %344 = vector.load %arg15[%343, %c0_172] : memref<16x32xf32, #tpu.memory_space<vmem>>, vector<2x32xf32>
    %345 = arith.index_cast %342 : i32 to index
    %c0_173 = arith.constant 0 : index
    %346 = vector.load %arg16[%345, %c0_173] : memref<16x32xf32, #tpu.memory_space<vmem>>, vector<2x32xf32>
    %347 = arith.index_cast %342 : i32 to index
    %c0_174 = arith.constant 0 : index
    %348 = vector.load %arg17[%347, %c0_174] : memref<16x32xf32, #tpu.memory_space<vmem>>, vector<2x32xf32>
    %cst_175 = arith.constant dense<0.000000e+00> : vector<2x32xf32>
    %349 = tpu.matmul %341, %335, %cst_175 {dimension_numbers = #tpu.dot_dimension_numbers<[1], [0], [0], [1], [0, 0, 1, 1], [], []>} : vector<2x32xf32>, vector<32x32xf32>, vector<2x32xf32> -> vector<2x32xf32>
    %cst_176 = arith.constant dense<0.000000e+00> : vector<2x32xf32>
    %350 = tpu.matmul %341, %337, %cst_176 {dimension_numbers = #tpu.dot_dimension_numbers<[1], [0], [0], [1], [0, 0, 1, 1], [], []>} : vector<2x32xf32>, vector<32x32xf32>, vector<2x32xf32> -> vector<2x32xf32>
    %cst_177 = arith.constant dense<0.000000e+00> : vector<2x32xf32>
    %351 = tpu.matmul %341, %339, %cst_177 {dimension_numbers = #tpu.dot_dimension_numbers<[1], [0], [0], [1], [0, 0, 1, 1], [], []>} : vector<2x32xf32>, vector<32x32xf32>, vector<2x32xf32> -> vector<2x32xf32>
    %352 = vector.broadcast %340 : vector<1x32xf32> to vector<2x32xf32>
    %353 = arith.addf %351, %352 : vector<2x32xf32>
    %354 = arith.addf %344, %349 : vector<2x32xf32>
    %355 = arith.negf %354 : vector<2x32xf32>
    %356 = math.exp %355 : vector<2x32xf32>
    %cst_178 = arith.constant 1.000000e+00 : f32
    %357 = vector.broadcast %cst_178 : f32 to vector<2x32xf32>
    %358 = arith.addf %357, %356 : vector<2x32xf32>
    %359 = arith.divf %357, %358 : vector<2x32xf32>
    %360 = arith.addf %346, %350 : vector<2x32xf32>
    %361 = arith.negf %360 : vector<2x32xf32>
    %362 = math.exp %361 : vector<2x32xf32>
    %cst_179 = arith.constant 1.000000e+00 : f32
    %363 = vector.broadcast %cst_179 : f32 to vector<2x32xf32>
    %364 = arith.addf %363, %362 : vector<2x32xf32>
    %365 = arith.divf %363, %364 : vector<2x32xf32>
    %366 = arith.mulf %359, %353 : vector<2x32xf32>
    %367 = arith.addf %348, %366 : vector<2x32xf32>
    %368 = math.tanh %367 : vector<2x32xf32>
    %cst_180 = arith.constant 1.000000e+00 : f32
    %369 = vector.broadcast %cst_180 : f32 to vector<2x32xf32>
    %370 = arith.subf %369, %365 : vector<2x32xf32>
    %371 = arith.mulf %370, %368 : vector<2x32xf32>
    %372 = arith.mulf %365, %341 : vector<2x32xf32>
    %373 = arith.addf %371, %372 : vector<2x32xf32>
    %374 = arith.index_cast %342 : i32 to index
    %c0_181 = arith.constant 0 : index
    %375 = vector.load %arg19[%374, %c0_181] : memref<16x32xf32, #tpu.memory_space<vmem>>, vector<2x32xf32>
    tpu.vector_store %arg19[%374, %c0_181], %373 {strides = array<i32>} : memref<16x32xf32, #tpu.memory_space<vmem>>, vector<2x32xf32>,
    %c1_i32_182 = arith.constant 1 : i32
    %c2_i32_183 = arith.constant 2 : i32
    %376 = arith.muli %c1_i32_182, %c2_i32_183 : i32
    %377 = arith.index_cast %376 : i32 to index
    %c0_184 = arith.constant 0 : index
    %378 = vector.load %arg15[%377, %c0_184] : memref<16x32xf32, #tpu.memory_space<vmem>>, vector<2x32xf32>
    %379 = arith.index_cast %376 : i32 to index
    %c0_185 = arith.constant 0 : index
    %380 = vector.load %arg16[%379, %c0_185] : memref<16x32xf32, #tpu.memory_space<vmem>>, vector<2x32xf32>
    %381 = arith.index_cast %376 : i32 to index
    %c0_186 = arith.constant 0 : index
    %382 = vector.load %arg17[%381, %c0_186] : memref<16x32xf32, #tpu.memory_space<vmem>>, vector<2x32xf32>
    %cst_187 = arith.constant dense<0.000000e+00> : vector<2x32xf32>
    %383 = tpu.matmul %373, %335, %cst_187 {dimension_numbers = #tpu.dot_dimension_numbers<[1], [0], [0], [1], [0, 0, 1, 1], [], []>} : vector<2x32xf32>, vector<32x32xf32>, vector<2x32xf32> -> vector<2x32xf32>
    %cst_188 = arith.constant dense<0.000000e+00> : vector<2x32xf32>
    %384 = tpu.matmul %373, %337, %cst_188 {dimension_numbers = #tpu.dot_dimension_numbers<[1], [0], [0], [1], [0, 0, 1, 1], [], []>} : vector<2x32xf32>, vector<32x32xf32>, vector<2x32xf32> -> vector<2x32xf32>
    %cst_189 = arith.constant dense<0.000000e+00> : vector<2x32xf32>
    %385 = tpu.matmul %373, %339, %cst_189 {dimension_numbers = #tpu.dot_dimension_numbers<[1], [0], [0], [1], [0, 0, 1, 1], [], []>} : vector<2x32xf32>, vector<32x32xf32>, vector<2x32xf32> -> vector<2x32xf32>
    %386 = vector.broadcast %340 : vector<1x32xf32> to vector<2x32xf32>
    %387 = arith.addf %385, %386 : vector<2x32xf32>
    %388 = arith.addf %378, %383 : vector<2x32xf32>
    %389 = arith.negf %388 : vector<2x32xf32>
    %390 = math.exp %389 : vector<2x32xf32>
    %cst_190 = arith.constant 1.000000e+00 : f32
    %391 = vector.broadcast %cst_190 : f32 to vector<2x32xf32>
    %392 = arith.addf %391, %390 : vector<2x32xf32>
    %393 = arith.divf %391, %392 : vector<2x32xf32>
    %394 = arith.addf %380, %384 : vector<2x32xf32>
    %395 = arith.negf %394 : vector<2x32xf32>
    %396 = math.exp %395 : vector<2x32xf32>
    %cst_191 = arith.constant 1.000000e+00 : f32
    %397 = vector.broadcast %cst_191 : f32 to vector<2x32xf32>
    %398 = arith.addf %397, %396 : vector<2x32xf32>
    %399 = arith.divf %397, %398 : vector<2x32xf32>
    %400 = arith.mulf %393, %387 : vector<2x32xf32>
    %401 = arith.addf %382, %400 : vector<2x32xf32>
    %402 = math.tanh %401 : vector<2x32xf32>
    %cst_192 = arith.constant 1.000000e+00 : f32
    %403 = vector.broadcast %cst_192 : f32 to vector<2x32xf32>
    %404 = arith.subf %403, %399 : vector<2x32xf32>
    %405 = arith.mulf %404, %402 : vector<2x32xf32>
    %406 = arith.mulf %399, %373 : vector<2x32xf32>
    %407 = arith.addf %405, %406 : vector<2x32xf32>
    %408 = arith.index_cast %376 : i32 to index
    %c0_193 = arith.constant 0 : index
    %409 = vector.load %arg19[%408, %c0_193] : memref<16x32xf32, #tpu.memory_space<vmem>>, vector<2x32xf32>
    tpu.vector_store %arg19[%408, %c0_193], %407 {strides = array<i32>} : memref<16x32xf32, #tpu.memory_space<vmem>>, vector<2x32xf32>,
    %c2_i32_194 = arith.constant 2 : i32
    %c2_i32_195 = arith.constant 2 : i32
    %410 = arith.muli %c2_i32_194, %c2_i32_195 : i32
    %411 = arith.index_cast %410 : i32 to index
    %c0_196 = arith.constant 0 : index
    %412 = vector.load %arg15[%411, %c0_196] : memref<16x32xf32, #tpu.memory_space<vmem>>, vector<2x32xf32>
    %413 = arith.index_cast %410 : i32 to index
    %c0_197 = arith.constant 0 : index
    %414 = vector.load %arg16[%413, %c0_197] : memref<16x32xf32, #tpu.memory_space<vmem>>, vector<2x32xf32>
    %415 = arith.index_cast %410 : i32 to index
    %c0_198 = arith.constant 0 : index
    %416 = vector.load %arg17[%415, %c0_198] : memref<16x32xf32, #tpu.memory_space<vmem>>, vector<2x32xf32>
    %cst_199 = arith.constant dense<0.000000e+00> : vector<2x32xf32>
    %417 = tpu.matmul %407, %335, %cst_199 {dimension_numbers = #tpu.dot_dimension_numbers<[1], [0], [0], [1], [0, 0, 1, 1], [], []>} : vector<2x32xf32>, vector<32x32xf32>, vector<2x32xf32> -> vector<2x32xf32>
    %cst_200 = arith.constant dense<0.000000e+00> : vector<2x32xf32>
    %418 = tpu.matmul %407, %337, %cst_200 {dimension_numbers = #tpu.dot_dimension_numbers<[1], [0], [0], [1], [0, 0, 1, 1], [], []>} : vector<2x32xf32>, vector<32x32xf32>, vector<2x32xf32> -> vector<2x32xf32>
    %cst_201 = arith.constant dense<0.000000e+00> : vector<2x32xf32>
    %419 = tpu.matmul %407, %339, %cst_201 {dimension_numbers = #tpu.dot_dimension_numbers<[1], [0], [0], [1], [0, 0, 1, 1], [], []>} : vector<2x32xf32>, vector<32x32xf32>, vector<2x32xf32> -> vector<2x32xf32>
    %420 = vector.broadcast %340 : vector<1x32xf32> to vector<2x32xf32>
    %421 = arith.addf %419, %420 : vector<2x32xf32>
    %422 = arith.addf %412, %417 : vector<2x32xf32>
    %423 = arith.negf %422 : vector<2x32xf32>
    %424 = math.exp %423 : vector<2x32xf32>
    %cst_202 = arith.constant 1.000000e+00 : f32
    %425 = vector.broadcast %cst_202 : f32 to vector<2x32xf32>
    %426 = arith.addf %425, %424 : vector<2x32xf32>
    %427 = arith.divf %425, %426 : vector<2x32xf32>
    %428 = arith.addf %414, %418 : vector<2x32xf32>
    %429 = arith.negf %428 : vector<2x32xf32>
    %430 = math.exp %429 : vector<2x32xf32>
    %cst_203 = arith.constant 1.000000e+00 : f32
    %431 = vector.broadcast %cst_203 : f32 to vector<2x32xf32>
    %432 = arith.addf %431, %430 : vector<2x32xf32>
    %433 = arith.divf %431, %432 : vector<2x32xf32>
    %434 = arith.mulf %427, %421 : vector<2x32xf32>
    %435 = arith.addf %416, %434 : vector<2x32xf32>
    %436 = math.tanh %435 : vector<2x32xf32>
    %cst_204 = arith.constant 1.000000e+00 : f32
    %437 = vector.broadcast %cst_204 : f32 to vector<2x32xf32>
    %438 = arith.subf %437, %433 : vector<2x32xf32>
    %439 = arith.mulf %438, %436 : vector<2x32xf32>
    %440 = arith.mulf %433, %407 : vector<2x32xf32>
    %441 = arith.addf %439, %440 : vector<2x32xf32>
    %442 = arith.index_cast %410 : i32 to index
    %c0_205 = arith.constant 0 : index
    %443 = vector.load %arg19[%442, %c0_205] : memref<16x32xf32, #tpu.memory_space<vmem>>, vector<2x32xf32>
    tpu.vector_store %arg19[%442, %c0_205], %441 {strides = array<i32>} : memref<16x32xf32, #tpu.memory_space<vmem>>, vector<2x32xf32>,
    %c3_i32_206 = arith.constant 3 : i32
    %c2_i32_207 = arith.constant 2 : i32
    %444 = arith.muli %c3_i32_206, %c2_i32_207 : i32
    %445 = arith.index_cast %444 : i32 to index
    %c0_208 = arith.constant 0 : index
    %446 = vector.load %arg15[%445, %c0_208] : memref<16x32xf32, #tpu.memory_space<vmem>>, vector<2x32xf32>
    %447 = arith.index_cast %444 : i32 to index
    %c0_209 = arith.constant 0 : index
    %448 = vector.load %arg16[%447, %c0_209] : memref<16x32xf32, #tpu.memory_space<vmem>>, vector<2x32xf32>
    %449 = arith.index_cast %444 : i32 to index
    %c0_210 = arith.constant 0 : index
    %450 = vector.load %arg17[%449, %c0_210] : memref<16x32xf32, #tpu.memory_space<vmem>>, vector<2x32xf32>
    %cst_211 = arith.constant dense<0.000000e+00> : vector<2x32xf32>
    %451 = tpu.matmul %441, %335, %cst_211 {dimension_numbers = #tpu.dot_dimension_numbers<[1], [0], [0], [1], [0, 0, 1, 1], [], []>} : vector<2x32xf32>, vector<32x32xf32>, vector<2x32xf32> -> vector<2x32xf32>
    %cst_212 = arith.constant dense<0.000000e+00> : vector<2x32xf32>
    %452 = tpu.matmul %441, %337, %cst_212 {dimension_numbers = #tpu.dot_dimension_numbers<[1], [0], [0], [1], [0, 0, 1, 1], [], []>} : vector<2x32xf32>, vector<32x32xf32>, vector<2x32xf32> -> vector<2x32xf32>
    %cst_213 = arith.constant dense<0.000000e+00> : vector<2x32xf32>
    %453 = tpu.matmul %441, %339, %cst_213 {dimension_numbers = #tpu.dot_dimension_numbers<[1], [0], [0], [1], [0, 0, 1, 1], [], []>} : vector<2x32xf32>, vector<32x32xf32>, vector<2x32xf32> -> vector<2x32xf32>
    %454 = vector.broadcast %340 : vector<1x32xf32> to vector<2x32xf32>
    %455 = arith.addf %453, %454 : vector<2x32xf32>
    %456 = arith.addf %446, %451 : vector<2x32xf32>
    %457 = arith.negf %456 : vector<2x32xf32>
    %458 = math.exp %457 : vector<2x32xf32>
    %cst_214 = arith.constant 1.000000e+00 : f32
    %459 = vector.broadcast %cst_214 : f32 to vector<2x32xf32>
    %460 = arith.addf %459, %458 : vector<2x32xf32>
    %461 = arith.divf %459, %460 : vector<2x32xf32>
    %462 = arith.addf %448, %452 : vector<2x32xf32>
    %463 = arith.negf %462 : vector<2x32xf32>
    %464 = math.exp %463 : vector<2x32xf32>
    %cst_215 = arith.constant 1.000000e+00 : f32
    %465 = vector.broadcast %cst_215 : f32 to vector<2x32xf32>
    %466 = arith.addf %465, %464 : vector<2x32xf32>
    %467 = arith.divf %465, %466 : vector<2x32xf32>
    %468 = arith.mulf %461, %455 : vector<2x32xf32>
    %469 = arith.addf %450, %468 : vector<2x32xf32>
    %470 = math.tanh %469 : vector<2x32xf32>
    %cst_216 = arith.constant 1.000000e+00 : f32
    %471 = vector.broadcast %cst_216 : f32 to vector<2x32xf32>
    %472 = arith.subf %471, %467 : vector<2x32xf32>
    %473 = arith.mulf %472, %470 : vector<2x32xf32>
    %474 = arith.mulf %467, %441 : vector<2x32xf32>
    %475 = arith.addf %473, %474 : vector<2x32xf32>
    %476 = arith.index_cast %444 : i32 to index
    %c0_217 = arith.constant 0 : index
    %477 = vector.load %arg19[%476, %c0_217] : memref<16x32xf32, #tpu.memory_space<vmem>>, vector<2x32xf32>
    tpu.vector_store %arg19[%476, %c0_217], %475 {strides = array<i32>} : memref<16x32xf32, #tpu.memory_space<vmem>>, vector<2x32xf32>,
    %c4_i32_218 = arith.constant 4 : i32
    %c2_i32_219 = arith.constant 2 : i32
    %478 = arith.muli %c4_i32_218, %c2_i32_219 : i32
    %479 = arith.index_cast %478 : i32 to index
    %c0_220 = arith.constant 0 : index
    %480 = vector.load %arg15[%479, %c0_220] : memref<16x32xf32, #tpu.memory_space<vmem>>, vector<2x32xf32>
    %481 = arith.index_cast %478 : i32 to index
    %c0_221 = arith.constant 0 : index
    %482 = vector.load %arg16[%481, %c0_221] : memref<16x32xf32, #tpu.memory_space<vmem>>, vector<2x32xf32>
    %483 = arith.index_cast %478 : i32 to index
    %c0_222 = arith.constant 0 : index
    %484 = vector.load %arg17[%483, %c0_222] : memref<16x32xf32, #tpu.memory_space<vmem>>, vector<2x32xf32>
    %cst_223 = arith.constant dense<0.000000e+00> : vector<2x32xf32>
    %485 = tpu.matmul %475, %335, %cst_223 {dimension_numbers = #tpu.dot_dimension_numbers<[1], [0], [0], [1], [0, 0, 1, 1], [], []>} : vector<2x32xf32>, vector<32x32xf32>, vector<2x32xf32> -> vector<2x32xf32>
    %cst_224 = arith.constant dense<0.000000e+00> : vector<2x32xf32>
    %486 = tpu.matmul %475, %337, %cst_224 {dimension_numbers = #tpu.dot_dimension_numbers<[1], [0], [0], [1], [0, 0, 1, 1], [], []>} : vector<2x32xf32>, vector<32x32xf32>, vector<2x32xf32> -> vector<2x32xf32>
    %cst_225 = arith.constant dense<0.000000e+00> : vector<2x32xf32>
    %487 = tpu.matmul %475, %339, %cst_225 {dimension_numbers = #tpu.dot_dimension_numbers<[1], [0], [0], [1], [0, 0, 1, 1], [], []>} : vector<2x32xf32>, vector<32x32xf32>, vector<2x32xf32> -> vector<2x32xf32>
    %488 = vector.broadcast %340 : vector<1x32xf32> to vector<2x32xf32>
    %489 = arith.addf %487, %488 : vector<2x32xf32>
    %490 = arith.addf %480, %485 : vector<2x32xf32>
    %491 = arith.negf %490 : vector<2x32xf32>
    %492 = math.exp %491 : vector<2x32xf32>
    %cst_226 = arith.constant 1.000000e+00 : f32
    %493 = vector.broadcast %cst_226 : f32 to vector<2x32xf32>
    %494 = arith.addf %493, %492 : vector<2x32xf32>
    %495 = arith.divf %493, %494 : vector<2x32xf32>
    %496 = arith.addf %482, %486 : vector<2x32xf32>
    %497 = arith.negf %496 : vector<2x32xf32>
    %498 = math.exp %497 : vector<2x32xf32>
    %cst_227 = arith.constant 1.000000e+00 : f32
    %499 = vector.broadcast %cst_227 : f32 to vector<2x32xf32>
    %500 = arith.addf %499, %498 : vector<2x32xf32>
    %501 = arith.divf %499, %500 : vector<2x32xf32>
    %502 = arith.mulf %495, %489 : vector<2x32xf32>
    %503 = arith.addf %484, %502 : vector<2x32xf32>
    %504 = math.tanh %503 : vector<2x32xf32>
    %cst_228 = arith.constant 1.000000e+00 : f32
    %505 = vector.broadcast %cst_228 : f32 to vector<2x32xf32>
    %506 = arith.subf %505, %501 : vector<2x32xf32>
    %507 = arith.mulf %506, %504 : vector<2x32xf32>
    %508 = arith.mulf %501, %475 : vector<2x32xf32>
    %509 = arith.addf %507, %508 : vector<2x32xf32>
    %510 = arith.index_cast %478 : i32 to index
    %c0_229 = arith.constant 0 : index
    %511 = vector.load %arg19[%510, %c0_229] : memref<16x32xf32, #tpu.memory_space<vmem>>, vector<2x32xf32>
    tpu.vector_store %arg19[%510, %c0_229], %509 {strides = array<i32>} : memref<16x32xf32, #tpu.memory_space<vmem>>, vector<2x32xf32>,
    %c5_i32_230 = arith.constant 5 : i32
    %c2_i32_231 = arith.constant 2 : i32
    %512 = arith.muli %c5_i32_230, %c2_i32_231 : i32
    %513 = arith.index_cast %512 : i32 to index
    %c0_232 = arith.constant 0 : index
    %514 = vector.load %arg15[%513, %c0_232] : memref<16x32xf32, #tpu.memory_space<vmem>>, vector<2x32xf32>
    %515 = arith.index_cast %512 : i32 to index
    %c0_233 = arith.constant 0 : index
    %516 = vector.load %arg16[%515, %c0_233] : memref<16x32xf32, #tpu.memory_space<vmem>>, vector<2x32xf32>
    %517 = arith.index_cast %512 : i32 to index
    %c0_234 = arith.constant 0 : index
    %518 = vector.load %arg17[%517, %c0_234] : memref<16x32xf32, #tpu.memory_space<vmem>>, vector<2x32xf32>
    %cst_235 = arith.constant dense<0.000000e+00> : vector<2x32xf32>
    %519 = tpu.matmul %509, %335, %cst_235 {dimension_numbers = #tpu.dot_dimension_numbers<[1], [0], [0], [1], [0, 0, 1, 1], [], []>} : vector<2x32xf32>, vector<32x32xf32>, vector<2x32xf32> -> vector<2x32xf32>
    %cst_236 = arith.constant dense<0.000000e+00> : vector<2x32xf32>
    %520 = tpu.matmul %509, %337, %cst_236 {dimension_numbers = #tpu.dot_dimension_numbers<[1], [0], [0], [1], [0, 0, 1, 1], [], []>} : vector<2x32xf32>, vector<32x32xf32>, vector<2x32xf32> -> vector<2x32xf32>
    %cst_237 = arith.constant dense<0.000000e+00> : vector<2x32xf32>
    %521 = tpu.matmul %509, %339, %cst_237 {dimension_numbers = #tpu.dot_dimension_numbers<[1], [0], [0], [1], [0, 0, 1, 1], [], []>} : vector<2x32xf32>, vector<32x32xf32>, vector<2x32xf32> -> vector<2x32xf32>
    %522 = vector.broadcast %340 : vector<1x32xf32> to vector<2x32xf32>
    %523 = arith.addf %521, %522 : vector<2x32xf32>
    %524 = arith.addf %514, %519 : vector<2x32xf32>
    %525 = arith.negf %524 : vector<2x32xf32>
    %526 = math.exp %525 : vector<2x32xf32>
    %cst_238 = arith.constant 1.000000e+00 : f32
    %527 = vector.broadcast %cst_238 : f32 to vector<2x32xf32>
    %528 = arith.addf %527, %526 : vector<2x32xf32>
    %529 = arith.divf %527, %528 : vector<2x32xf32>
    %530 = arith.addf %516, %520 : vector<2x32xf32>
    %531 = arith.negf %530 : vector<2x32xf32>
    %532 = math.exp %531 : vector<2x32xf32>
    %cst_239 = arith.constant 1.000000e+00 : f32
    %533 = vector.broadcast %cst_239 : f32 to vector<2x32xf32>
    %534 = arith.addf %533, %532 : vector<2x32xf32>
    %535 = arith.divf %533, %534 : vector<2x32xf32>
    %536 = arith.mulf %529, %523 : vector<2x32xf32>
    %537 = arith.addf %518, %536 : vector<2x32xf32>
    %538 = math.tanh %537 : vector<2x32xf32>
    %cst_240 = arith.constant 1.000000e+00 : f32
    %539 = vector.broadcast %cst_240 : f32 to vector<2x32xf32>
    %540 = arith.subf %539, %535 : vector<2x32xf32>
    %541 = arith.mulf %540, %538 : vector<2x32xf32>
    %542 = arith.mulf %535, %509 : vector<2x32xf32>
    %543 = arith.addf %541, %542 : vector<2x32xf32>
    %544 = arith.index_cast %512 : i32 to index
    %c0_241 = arith.constant 0 : index
    %545 = vector.load %arg19[%544, %c0_241] : memref<16x32xf32, #tpu.memory_space<vmem>>, vector<2x32xf32>
    tpu.vector_store %arg19[%544, %c0_241], %543 {strides = array<i32>} : memref<16x32xf32, #tpu.memory_space<vmem>>, vector<2x32xf32>,
    %c6_i32_242 = arith.constant 6 : i32
    %c2_i32_243 = arith.constant 2 : i32
    %546 = arith.muli %c6_i32_242, %c2_i32_243 : i32
    %547 = arith.index_cast %546 : i32 to index
    %c0_244 = arith.constant 0 : index
    %548 = vector.load %arg15[%547, %c0_244] : memref<16x32xf32, #tpu.memory_space<vmem>>, vector<2x32xf32>
    %549 = arith.index_cast %546 : i32 to index
    %c0_245 = arith.constant 0 : index
    %550 = vector.load %arg16[%549, %c0_245] : memref<16x32xf32, #tpu.memory_space<vmem>>, vector<2x32xf32>
    %551 = arith.index_cast %546 : i32 to index
    %c0_246 = arith.constant 0 : index
    %552 = vector.load %arg17[%551, %c0_246] : memref<16x32xf32, #tpu.memory_space<vmem>>, vector<2x32xf32>
    %cst_247 = arith.constant dense<0.000000e+00> : vector<2x32xf32>
    %553 = tpu.matmul %543, %335, %cst_247 {dimension_numbers = #tpu.dot_dimension_numbers<[1], [0], [0], [1], [0, 0, 1, 1], [], []>} : vector<2x32xf32>, vector<32x32xf32>, vector<2x32xf32> -> vector<2x32xf32>
    %cst_248 = arith.constant dense<0.000000e+00> : vector<2x32xf32>
    %554 = tpu.matmul %543, %337, %cst_248 {dimension_numbers = #tpu.dot_dimension_numbers<[1], [0], [0], [1], [0, 0, 1, 1], [], []>} : vector<2x32xf32>, vector<32x32xf32>, vector<2x32xf32> -> vector<2x32xf32>
    %cst_249 = arith.constant dense<0.000000e+00> : vector<2x32xf32>
    %555 = tpu.matmul %543, %339, %cst_249 {dimension_numbers = #tpu.dot_dimension_numbers<[1], [0], [0], [1], [0, 0, 1, 1], [], []>} : vector<2x32xf32>, vector<32x32xf32>, vector<2x32xf32> -> vector<2x32xf32>
    %556 = vector.broadcast %340 : vector<1x32xf32> to vector<2x32xf32>
    %557 = arith.addf %555, %556 : vector<2x32xf32>
    %558 = arith.addf %548, %553 : vector<2x32xf32>
    %559 = arith.negf %558 : vector<2x32xf32>
    %560 = math.exp %559 : vector<2x32xf32>
    %cst_250 = arith.constant 1.000000e+00 : f32
    %561 = vector.broadcast %cst_250 : f32 to vector<2x32xf32>
    %562 = arith.addf %561, %560 : vector<2x32xf32>
    %563 = arith.divf %561, %562 : vector<2x32xf32>
    %564 = arith.addf %550, %554 : vector<2x32xf32>
    %565 = arith.negf %564 : vector<2x32xf32>
    %566 = math.exp %565 : vector<2x32xf32>
    %cst_251 = arith.constant 1.000000e+00 : f32
    %567 = vector.broadcast %cst_251 : f32 to vector<2x32xf32>
    %568 = arith.addf %567, %566 : vector<2x32xf32>
    %569 = arith.divf %567, %568 : vector<2x32xf32>
    %570 = arith.mulf %563, %557 : vector<2x32xf32>
    %571 = arith.addf %552, %570 : vector<2x32xf32>
    %572 = math.tanh %571 : vector<2x32xf32>
    %cst_252 = arith.constant 1.000000e+00 : f32
    %573 = vector.broadcast %cst_252 : f32 to vector<2x32xf32>
    %574 = arith.subf %573, %569 : vector<2x32xf32>
    %575 = arith.mulf %574, %572 : vector<2x32xf32>
    %576 = arith.mulf %569, %543 : vector<2x32xf32>
    %577 = arith.addf %575, %576 : vector<2x32xf32>
    %578 = arith.index_cast %546 : i32 to index
    %c0_253 = arith.constant 0 : index
    %579 = vector.load %arg19[%578, %c0_253] : memref<16x32xf32, #tpu.memory_space<vmem>>, vector<2x32xf32>
    tpu.vector_store %arg19[%578, %c0_253], %577 {strides = array<i32>} : memref<16x32xf32, #tpu.memory_space<vmem>>, vector<2x32xf32>,
    %c7_i32_254 = arith.constant 7 : i32
    %c2_i32_255 = arith.constant 2 : i32
    %580 = arith.muli %c7_i32_254, %c2_i32_255 : i32
    %581 = arith.index_cast %580 : i32 to index
    %c0_256 = arith.constant 0 : index
    %582 = vector.load %arg15[%581, %c0_256] : memref<16x32xf32, #tpu.memory_space<vmem>>, vector<2x32xf32>
    %583 = arith.index_cast %580 : i32 to index
    %c0_257 = arith.constant 0 : index
    %584 = vector.load %arg16[%583, %c0_257] : memref<16x32xf32, #tpu.memory_space<vmem>>, vector<2x32xf32>
    %585 = arith.index_cast %580 : i32 to index
    %c0_258 = arith.constant 0 : index
    %586 = vector.load %arg17[%585, %c0_258] : memref<16x32xf32, #tpu.memory_space<vmem>>, vector<2x32xf32>
    %cst_259 = arith.constant dense<0.000000e+00> : vector<2x32xf32>
    %587 = tpu.matmul %577, %335, %cst_259 {dimension_numbers = #tpu.dot_dimension_numbers<[1], [0], [0], [1], [0, 0, 1, 1], [], []>} : vector<2x32xf32>, vector<32x32xf32>, vector<2x32xf32> -> vector<2x32xf32>
    %cst_260 = arith.constant dense<0.000000e+00> : vector<2x32xf32>
    %588 = tpu.matmul %577, %337, %cst_260 {dimension_numbers = #tpu.dot_dimension_numbers<[1], [0], [0], [1], [0, 0, 1, 1], [], []>} : vector<2x32xf32>, vector<32x32xf32>, vector<2x32xf32> -> vector<2x32xf32>
    %cst_261 = arith.constant dense<0.000000e+00> : vector<2x32xf32>
    %589 = tpu.matmul %577, %339, %cst_261 {dimension_numbers = #tpu.dot_dimension_numbers<[1], [0], [0], [1], [0, 0, 1, 1], [], []>} : vector<2x32xf32>, vector<32x32xf32>, vector<2x32xf32> -> vector<2x32xf32>
    %590 = vector.broadcast %340 : vector<1x32xf32> to vector<2x32xf32>
    %591 = arith.addf %589, %590 : vector<2x32xf32>
    %592 = arith.addf %582, %587 : vector<2x32xf32>
    %593 = arith.negf %592 : vector<2x32xf32>
    %594 = math.exp %593 : vector<2x32xf32>
    %cst_262 = arith.constant 1.000000e+00 : f32
    %595 = vector.broadcast %cst_262 : f32 to vector<2x32xf32>
    %596 = arith.addf %595, %594 : vector<2x32xf32>
    %597 = arith.divf %595, %596 : vector<2x32xf32>
    %598 = arith.addf %584, %588 : vector<2x32xf32>
    %599 = arith.negf %598 : vector<2x32xf32>
    %600 = math.exp %599 : vector<2x32xf32>
    %cst_263 = arith.constant 1.000000e+00 : f32
    %601 = vector.broadcast %cst_263 : f32 to vector<2x32xf32>
    %602 = arith.addf %601, %600 : vector<2x32xf32>
    %603 = arith.divf %601, %602 : vector<2x32xf32>
    %604 = arith.mulf %597, %591 : vector<2x32xf32>
    %605 = arith.addf %586, %604 : vector<2x32xf32>
    %606 = math.tanh %605 : vector<2x32xf32>
    %cst_264 = arith.constant 1.000000e+00 : f32
    %607 = vector.broadcast %cst_264 : f32 to vector<2x32xf32>
    %608 = arith.subf %607, %603 : vector<2x32xf32>
    %609 = arith.mulf %608, %606 : vector<2x32xf32>
    %610 = arith.mulf %603, %577 : vector<2x32xf32>
    %611 = arith.addf %609, %610 : vector<2x32xf32>
    %612 = arith.index_cast %580 : i32 to index
    %c0_265 = arith.constant 0 : index
    %613 = vector.load %arg19[%612, %c0_265] : memref<16x32xf32, #tpu.memory_space<vmem>>, vector<2x32xf32>
    tpu.vector_store %arg19[%612, %c0_265], %611 {strides = array<i32>} : memref<16x32xf32, #tpu.memory_space<vmem>>, vector<2x32xf32>,
    %c8_i32_266 = arith.constant 8 : i32
    %c0_267 = arith.constant 0 : index
    %c0_268 = arith.constant 0 : index
    %614 = vector.load %arg19[%c0_267, %c0_268] : memref<16x32xf32, #tpu.memory_space<vmem>>, vector<16x32xf32>
    %c0_269 = arith.constant 0 : index
    %c0_270 = arith.constant 0 : index
    %615 = vector.load %arg10[%c0_269, %c0_270] : memref<32x64xf32, #tpu.memory_space<vmem>>, vector<32x64xf32>
    %cst_271 = arith.constant dense<0.000000e+00> : vector<16x64xf32>
    %616 = tpu.matmul %614, %615, %cst_271 {dimension_numbers = #tpu.dot_dimension_numbers<[1], [0], [0], [1], [0, 0, 1, 1], [], []>} : vector<16x32xf32>, vector<32x64xf32>, vector<16x64xf32> -> vector<16x64xf32>
    %c0_272 = arith.constant 0 : index
    %c0_273 = arith.constant 0 : index
    %617 = vector.load %arg11[%c0_272, %c0_273] : memref<1x64xf32, #tpu.memory_space<vmem>>, vector<1x64xf32>
    %618 = vector.broadcast %617 : vector<1x64xf32> to vector<16x64xf32>
    %619 = arith.addf %616, %618 : vector<16x64xf32>
    %cst_274 = arith.constant 0.000000e+00 : f32
    %620 = vector.broadcast %cst_274 : f32 to vector<16x64xf32>
    %621 = arith.maximumf %619, %620 : vector<16x64xf32>
    %c0_275 = arith.constant 0 : index
    %c0_276 = arith.constant 0 : index
    %622 = vector.load %arg12[%c0_275, %c0_276] : memref<64x128xf32, #tpu.memory_space<vmem>>, vector<64x128xf32>
    %cst_277 = arith.constant dense<0.000000e+00> : vector<16x128xf32>
    %623 = tpu.matmul %621, %622, %cst_277 {dimension_numbers = #tpu.dot_dimension_numbers<[1], [0], [0], [1], [0, 0, 1, 1], [], []>} : vector<16x64xf32>, vector<64x128xf32>, vector<16x128xf32> -> vector<16x128xf32>
    %c0_278 = arith.constant 0 : index
    %c0_279 = arith.constant 0 : index
    %624 = vector.load %arg13[%c0_278, %c0_279] : memref<1x128xf32, #tpu.memory_space<vmem>>, vector<1x128xf32>
    %625 = vector.broadcast %624 : vector<1x128xf32> to vector<16x128xf32>
    %626 = arith.addf %623, %625 : vector<16x128xf32>
    %627 = tpu.iota {dimensions = array<i32: 1>} : vector<16x128xi32>
    %c12_i32 = arith.constant 12 : i32
    %628 = vector.broadcast %c12_i32 : i32 to vector<16x128xi32>
    %629 = arith.cmpi sge, %627, %628 : vector<16x128xi32>
    %c48_i32 = arith.constant 48 : i32
    %630 = vector.broadcast %c48_i32 : i32 to vector<16x128xi32>
    %631 = arith.cmpi slt, %627, %630 : vector<16x128xi32>
    %632 = arith.andi %629, %631 : vector<16x128xi1>
    %633 = math.tanh %626 : vector<16x128xf32>
    %634 = arith.select %632, %633, %626 : vector<16x128xi1>, vector<16x128xf32>
    %c0_280 = arith.constant 0 : index
    %c0_281 = arith.constant 0 : index
    %c0_282 = arith.constant 0 : index
    %635 = vector.load %arg14[%c0_280, %c0_281, %c0_282] : memref<1x16x128xf32, #tpu.memory_space<vmem>>, vector<1x16x128xf32>
    %636 = vector.shape_cast %635 : vector<1x16x128xf32> to vector<16x128xf32>
    %637 = vector.shape_cast %634 : vector<16x128xf32> to vector<1x16x128xf32>
    tpu.vector_store %arg14[%c0_280, %c0_281, %c0_282], %637 {strides = array<i32>} : memref<1x16x128xf32, #tpu.memory_space<vmem>>, vector<1x16x128xf32>,
    return
  }
  func.func @transform_0(%arg0: i32) -> (i32, i32, i32, i32) {
    %c0_i32 = arith.constant 0 : i32
    %c0_i32_0 = arith.constant 0 : i32
    %c0_i32_1 = arith.constant 0 : i32
    %c0_i32_2 = arith.constant 0 : i32
    return %arg0, %c0_i32, %c0_i32_0, %c0_i32_1 : i32, i32, i32, i32
  }
  func.func @transform_1(%arg0: i32) -> (i32, i32, i32) {
    %c0_i32 = arith.constant 0 : i32
    %c0_i32_0 = arith.constant 0 : i32
    %c0_i32_1 = arith.constant 0 : i32
    %c0_i32_2 = arith.constant 0 : i32
    return %c0_i32, %c0_i32_0, %c0_i32_1 : i32, i32, i32
  }
  func.func @transform_2(%arg0: i32) -> (i32, i32, i32) {
    %c0_i32 = arith.constant 0 : i32
    %c0_i32_0 = arith.constant 0 : i32
    %c0_i32_1 = arith.constant 0 : i32
    %c0_i32_2 = arith.constant 0 : i32
    return %c0_i32, %c0_i32_0, %c0_i32_1 : i32, i32, i32
  }
  func.func @transform_3(%arg0: i32) -> (i32, i32, i32) {
    %c0_i32 = arith.constant 0 : i32
    %c0_i32_0 = arith.constant 0 : i32
    %c0_i32_1 = arith.constant 0 : i32
    %c0_i32_2 = arith.constant 0 : i32
    return %c0_i32, %c0_i32_0, %c0_i32_1 : i32, i32, i32
  }
  func.func @transform_4(%arg0: i32) -> (i32, i32) {
    %c0_i32 = arith.constant 0 : i32
    %c0_i32_0 = arith.constant 0 : i32
    %c0_i32_1 = arith.constant 0 : i32
    return %c0_i32, %c0_i32_0 : i32, i32
  }
  func.func @transform_5(%arg0: i32) -> (i32, i32, i32) {
    %c0_i32 = arith.constant 0 : i32
    %c0_i32_0 = arith.constant 0 : i32
    %c0_i32_1 = arith.constant 0 : i32
    %c0_i32_2 = arith.constant 0 : i32
    return %c0_i32, %c0_i32_0, %c0_i32_1 : i32, i32, i32
  }
  func.func @transform_6(%arg0: i32) -> (i32, i32, i32) {
    %c0_i32 = arith.constant 0 : i32
    %c0_i32_0 = arith.constant 0 : i32
    %c0_i32_1 = arith.constant 0 : i32
    %c0_i32_2 = arith.constant 0 : i32
    return %c0_i32, %c0_i32_0, %c0_i32_1 : i32, i32, i32
  }
  func.func @transform_7(%arg0: i32) -> (i32, i32, i32) {
    %c0_i32 = arith.constant 0 : i32
    %c0_i32_0 = arith.constant 0 : i32
    %c0_i32_1 = arith.constant 0 : i32
    %c0_i32_2 = arith.constant 0 : i32
    return %c0_i32, %c0_i32_0, %c0_i32_1 : i32, i32, i32
  }
  func.func @transform_8(%arg0: i32) -> (i32, i32) {
    %c0_i32 = arith.constant 0 : i32
    %c0_i32_0 = arith.constant 0 : i32
    %c0_i32_1 = arith.constant 0 : i32
    return %c0_i32, %c0_i32_0 : i32, i32
  }
  func.func @transform_9(%arg0: i32) -> (i32, i32) {
    %c0_i32 = arith.constant 0 : i32
    %c0_i32_0 = arith.constant 0 : i32
    %c0_i32_1 = arith.constant 0 : i32
    return %c0_i32, %c0_i32_0 : i32, i32
  }
  func.func @transform_10(%arg0: i32) -> (i32, i32) {
    %c0_i32 = arith.constant 0 : i32
    %c0_i32_0 = arith.constant 0 : i32
    %c0_i32_1 = arith.constant 0 : i32
    return %c0_i32, %c0_i32_0 : i32, i32
  }
  func.func @transform_11(%arg0: i32) -> (i32, i32) {
    %c0_i32 = arith.constant 0 : i32
    %c0_i32_0 = arith.constant 0 : i32
    %c0_i32_1 = arith.constant 0 : i32
    return %c0_i32, %c0_i32_0 : i32, i32
  }
  func.func @transform_12(%arg0: i32) -> (i32, i32) {
    %c0_i32 = arith.constant 0 : i32
    %c0_i32_0 = arith.constant 0 : i32
    %c0_i32_1 = arith.constant 0 : i32
    return %c0_i32, %c0_i32_0 : i32, i32
  }
  func.func @transform_13(%arg0: i32) -> (i32, i32, i32) {
    %c0_i32 = arith.constant 0 : i32
    %c0_i32_0 = arith.constant 0 : i32
    %c0_i32_1 = arith.constant 0 : i32
    return %arg0, %c0_i32, %c0_i32_0 : i32, i32, i32
  }
}

</mosaic_0001>

<bundles_post_ra>
// kernel: seld_decoder_forward.1
= control target key start
LH: loop header
LB: loop body
LE: loop exit
PB: predicated region body
PF: predicated region fallthrough
CT: control target
= control target key end

     0   :  { %vm60_vm0 = vcmask 257024   ;;  %v2720_v12 = vmov 4.0   ;;  %vm220_vm2 = vcmask 1041409   ;;  %vm222_vm3 = vcmask 1042434   ;;  %s3628_s1 = inlined_call_operand.vmem [shape: f32[3,32,32], index: 1, kind: input, shape index: {}]   ;;  %s3629_s0 = inlined_call_operand.vmem [shape: f32[1,16,4,32], index: 0, kind: input, shape index: {}]   ;;  %s3630_s2 = inlined_call_operand.vmem [shape: f32[3,32,32], index: 2, kind: input, shape index: {}]   ;;  %s3631_s3 = inlined_call_operand.vmem [shape: f32[3,1,32], index: 3, kind: input, shape index: {}]   ;;  %s3632_s4 = inlined_call_operand.vmem [shape: f32[1,32], index: 4, kind: input, shape index: {}]   ;;  %s3633_s5 = inlined_call_operand.vmem [shape: f32[3,32,32], index: 5, kind: input, shape index: {}]   ;;  %s3634_s7 = inlined_call_operand.vmem [shape: f32[3,1,32], index: 7, kind: input, shape index: {}]   ;;  %s3635_s6 = inlined_call_operand.vmem [shape: f32[3,32,32], index: 6, kind: input, shape index: {}]   ;;  %s3636_s8 = inlined_call_operand.vmem [shape: f32[1,32], index: 8, kind: input, shape index: {}]   ;;  %s3637_s9 = inlined_call_operand.vmem [shape: f32[32,64], index: 9, kind: input, shape index: {}]   ;;  %s3638_s10 = inlined_call_operand.vmem [shape: f32[1,64], index: 10, kind: input, shape index: {}]   ;;  %s3639_s11 = inlined_call_operand.vmem [shape: f32[64,128], index: 11, kind: input, shape index: {}]   ;;  %s3640_s12 = inlined_call_operand.vmem [shape: f32[1,128], index: 12, kind: input, shape index: {}]   ;;  %s3641_s13 = inlined_call_operand.vmem [shape: f32[1,16,128], index: 13, kind: output, shape index: {}]  }
   0x1   :  { %v199_v0 = vld [vmem:[%s3628_s1 + $0x18] sm:$0xff]  ;;  %v198_v1 = vld [vmem:[%s3628_s1 + $0x10] sm:$0xff]  ;;  %v197_v2 = vld [vmem:[%s3628_s1 + $0x8] sm:$0xff]  ;;  %2550 = vrcp.f32 %v2720_v12  ;;  %vm224_vm4 = vcmask 1043459   ;;  %vm226_vm5 = vcmask 1044484   ;;  %vm228_vm6 = vcmask 1045509  }
   0x2   :  { %2534 = vmatpush.msra.mxu3 %v199_v0  ;;  %258 = vmatpush.msra.mxu0 %v199_v0  ;;  %v2413_v3 = vld [vmem:[%s3628_s1 + $0x38] sm:$0xff]  ;;  %v52_v4 = vld [vmem:[%s3629_s0 + $0x20] sm:$0xf]  ;;  %v53_v6 = vld [vmem:[%s3629_s0 + $0x24] sm:$0xf]  ;;  %vm230_vm7 = vcmask 1046534  }
   0x3   :  { %v196_v5 = vld [vmem:[%s3628_s1] sm:$0xff]  ;;  %293 = vmatpush.msra.mxu2 %v2413_v3  ;;  %v54_v7 = vld [vmem:[%s3629_s0 + $0x28] sm:$0xf]  ;;  %v55_v8 = vld [vmem:[%s3629_s0 + $0x2c] sm:$0xf]  ;;  %v117_v14 = vsel %vm60_vm0, %v52_v4, 0.0 }
   0x4   :  { %2535 = vmatpush.msra.mxu3 %v198_v1  ;;  %259 = vmatpush.msra.mxu0 %v198_v1  ;;  %v56_v9 = vld [vmem:[%s3629_s0 + $0x30] sm:$0xf]  ;;  %v57_v10 = vld [vmem:[%s3629_s0 + $0x34] sm:$0xf]  ;;  %v58_v11 = vld [vmem:[%s3629_s0 + $0x38] sm:$0xf] }
   0x5   :  { %v59_v13 = vld [vmem:[%s3629_s0 + $0x3c] sm:$0xf]  ;;  %v124_v15 = vsel %vm60_vm0, %v53_v6, 0.0  ;;  %v131_v16 = vsel %vm60_vm0, %v54_v7, 0.0  ;;  %v138_v17 = vsel %vm60_vm0, %v55_v8, 0.0  ;;  %v118_v18 = vrot.slane %v117_v14, 4 }
   0x6   :  { %2536 = vmatpush.msra.mxu3 %v197_v2  ;;  %v125_v19 = vrot.slane %v124_v15, 4  ;;  %v132_v20 = vrot.slane %v131_v16, 4  ;;  %v139_v21 = vrot.slane %v138_v17, 4  ;;  %v2838_v22 = vld [vmem:[%s3630_s2 + $0x18] sm:$0xff]  ;;  %260 = vmatpush.msra.mxu0 %v197_v2  ;;  %v2412_v23 = vld [vmem:[%s3628_s1 + $0x30] sm:$0xff]  ;;  %v145_v24 = vsel %vm60_vm0, %v56_v9, 0.0 }
   0x7   :  { %v152_v25 = vsel %vm60_vm0, %v57_v10, 0.0  ;;  %v159_v26 = vsel %vm60_vm0, %v58_v11, 0.0  ;;  %v166_v27 = vsel %vm60_vm0, %v59_v13, 0.0  ;;  %294 = vmatpush.msra.mxu2 %v2412_v23  ;;  %v2411_v28 = vld [vmem:[%s3628_s1 + $0x28] sm:$0xff]  ;;  %492 = vmatpush.msra.mxu1 %v2838_v22  ;;  %v119_v29 = vadd.f32 %v118_v18, %v117_v14  ;;  %v2854_v33 = vld [vmem:[%s3630_s2 + $0x10] sm:$0xff]  ;;  %v2857_v38 = vpop.eup %2550 }
   0x8   :  { %2537 = vmatpush.msra.mxu3 %v196_v5  ;;  %v126_v30 = vadd.f32 %v125_v19, %v124_v15  ;;  %v133_v31 = vadd.f32 %v132_v20, %v131_v16  ;;  %v140_v32 = vadd.f32 %v139_v21, %v138_v17  ;;  %v146_v34 = vrot.slane %v145_v24, 4  ;;  %261 = vmatpush.msra.mxu0 %v196_v5  ;;  %v44_v63 = vld [vmem:[%s3629_s0] sm:$0xf]  ;;  %v45_v3 = vld [vmem:[%s3629_s0 + $0x4] sm:$0xf]  ;;  %v2893_v19 = vld [vmem:[%s3630_s2 + $0x8] sm:$0xff] }
   0x9   :  { %v153_v35 = vrot.slane %v152_v25, 4  ;;  %v160_v36 = vrot.slane %v159_v26, 4  ;;  %v167_v37 = vrot.slane %v166_v27, 4  ;;  %v120_v39 = vrot.slane %v119_v29, 2  ;;  %295 = vmatpush.msra.mxu2 %v2411_v28  ;;  %493 = vmatpush.msra.mxu1 %v2854_v33  ;;  %v46_v4 = vld [vmem:[%s3629_s0 + $0x8] sm:$0xf] }
   0xa   :  { %374 = vmatpush.msrb.mxu3 %v2838_v22  ;;  %v127_v40 = vrot.slane %v126_v30, 2  ;;  %v134_v41 = vrot.slane %v133_v31, 2  ;;  %v141_v42 = vrot.slane %v140_v32, 2  ;;  %v147_v43 = vadd.f32 %v146_v34, %v145_v24  ;;  %v47_v9 = vld [vmem:[%s3629_s0 + $0xc] sm:$0xf]  ;;  %v2410_v20 = vld [vmem:[%s3628_s1 + $0x20] sm:$0xff] }
   0xb   :  { %v154_v44 = vadd.f32 %v153_v35, %v152_v25  ;;  %v161_v45 = vadd.f32 %v160_v36, %v159_v26  ;;  %v168_v46 = vadd.f32 %v167_v37, %v166_v27  ;;  %v121_v47 = vadd.f32 %v120_v39, %v119_v29  ;;  %v48_v12 = vld [vmem:[%s3629_s0 + $0x10] sm:$0xf]  ;;  %v49_v13 = vld [vmem:[%s3629_s0 + $0x14] sm:$0xf]  ;;  %v2901_v21 = vld [vmem:[%s3630_s2] sm:$0xff]  ;;  %296 = vmatpush.msra.mxu2 %v2410_v20 }
   0xc   :  { %375 = vmatpush.msrb.mxu3 %v2854_v33  ;;  %v128_v48 = vadd.f32 %v127_v40, %v126_v30  ;;  %v135_v49 = vadd.f32 %v134_v41, %v133_v31  ;;  %v142_v50 = vadd.f32 %v141_v42, %v140_v32  ;;  %v148_v51 = vrot.slane %v147_v43, 2  ;;  %v50_v24 = vld [vmem:[%s3629_s0 + $0x18] sm:$0xf]  ;;  %494 = vmatpush.msra.mxu1 %v2893_v19  ;;  %v2419_v39 = vld [vmem:[%s3628_s1 + $0x50] sm:$0xff] }
   0xd   :  { %v155_v52 = vrot.slane %v154_v44, 2  ;;  %v162_v53 = vrot.slane %v161_v45, 2  ;;  %v169_v54 = vrot.slane %v168_v46, 2  ;;  %v122_v55 = vrot.slane %v121_v47, 1  ;;  %v2420_v32 = vld [vmem:[%s3628_s1 + $0x58] sm:$0xff] }
   0xe   :  { %v129_v56 = vrot.slane %v128_v48, 1  ;;  %v136_v57 = vrot.slane %v135_v49, 1  ;;  %v143_v58 = vrot.slane %v142_v50, 1  ;;  %v149_v59 = vadd.f32 %v148_v51, %v147_v43  ;;  %376 = vmatpush.msrb.mxu3 %v2893_v19  ;;  %328 = vmatpush.msrb.mxu2 %v2420_v32 }
   0xf   :  { %v156_v60 = vadd.f32 %v155_v52, %v154_v44  ;;  %v163_v61 = vadd.f32 %v162_v53, %v161_v45  ;;  %v170_v62 = vadd.f32 %v169_v54, %v168_v46  ;;  %v2864_v0 = vadd.f32 %v122_v55, %v121_v47  ;;  %v2925_v44 = vld [vmem:[%s3630_s2 + $0x38] sm:$0xff]  ;;  %495 = vmatpush.msra.mxu1 %v2901_v21  ;;  %v2933_v53 = vld [vmem:[%s3630_s2 + $0x30] sm:$0xff] }
  0x10   :  { %v2866_v1 = vadd.f32 %v129_v56, %v128_v48  ;;  %v2868_v2 = vadd.f32 %v136_v57, %v135_v49  ;;  %v150_v5 = vrot.slane %v149_v59, 1  ;;  %v2879_v10 = vadd.f32 %v143_v58, %v142_v50  ;;  %377 = vmatpush.msrb.mxu3 %v2901_v21  ;;  %329 = vmatpush.msrb.mxu2 %v2419_v39  ;;  %v2988_v39 = vld [vmem:[%s3630_s2 + $0x58] sm:$0xff] }
  0x11   :  { %v157_v6 = vrot.slane %v156_v60, 1  ;;  %v164_v7 = vrot.slane %v163_v61, 1  ;;  %v171_v8 = vrot.slane %v170_v62, 1  ;;  %v174_v11 = vmul.f32 4.0, %v2857_v38  ;;  %626 = vmatpush.msrb.mxu1 %v2925_v44  ;;  %417 = vmatpush.msrb.mxu0 %v2988_v39 }
  0x12   :  { %vm178_vm1 = vweird.f32 %v2857_v38  ;;  %v61_v14 = vsel %vm60_vm0, %v44_v63, 0.0  ;;  %v151_v15 = vadd.f32 %v150_v5, %v149_v59  ;;  %v68_v26 = vsel %vm60_vm0, %v45_v3, 0.0 }
  0x13   :  { %v158_v16 = vadd.f32 %v157_v6, %v156_v60  ;;  %v165_v17 = vadd.f32 %v164_v7, %v163_v61  ;;  %v172_v18 = vadd.f32 %v171_v8, %v170_v62  ;;  %v175_v23 = vsub.f32 1.0, %v174_v11  ;;  %627 = vmatpush.msrb.mxu1 %v2933_v53  ;;  %v2417_v62 = vld [vmem:[%s3628_s1 + $0x40] sm:$0xff] }
  0x14   :  { %v62_v25 = vrot.slane %v61_v14, 4  ;;  %v75_v27 = vsel %vm60_vm0, %v46_v4, 0.0  ;;  %v69_v28 = vrot.slane %v68_v26, 4  ;;  %v82_v30 = vsel %vm60_vm0, %v47_v9, 0.0 }
  0x15   :  { %v76_v29 = vrot.slane %v75_v27, 4  ;;  %v89_v31 = vsel %vm60_vm0, %v48_v12, 0.0  ;;  %v176_v34 = vmul.f32 %v2857_v38, %v175_v23  ;;  %v83_v36 = vrot.slane %v82_v30, 4  ;;  %v2970_v12 = vld [vmem:[%s3630_s2 + $0x20] sm:$0xff] }
  0x16   :  { %v63_v35 = vadd.f32 %v62_v25, %v61_v14  ;;  %v90_v37 = vrot.slane %v89_v31, 4  ;;  %v70_v40 = vadd.f32 %v69_v28, %v68_v26  ;;  %v96_v42 = vsel %vm60_vm0, %v49_v13, 0.0 }
  0x17   :  { %v77_v41 = vadd.f32 %v76_v29, %v75_v27  ;;  %v103_v43 = vsel %vm60_vm0, %v50_v24, 0.0  ;;  %v177_v45 = vadd.f32 %v2857_v38, %v176_v34  ;;  %vm232_vm8 = vcmask 1047559  }
  0x18   :  { %v64_v46 = vrot.slane %v63_v35, 2  ;;  %v84_v47 = vadd.f32 %v83_v36, %v82_v30  ;;  %v91_v48 = vadd.f32 %v90_v37, %v89_v31  ;;  %vm241_vm9 = vcmask 261120  }
  0x19   :  { %v71_v49 = vrot.slane %v70_v40, 2  ;;  %v78_v50 = vrot.slane %v77_v41, 2  ;;  %v97_v51 = vrot.slane %v96_v42, 4  ;;  %v104_v52 = vrot.slane %v103_v43, 4 }
  0x1a   :  { %v2938_v54 = vsel %vm178_vm1, %v2857_v38, %v177_v45  ;;  %v65_v55 = vadd.f32 %v64_v46, %v63_v35  ;;  %v85_v56 = vrot.slane %v84_v47, 2  ;;  %v92_v57 = vrot.slane %v91_v48, 2  ;;  %v2418_v38 = vld [vmem:[%s3628_s1 + $0x48] sm:$0xff] }
  0x1b   :  { %v188_v58 = vmul.f32 %v2938_v54, %v2864_v0  ;;  %v189_v59 = vmul.f32 %v2938_v54, %v2866_v1  ;;  %v190_v60 = vmul.f32 %v2938_v54, %v2868_v2  ;;  %v191_v61 = vmul.f32 %v2938_v54, %v2879_v10  ;;  %v2962_v2 = vld [vmem:[%s3630_s2 + $0x28] sm:$0xff]  ;;  %330 = vmatpush.msrb.mxu2 %v2418_v38 }
  0x1c   :  { %v192_v63 = vmul.f32 %v2938_v54, %v151_v15  ;;  %v193_v0 = vmul.f32 %v2938_v54, %v158_v16  ;;  %v194_v1 = vmul.f32 %v2938_v54, %v165_v17  ;;  %v195_v3 = vmul.f32 %v2938_v54, %v172_v18  ;;  %628 = vmatpush.msrb.mxu1 %v2962_v2  ;;  %v51_v18 = vld [vmem:[%s3629_s0 + $0x1c] sm:$0xf] }
  0x1d   :  { %v234_v4 = vsel %vm220_vm2, %v189_v59, %v188_v58  ;;  %v66_v5 = vrot.slane %v65_v55, 1  ;;  %v72_v6 = vadd.f32 %v71_v49, %v70_v40  ;;  %v79_v7 = vadd.f32 %v78_v50, %v77_v41  ;;  %331 = vmatpush.msrb.mxu2 %v2417_v62  ;;  %v2993_v40 = vld [vmem:[%s3630_s2 + $0x50] sm:$0xff]  ;;  %v3006_v49 = vld [vmem:[%s3630_s2 + $0x48] sm:$0xff] }
  0x1e   :  { %v235_v8 = vsel %vm222_vm3, %v190_v60, %v234_v4  ;;  %v86_v9 = vadd.f32 %v85_v56, %v84_v47  ;;  %v93_v10 = vadd.f32 %v92_v57, %v91_v48  ;;  %v98_v11 = vadd.f32 %v97_v51, %v96_v42  ;;  %629 = vmatpush.msrb.mxu1 %v2970_v12  ;;  %v3015_v57 = vld [vmem:[%s3630_s2 + $0x40] sm:$0xff] }
  0x1f   :  { %v236_v13 = vsel %vm224_vm4, %v191_v61, %v235_v8  ;;  %v67_v14 = vadd.f32 %v66_v5, %v65_v55  ;;  %v73_v15 = vrot.slane %v72_v6, 1  ;;  %v80_v16 = vrot.slane %v79_v7, 1  ;;  %418 = vmatpush.msrb.mxu0 %v2993_v40 }
  0x20   :  { %v237_v17 = vsel %vm226_vm5, %v192_v63, %v236_v13  ;;  %v87_v20 = vrot.slane %v86_v9, 1  ;;  %v94_v23 = vrot.slane %v93_v10, 1  ;;  %v99_v24 = vrot.slane %v98_v11, 2  ;;  %v2541_v13 = vld [vmem:[%s3631_s3 + $0x1] ss:$0 sm:$0xff] }
  0x21   :  { %v238_v25 = vsel %vm228_vm6, %v193_v0, %v237_v17  ;;  %v74_v26 = vadd.f32 %v73_v15, %v72_v6  ;;  %v81_v27 = vadd.f32 %v80_v16, %v79_v7  ;;  %v105_v28 = vadd.f32 %v104_v52, %v103_v43  ;;  %419 = vmatpush.msrb.mxu0 %v3006_v49 }
  0x22   :  { %v239_v29 = vsel %vm230_vm7, %v194_v1, %v238_v25  ;;  %v88_v30 = vadd.f32 %v87_v20, %v86_v9  ;;  %v95_v31 = vadd.f32 %v94_v23, %v93_v10  ;;  %v100_v32 = vadd.f32 %v99_v24, %v98_v11 }
  0x23   :  { %v2981_v34 = vsel %vm232_vm8, %v195_v3, %v239_v29  ;;  %v106_v35 = vrot.slane %v105_v28, 2  ;;  %v110_v36 = vsel %vm60_vm0, %v51_v18, 0.0  ;;  %v180_v37 = vmul.f32 %v2938_v54, %v67_v14  ;;  %420 = vmatpush.msrb.mxu0 %v3015_v57  ;;  %v2542_v29 = vld [vmem:[%s3631_s3 + $0x2] ss:$0 sm:$0xff] }
  0x24   :  { %2409 = vmatmul.msk.f32.vlgmr.msra.gmra.mxu3 %vm241_vm9, %v2981_v34  ;;  %v101_v41 = vrot.slane %v100_v32, 1  ;;  %v111_v42 = vrot.slane %v110_v36, 4  ;;  %v181_v43 = vmul.f32 %v2938_v54, %v74_v26  ;;  %v182_v45 = vmul.f32 %v2938_v54, %v81_v27 }
  0x25   :  { %v107_v46 = vadd.f32 %v106_v35, %v105_v28  ;;  %v183_v47 = vmul.f32 %v2938_v54, %v88_v30  ;;  %v184_v48 = vmul.f32 %v2938_v54, %v95_v31  ;;  %394 = vmatpush.msra.mxu3 %v2925_v44  ;;  %v2721_v3 = vmov 0.0  }
  0x26   :  { %v102_v50 = vadd.f32 %v101_v41, %v100_v32  ;;  %v112_v51 = vadd.f32 %v111_v42, %v110_v36  ;;  %v221_v52 = vsel %vm220_vm2, %v181_v43, %v180_v37  ;;  %vm472_vm2 = vcmask 254976  }
  0x27   :  { %v108_v55 = vrot.slane %v107_v46, 1  ;;  %v223_v56 = vsel %vm222_vm3, %v182_v45, %v221_v52  ;;  %395 = vmatpush.msra.mxu3 %v2933_v53  ;;  %v3080_v45 = vld [vmem:[%s3632_s4] ss:$0 sm:$0xff] }
  0x28   :  { %v113_v58 = vrot.slane %v112_v51, 2  ;;  %v185_v59 = vmul.f32 %v2938_v54, %v102_v50  ;;  %v225_v60 = vsel %vm224_vm4, %v183_v47, %v223_v56 }
  0x29   :  { %v109_v61 = vadd.f32 %v108_v55, %v107_v46  ;;  %v227_v38 = vsel %vm226_vm5, %v184_v48, %v225_v60  ;;  %396 = vmatpush.msra.mxu3 %v2962_v2 }
  0x2a   :  { %v114_v62 = vadd.f32 %v113_v58, %v112_v51  ;;  %v229_v1 = vsel %vm228_vm6, %v185_v59, %v227_v38 }
  0x2b   :  { %v186_v63 = vmul.f32 %v2938_v54, %v109_v61  ;;  %397 = vmatpush.msra.mxu3 %v2970_v12 }
  0x2c   :  { %v115_v0 = vrot.slane %v114_v62, 1  ;;  %378 = vmatmul.f32.vlgmr.msrb.gmra.mxu3 %v2721_v3 }
  0x2d   :  { %532 = vmatpush.msrb.mxu3 %v2988_v39  ;;  %v231_v5 = vsel %vm230_vm7, %v186_v63, %v229_v1 }
  0x2e   :  { %v116_v4 = vadd.f32 %v115_v0, %v114_v62 }
  0x2f   :  { %533 = vmatpush.msrb.mxu3 %v2993_v40 }
  0x30   :  { %v187_v6 = vmul.f32 %v2938_v54, %v116_v4  ;;  %v2540_v54 = vld [vmem:[%s3631_s3] ss:$0 sm:$0xff] }
  0x31   :  { %534 = vmatpush.msrb.mxu3 %v3006_v49 }
  0x32   :  { %v233_v7 = vsel %vm232_vm8, %v187_v6, %v231_v5 }
  0x33   :  { %2408 = vmatmul.msk.f32.vlgmr.msra.gmra.mxu0 %vm241_vm9, %v233_v7  ;;  %2415 = vmatmul.msk.f32.vlgmr.msra.gmra.mxu2 %vm241_vm9, %v233_v7 }
  0x34   :  { %398 = vmatmul.f32.vlgmr.msra.gmra.mxu3 %v2721_v3  ;;  %512 = vmatpush.msra.mxu2 %v2925_v44 }
  0x35   :  { %535 = vmatpush.msrb.mxu3 %v3015_v57  ;;  %606 = vmatpush.msra.mxu0 %v2838_v22 }
  0x36   :  { %513 = vmatpush.msra.mxu2 %v2933_v53 }
  0x37   :  { %720 = vmatpush.msra.mxu3 %v2838_v22  ;;  %607 = vmatpush.msra.mxu0 %v2854_v33 }
  0x38   :  { %514 = vmatpush.msra.mxu2 %v2962_v2 }
  0x39   :  { %721 = vmatpush.msra.mxu3 %v2854_v33  ;;  %608 = vmatpush.msra.mxu0 %v2893_v19 }
  0x3a   :  { %515 = vmatpush.msra.mxu2 %v2970_v12 }
  0x3b   :  { %722 = vmatpush.msra.mxu3 %v2893_v19  ;;  %2416 = vmatmul.msk.f32.gmra.mxu2 %vm241_vm9, %v2981_v34 }
  0x3c   :  { %421 = vmatmul.f32.vlgmr.msrb.gmra.mxu0 %v2721_v3 }
  0x3d   :  { %609 = vmatpush.msra.mxu0 %v2901_v21  ;;  %723 = vmatpush.msra.mxu3 %v2901_v21 }
  0x3f   :  { %740 = vmatpush.msrb.mxu0 %v2925_v44 }
  0x41   :  { %741 = vmatpush.msrb.mxu0 %v2933_v53 }
  0x43   :  { %742 = vmatpush.msrb.mxu0 %v2962_v2  ;;  %2422 = vmatmul.msk.f32.vlgmr.msrb.gmra.mxu2 %vm241_vm9, %v233_v7 }
  0x44   :  { %646 = vmatpush.msrb.mxu2 %v2988_v39 }
  0x45   :  { %743 = vmatpush.msrb.mxu0 %v2970_v12 }
  0x46   :  { %647 = vmatpush.msrb.mxu2 %v2993_v40 }
  0x48   :  { %648 = vmatpush.msrb.mxu2 %v3006_v49 }
  0x4a   :  { %649 = vmatpush.msrb.mxu2 %v3015_v57 }
  0x4b   :  { %2423 = vmatmul.msk.f32.gmra.mxu2 %vm241_vm9, %v2981_v34 }
  0xa7   :  { %v266_v8 = vpop.f32.mrf.mxu3 }
  0xa8   :  { %v267_v9 = vadd.f32 %v2540_v54, %v266_v8 }
  0xaa   :  { %270 = vst.msk [vmem:[#allocation2 + $0x8] sm:$0xff] %vm241_vm9, %v267_v9 }
  0xaf   :  { %v379_v14 = vpop.f32.mrf.mxu3 }
  0xb0   :  { %v263_v10 = vpop.f32.mrf.mxu0 }
  0xb1   :  { %v264_v11 = vadd.f32 %v2540_v54, %v263_v10 }
  0xb3   :  { %269 = vst.msk [vmem:[#allocation2] sm:$0xff] %vm241_vm9, %v264_v11 }
  0xb6   :  { %v298_v15 = vpop.f32.mrf.mxu2 }
  0xb7   :  { %v299_v16 = vadd.f32 %v2541_v13, %v298_v15  ;;  %v399_v23 = vpop.f32.mrf.mxu3 }
  0xb9   :  { %304 = vst.msk [vmem:[#allocation3] sm:$0xff] %vm241_vm9, %v299_v16  ;;  %v422_v47 = vpop.f32.mrf.mxu0 }
  0xba   :  { %v356_v17 = vld [vmem:[#allocation2] sm:$0x3]  ;;  %v423_v56 = vadd.f32 %v3080_v45, %v422_v47  ;;  %v474_v15 = vld [vmem:[#allocation2 + $0x2] sm:$0x3] }
  0xbb   :  { %v425_v18 = vadd.f32 %v379_v14, %v356_v17 }
  0xbd   :  { %v2432_v20 = vmul.f32 -1.442695, %v425_v18 }
  0xbe   :  { %v301_v24 = vpop.f32.mrf.mxu2 }
  0xbf   :  { %2552 = vpow2.f32 %v2432_v20  ;;  %v302_v25 = vadd.f32 %v2541_v13, %v301_v24 }
  0xc0   :  { %v357_v26 = vld [vmem:[#allocation3] sm:$0x3]  ;;  %v475_v20 = vld [vmem:[#allocation3 + $0x2] sm:$0x3] }
  0xc1   :  { %v445_v27 = vadd.f32 %v399_v23, %v357_v26  ;;  %305 = vst.msk [vmem:[#allocation3 + $0x8] sm:$0xff] %vm241_vm9, %v302_v25 }
  0xc3   :  { %v2433_v28 = vmul.f32 -1.442695, %v445_v27 }
  0xc5   :  { %v2553_v30 = vpop.eup %2552  ;;  %2554 = vpow2.f32 %v2433_v28 }
  0xc6   :  { %v429_v31 = vadd.f32 1.0, %v2553_v30  ;;  %v333_v32 = vpop.f32.mrf.mxu2 }
  0xc7   :  { %v334_v34 = vadd.f32 %v2542_v29, %v333_v32 }
  0xc8   :  { %2556 = vrcp.f32 %v429_v31  ;;  %v441_v48 = vand.u32 2147483648, %v429_v31  ;;  %v439_v51 = vand.u32 2147483647, %v429_v31  ;;  %vm435_vm11 = vweird.f32 %v429_v31 }
  0xc9   :  { %339 = vst.msk [vmem:[#allocation4] sm:$0xff] %vm241_vm9, %v334_v34 }
  0xca   :  { %v442_v59 = vor.u32 1.1754944e-38, %v441_v48  ;;  %vm440_vm13 = vcmp.eq.f32.partialorder %v439_v51, 8.507059e+37 }
  0xcb   :  { %v2555_v35 = vpop.eup %2554 }
  0xcc   :  { %v449_v36 = vadd.f32 1.0, %v2555_v35 }
  0xce   :  { %v2557_v37 = vpop.eup %2556  ;;  %2558 = vrcp.f32 %v449_v36  ;;  %v336_v41 = vpop.f32.mrf.mxu2  ;;  %v461_v38 = vand.u32 2147483648, %v449_v36  ;;  %v459_v1 = vand.u32 2147483647, %v449_v36  ;;  %vm455_vm15 = vweird.f32 %v449_v36 }
  0xcf   :  { %v431_v42 = vmul.f32 %v2557_v37, %v429_v31  ;;  %v337_v43 = vadd.f32 %v2542_v29, %v336_v41  ;;  %vm436_vm10 = vweird.f32 %v2557_v37 }
  0xd0   :  { %vm437_vm12 = vmor %vm435_vm11, %vm436_vm10  ;;  %v358_v62 = vld [vmem:[#allocation4] sm:$0x3]  ;;  %v462_v7 = vor.u32 1.1754944e-38, %v461_v38  ;;  %vm460_vm1 = vcmp.eq.f32.partialorder %v459_v1, 8.507059e+37 }
  0xd1   :  { %v432_v46 = vsub.f32 1.0, %v431_v42  ;;  %340 = vst.msk [vmem:[#allocation4 + $0x8] sm:$0xff] %vm241_vm9, %v337_v43 }
  0xd3   :  { %v433_v50 = vmul.f32 %v2557_v37, %v432_v46 }
  0xd4   :  { %v2559_v52 = vpop.eup %2558 }
  0xd5   :  { %v451_v55 = vmul.f32 %v2559_v52, %v449_v36  ;;  %v434_v58 = vadd.f32 %v2557_v37, %v433_v50  ;;  %vm456_vm14 = vweird.f32 %v2559_v52 }
  0xd6   :  { %vm457_vm0 = vmor %vm455_vm15, %vm456_vm14 }
  0xd7   :  { %v452_v60 = vsub.f32 1.0, %v451_v55  ;;  %v438_v61 = vsel %vm437_vm12, %v2557_v37, %v434_v58 }
  0xd8   :  { %v443_v63 = vsel %vm440_vm13, %v442_v59, %v438_v61  ;;  %v476_v59 = vld [vmem:[#allocation4 + $0x2] sm:$0x3] }
  0xd9   :  { %v453_v0 = vmul.f32 %v2559_v52, %v452_v60  ;;  %v465_v4 = vmul.f32 %v443_v63, %v423_v56 }
  0xdb   :  { %v454_v5 = vadd.f32 %v2559_v52, %v453_v0  ;;  %v466_v6 = vadd.f32 %v465_v4, %v358_v62 }
  0xdd   :  { %v458_v54 = vsel %vm457_vm0, %v2559_v52, %v454_v5  ;;  %2560 = vtanh.f32 %v466_v6 }
  0xde   :  { %v463_v8 = vsel %vm460_vm1, %v462_v7, %v458_v54  ;;  %v588_v7 = vld [vmem:[#allocation2 + $0x4] sm:$0x3] }
  0xdf   :  { %v468_v9 = vsub.f32 1.0, %v463_v8  ;;  %v470_v13 = vmul.f32 0.0, %v463_v8  ;;  %v589_v8 = vld [vmem:[#allocation3 + $0x4] sm:$0x3] }
  0xe3   :  { %v2561_v10 = vpop.eup %2560 }
  0xe4   :  { %v469_v11 = vmul.f32 %v2561_v10, %v468_v9 }
  0xe6   :  { %v3084_v14 = vadd.f32 %v470_v13, %v469_v11 }
  0xe8   :  { %473 = vst.msk [vmem:[#allocation5] sm:$0x3] %vm472_vm2, %v3084_v14  ;;  %2434 = vmatmul.msk.f32.vlgmr.msra.gmra.mxu1 %vm241_vm9, %v3084_v14  ;;  %2435 = vmatmul.msk.f32.vlgmr.msra.gmra.mxu2 %vm241_vm9, %v3084_v14 }
  0xe9   :  { %2436 = vmatmul.msk.f32.vlgmr.msrb.gmra.mxu3 %vm241_vm9, %v3084_v14  ;;  %760 = vmatpush.msra.mxu1 %v2988_v39 }
  0xea   :  { %834 = vmatpush.msra.mxu2 %v2838_v22  ;;  %854 = vmatpush.msrb.mxu3 %v2925_v44 }
  0xeb   :  { %761 = vmatpush.msra.mxu1 %v2993_v40 }
  0xec   :  { %835 = vmatpush.msra.mxu2 %v2854_v33  ;;  %855 = vmatpush.msrb.mxu3 %v2933_v53 }
  0xed   :  { %762 = vmatpush.msra.mxu1 %v3006_v49 }
  0xee   :  { %836 = vmatpush.msra.mxu2 %v2893_v19  ;;  %856 = vmatpush.msrb.mxu3 %v2962_v2 }
  0xef   :  { %763 = vmatpush.msra.mxu1 %v3015_v57 }
  0xf0   :  { %837 = vmatpush.msra.mxu2 %v2901_v21  ;;  %857 = vmatpush.msrb.mxu3 %v2970_v12 }
 0x165   :  { %v497_v16 = vpop.f32.mrf.mxu1 }
 0x166   :  { %v540_v17 = vadd.f32 %v497_v16, %v474_v15 }
 0x168   :  { %v2437_v18 = vmul.f32 -1.442695, %v540_v17 }
 0x16a   :  { %2562 = vpow2.f32 %v2437_v18 }
 0x16b   :  { %v517_v23 = vpop.f32.mrf.mxu2 }
 0x16c   :  { %v560_v24 = vadd.f32 %v517_v23, %v475_v20  ;;  %v537_v41 = vpop.f32.mrf.mxu3 }
 0x16d   :  { %v538_v48 = vadd.f32 %v3080_v45, %v537_v41 }
 0x16e   :  { %v2438_v25 = vmul.f32 -1.442695, %v560_v24 }
 0x170   :  { %v2563_v26 = vpop.eup %2562  ;;  %2564 = vpow2.f32 %v2438_v25 }
 0x171   :  { %v544_v27 = vadd.f32 1.0, %v2563_v26 }
 0x173   :  { %2566 = vrcp.f32 %v544_v27  ;;  %v556_v34 = vand.u32 2147483648, %v544_v27  ;;  %v554_v36 = vand.u32 2147483647, %v544_v27  ;;  %vm550_vm4 = vweird.f32 %v544_v27 }
 0x175   :  { %v557_v46 = vor.u32 1.1754944e-38, %v556_v34  ;;  %vm555_vm6 = vcmp.eq.f32.partialorder %v554_v36, 8.507059e+37 }
 0x176   :  { %v2565_v28 = vpop.eup %2564 }
 0x177   :  { %v564_v29 = vadd.f32 1.0, %v2565_v28 }
 0x179   :  { %v2567_v30 = vpop.eup %2566  ;;  %2568 = vrcp.f32 %v564_v29  ;;  %v576_v55 = vand.u32 2147483648, %v564_v29  ;;  %v574_v58 = vand.u32 2147483647, %v564_v29  ;;  %vm570_vm8 = vweird.f32 %v564_v29 }
 0x17a   :  { %v546_v31 = vmul.f32 %v2567_v30, %v544_v27  ;;  %vm551_vm3 = vweird.f32 %v2567_v30 }
 0x17b   :  { %vm552_vm5 = vmor %vm550_vm4, %vm551_vm3  ;;  %v577_v38 = vor.u32 1.1754944e-38, %v576_v55  ;;  %vm575_vm11 = vcmp.eq.f32.partialorder %v574_v58, 8.507059e+37 }
 0x17c   :  { %v547_v32 = vsub.f32 1.0, %v546_v31 }
 0x17e   :  { %v548_v35 = vmul.f32 %v2567_v30, %v547_v32 }
 0x17f   :  { %v2569_v37 = vpop.eup %2568 }
 0x180   :  { %v566_v42 = vmul.f32 %v2569_v37, %v564_v29  ;;  %v549_v43 = vadd.f32 %v2567_v30, %v548_v35  ;;  %vm571_vm7 = vweird.f32 %v2569_v37 }
 0x181   :  { %vm572_vm10 = vmor %vm570_vm8, %vm571_vm7 }
 0x182   :  { %v567_v47 = vsub.f32 1.0, %v566_v42  ;;  %v553_v50 = vsel %vm552_vm5, %v2567_v30, %v549_v43 }
 0x183   :  { %v558_v51 = vsel %vm555_vm6, %v557_v46, %v553_v50 }
 0x184   :  { %v568_v52 = vmul.f32 %v2569_v37, %v567_v47  ;;  %v580_v56 = vmul.f32 %v558_v51, %v538_v48  ;;  %v590_v48 = vld [vmem:[#allocation4 + $0x4] sm:$0x3] }
 0x186   :  { %v569_v60 = vadd.f32 %v2569_v37, %v568_v52  ;;  %v581_v61 = vadd.f32 %v580_v56, %v476_v59 }
 0x188   :  { %v573_v62 = vsel %vm572_vm10, %v2569_v37, %v569_v60  ;;  %2570 = vtanh.f32 %v581_v61 }
 0x189   :  { %v578_v63 = vsel %vm575_vm11, %v577_v38, %v573_v62 }
 0x18a   :  { %v583_v0 = vsub.f32 1.0, %v578_v63  ;;  %v585_v5 = vmul.f32 %v578_v63, %v3084_v14 }
 0x18e   :  { %v2571_v1 = vpop.eup %2570 }
 0x18f   :  { %v584_v4 = vmul.f32 %v2571_v1, %v583_v0 }
 0x191   :  { %v3108_v6 = vadd.f32 %v585_v5, %v584_v4 }
 0x193   :  { %587 = vst.msk [vmem:[#allocation5 + $0x2] sm:$0x3] %vm472_vm2, %v3108_v6  ;;  %2439 = vmatmul.msk.f32.vlgmr.msra.gmra.mxu0 %vm241_vm9, %v3108_v6  ;;  %2440 = vmatmul.msk.f32.vlgmr.msrb.gmra.mxu1 %vm241_vm9, %v3108_v6 }
 0x194   :  { %2441 = vmatmul.msk.f32.vlgmr.msrb.gmra.mxu2 %vm241_vm9, %v3108_v6  ;;  %874 = vmatpush.msra.mxu0 %v2988_v39 }
 0x195   :  { %948 = vmatpush.msrb.mxu1 %v2838_v22  ;;  %968 = vmatpush.msrb.mxu2 %v2925_v44 }
 0x196   :  { %875 = vmatpush.msra.mxu0 %v2993_v40 }
 0x197   :  { %949 = vmatpush.msrb.mxu1 %v2854_v33  ;;  %969 = vmatpush.msrb.mxu2 %v2933_v53 }
 0x198   :  { %876 = vmatpush.msra.mxu0 %v3006_v49 }
 0x199   :  { %950 = vmatpush.msrb.mxu1 %v2893_v19  ;;  %970 = vmatpush.msrb.mxu2 %v2962_v2 }
 0x19a   :  { %877 = vmatpush.msra.mxu0 %v3015_v57 }
 0x19b   :  { %951 = vmatpush.msrb.mxu1 %v2901_v21  ;;  %971 = vmatpush.msrb.mxu2 %v2970_v12 }
 0x210   :  { %v611_v54 = vpop.f32.mrf.mxu0  ;;  %v631_v9 = vpop.f32.mrf.mxu1 }
 0x211   :  { %v654_v10 = vadd.f32 %v611_v54, %v588_v7  ;;  %v674_v11 = vadd.f32 %v631_v9, %v589_v8 }
 0x213   :  { %v2442_v13 = vmul.f32 -1.442695, %v654_v10  ;;  %v2443_v14 = vmul.f32 -1.442695, %v674_v11 }
 0x215   :  { %2572 = vpow2.f32 %v2442_v13 }
 0x216   :  { %2574 = vpow2.f32 %v2443_v14 }
 0x217   :  { %v651_v32 = vpop.f32.mrf.mxu2 }
 0x218   :  { %v652_v36 = vadd.f32 %v3080_v45, %v651_v32  ;;  %v704_v32 = vld [vmem:[#allocation4 + $0x6] sm:$0x3] }
 0x21b   :  { %v2573_v15 = vpop.eup %2572 }
 0x21c   :  { %v2575_v16 = vpop.eup %2574  ;;  %v658_v17 = vadd.f32 1.0, %v2573_v15 }
 0x21d   :  { %v678_v18 = vadd.f32 1.0, %v2575_v16 }
 0x21e   :  { %2576 = vrcp.f32 %v658_v17  ;;  %v670_v28 = vand.u32 2147483648, %v658_v17  ;;  %v668_v30 = vand.u32 2147483647, %v658_v17  ;;  %vm664_vm13 = vweird.f32 %v658_v17 }
 0x21f   :  { %2578 = vrcp.f32 %v678_v18  ;;  %v690_v43 = vand.u32 2147483648, %v678_v18  ;;  %vm684_vm1 = vweird.f32 %v678_v18  ;;  %v688_v47 = vand.u32 2147483647, %v678_v18 }
 0x220   :  { %v671_v35 = vor.u32 1.1754944e-38, %v670_v28  ;;  %vm669_vm15 = vcmp.eq.f32.partialorder %v668_v30, 8.507059e+37 }
 0x221   :  { %v691_v52 = vor.u32 1.1754944e-38, %v690_v43  ;;  %vm689_vm4 = vcmp.eq.f32.partialorder %v688_v47, 8.507059e+37 }
 0x224   :  { %v2577_v20 = vpop.eup %2576 }
 0x225   :  { %v2579_v23 = vpop.eup %2578  ;;  %v660_v24 = vmul.f32 %v2577_v20, %v658_v17  ;;  %vm665_vm12 = vweird.f32 %v2577_v20 }
 0x226   :  { %v680_v25 = vmul.f32 %v2579_v23, %v678_v18  ;;  %vm666_vm14 = vmor %vm664_vm13, %vm665_vm12  ;;  %vm685_vm0 = vweird.f32 %v2579_v23 }
 0x227   :  { %v661_v26 = vsub.f32 1.0, %v660_v24  ;;  %vm686_vm3 = vmor %vm684_vm1, %vm685_vm0 }
 0x228   :  { %v681_v27 = vsub.f32 1.0, %v680_v25 }
 0x229   :  { %v662_v29 = vmul.f32 %v2577_v20, %v661_v26 }
 0x22a   :  { %v682_v31 = vmul.f32 %v2579_v23, %v681_v27 }
 0x22b   :  { %v663_v34 = vadd.f32 %v2577_v20, %v662_v29 }
 0x22c   :  { %v683_v41 = vadd.f32 %v2579_v23, %v682_v31 }
 0x22d   :  { %v667_v37 = vsel %vm666_vm14, %v2577_v20, %v663_v34 }
 0x22e   :  { %v672_v42 = vsel %vm669_vm15, %v671_v35, %v667_v37  ;;  %v687_v51 = vsel %vm686_vm3, %v2579_v23, %v683_v41 }
 0x22f   :  { %v694_v46 = vmul.f32 %v672_v42, %v652_v36  ;;  %v692_v55 = vsel %vm689_vm4, %v691_v52, %v687_v51  ;;  %v817_v52 = vld [vmem:[#allocation3 + $0x8] sm:$0x3] }
 0x230   :  { %v697_v56 = vsub.f32 1.0, %v692_v55  ;;  %v699_v60 = vmul.f32 %v692_v55, %v3108_v6 }
 0x231   :  { %v695_v50 = vadd.f32 %v694_v46, %v590_v48  ;;  %v2716_v48 = vld [vmem:[%s3630_s2 + $0x18] sm:$0xff] }
 0x233   :  { %2580 = vtanh.f32 %v695_v50  ;;  %v2717_v50 = vld [vmem:[%s3630_s2 + $0x10] sm:$0xff] }
 0x239   :  { %v2581_v58 = vpop.eup %2580 }
 0x23a   :  { %v698_v59 = vmul.f32 %v2581_v58, %v697_v56 }
 0x23c   :  { %v3132_v61 = vadd.f32 %v699_v60, %v698_v59 }
 0x23e   :  { %701 = vst.msk [vmem:[#allocation5 + $0x4] sm:$0x3] %vm472_vm2, %v3132_v61  ;;  %2444 = vmatmul.msk.f32.vlgmr.msra.gmra.mxu3 %vm241_vm9, %v3132_v61  ;;  %2445 = vmatmul.msk.f32.vlgmr.msrb.gmra.mxu0 %vm241_vm9, %v3132_v61 }
 0x23f   :  { %2446 = vmatmul.msk.f32.vlgmr.msra.gmra.mxu1 %vm241_vm9, %v3132_v61  ;;  %988 = vmatpush.msra.mxu3 %v2988_v39 }
 0x240   :  { %1062 = vmatpush.msrb.mxu0 %v2838_v22  ;;  %1082 = vmatpush.msra.mxu1 %v2925_v44  ;;  %v703_v22 = vld [vmem:[#allocation3 + $0x6] sm:$0x3] }
 0x241   :  { %989 = vmatpush.msra.mxu3 %v2993_v40 }
 0x242   :  { %1063 = vmatpush.msrb.mxu0 %v2854_v33  ;;  %1083 = vmatpush.msra.mxu1 %v2933_v53  ;;  %v702_v33 = vld [vmem:[#allocation2 + $0x6] sm:$0x3] }
 0x243   :  { %990 = vmatpush.msra.mxu3 %v3006_v49 }
 0x244   :  { %1064 = vmatpush.msrb.mxu0 %v2893_v19  ;;  %1084 = vmatpush.msra.mxu1 %v2962_v2 }
 0x245   :  { %991 = vmatpush.msra.mxu3 %v3015_v57 }
 0x246   :  { %1065 = vmatpush.msrb.mxu0 %v2901_v21  ;;  %1085 = vmatpush.msra.mxu1 %v2970_v12 }
 0x2bb   :  { %v745_v38 = vpop.f32.mrf.mxu0 }
 0x2bc   :  { %v788_v62 = vadd.f32 %v745_v38, %v703_v22  ;;  %v765_v20 = vpop.f32.mrf.mxu1 }
 0x2bd   :  { %v766_v25 = vadd.f32 %v3080_v45, %v765_v20 }
 0x2be   :  { %v2448_v63 = vmul.f32 -1.442695, %v788_v62 }
 0x2c0   :  { %2582 = vpow2.f32 %v2448_v63 }
 0x2c1   :  { %v725_v0 = vpop.f32.mrf.mxu3 }
 0x2c2   :  { %v768_v1 = vadd.f32 %v725_v0, %v702_v33 }
 0x2c4   :  { %v2447_v4 = vmul.f32 -1.442695, %v768_v1 }
 0x2c6   :  { %v2583_v5 = vpop.eup %2582  ;;  %2584 = vpow2.f32 %v2447_v4 }
 0x2c7   :  { %v792_v6 = vadd.f32 1.0, %v2583_v5 }
 0x2c9   :  { %2586 = vrcp.f32 %v792_v6  ;;  %v804_v29 = vand.u32 2147483648, %v792_v6  ;;  %vm798_vm11 = vweird.f32 %v792_v6  ;;  %v802_v31 = vand.u32 2147483647, %v792_v6 }
 0x2cb   :  { %v805_v36 = vor.u32 1.1754944e-38, %v804_v29  ;;  %vm803_vm13 = vcmp.eq.f32.partialorder %v802_v31, 8.507059e+37 }
 0x2cc   :  { %v2585_v7 = vpop.eup %2584 }
 0x2cd   :  { %v772_v54 = vadd.f32 1.0, %v2585_v7 }
 0x2cf   :  { %2588 = vrcp.f32 %v772_v54  ;;  %v2587_v8 = vpop.eup %2586  ;;  %v784_v15 = vand.u32 2147483648, %v772_v54  ;;  %v782_v17 = vand.u32 2147483647, %v772_v54  ;;  %vm778_vm6 = vweird.f32 %v772_v54 }
 0x2d0   :  { %v794_v9 = vmul.f32 %v2587_v8, %v792_v6  ;;  %vm799_vm10 = vweird.f32 %v2587_v8 }
 0x2d1   :  { %v785_v24 = vor.u32 1.1754944e-38, %v784_v15  ;;  %vm783_vm8 = vcmp.eq.f32.partialorder %v782_v17, 8.507059e+37  ;;  %vm800_vm12 = vmor %vm798_vm11, %vm799_vm10  ;;  %v818_v15 = vld [vmem:[#allocation4 + $0x8] sm:$0x3] }
 0x2d2   :  { %v795_v13 = vsub.f32 1.0, %v794_v9 }
 0x2d4   :  { %v796_v18 = vmul.f32 %v2587_v8, %v795_v13 }
 0x2d5   :  { %v2589_v10 = vpop.eup %2588 }
 0x2d6   :  { %v774_v11 = vmul.f32 %v2589_v10, %v772_v54  ;;  %vm779_vm5 = vweird.f32 %v2589_v10  ;;  %v797_v27 = vadd.f32 %v2587_v8, %v796_v18 }
 0x2d7   :  { %vm780_vm7 = vmor %vm778_vm6, %vm779_vm5 }
 0x2d8   :  { %v775_v14 = vsub.f32 1.0, %v774_v11  ;;  %v801_v35 = vsel %vm800_vm12, %v2587_v8, %v797_v27 }
 0x2d9   :  { %v806_v37 = vsel %vm803_vm13, %v805_v36, %v801_v35 }
 0x2da   :  { %v776_v16 = vmul.f32 %v2589_v10, %v775_v14  ;;  %v811_v41 = vsub.f32 1.0, %v806_v37  ;;  %v813_v46 = vmul.f32 %v806_v37, %v3132_v61 }
 0x2dc   :  { %v777_v23 = vadd.f32 %v2589_v10, %v776_v16 }
 0x2de   :  { %v781_v26 = vsel %vm780_vm7, %v2589_v10, %v777_v23 }
 0x2df   :  { %v786_v28 = vsel %vm783_vm8, %v785_v24, %v781_v26 }
 0x2e0   :  { %v808_v30 = vmul.f32 %v786_v28, %v766_v25  ;;  %v930_v28 = vld [vmem:[#allocation2 + $0xa] sm:$0x3] }
 0x2e2   :  { %v809_v34 = vadd.f32 %v808_v30, %v704_v32  ;;  %v931_v32 = vld [vmem:[#allocation3 + $0xa] sm:$0x3] }
 0x2e4   :  { %2590 = vtanh.f32 %v809_v34 }
 0x2ea   :  { %v2591_v42 = vpop.eup %2590 }
 0x2eb   :  { %v812_v43 = vmul.f32 %v2591_v42, %v811_v41 }
 0x2ed   :  { %v3156_v47 = vadd.f32 %v813_v46, %v812_v43  ;;  %v1274_v43 = vld [vmem:[%s3633_s5] sm:$0xff] }
 0x2ef   :  { %815 = vst.msk [vmem:[#allocation5 + $0x6] sm:$0x3] %vm472_vm2, %v3156_v47  ;;  %2449 = vmatmul.msk.f32.vlgmr.msra.gmra.mxu2 %vm241_vm9, %v3156_v47  ;;  %2450 = vmatmul.msk.f32.vlgmr.msrb.gmra.mxu3 %vm241_vm9, %v3156_v47 }
 0x2f0   :  { %2451 = vmatmul.msk.f32.vlgmr.msra.gmra.mxu0 %vm241_vm9, %v3156_v47  ;;  %1102 = vmatpush.msra.mxu2 %v2988_v39 }
 0x2f1   :  { %1176 = vmatpush.msrb.mxu3 %v2716_v48  ;;  %1196 = vmatpush.msra.mxu0 %v2925_v44  ;;  %v816_v44 = vld [vmem:[#allocation2 + $0x8] sm:$0x3] }
 0x2f2   :  { %1103 = vmatpush.msra.mxu2 %v2993_v40 }
 0x2f3   :  { %1177 = vmatpush.msrb.mxu3 %v2717_v50  ;;  %1197 = vmatpush.msra.mxu0 %v2933_v53 }
 0x2f4   :  { %1104 = vmatpush.msra.mxu2 %v3006_v49 }
 0x2f5   :  { %1178 = vmatpush.msrb.mxu3 %v2893_v19  ;;  %1198 = vmatpush.msra.mxu0 %v2962_v2 }
 0x2f6   :  { %1105 = vmatpush.msra.mxu2 %v3015_v57 }
 0x2f7   :  { %1179 = vmatpush.msrb.mxu3 %v2901_v21  ;;  %1199 = vmatpush.msra.mxu0 %v2970_v12 }
 0x36d   :  { %v879_v4 = vpop.f32.mrf.mxu0 }
 0x36e   :  { %v880_v54 = vadd.f32 %v3080_v45, %v879_v4 }
 0x372   :  { %v839_v51 = vpop.f32.mrf.mxu2  ;;  %v859_v55 = vpop.f32.mrf.mxu3 }
 0x373   :  { %v882_v56 = vadd.f32 %v839_v51, %v816_v44  ;;  %v902_v58 = vadd.f32 %v859_v55, %v817_v52 }
 0x375   :  { %v2452_v59 = vmul.f32 -1.442695, %v882_v56  ;;  %v2453_v53 = vmul.f32 -1.442695, %v902_v58 }
 0x377   :  { %2592 = vpow2.f32 %v2452_v59 }
 0x378   :  { %2594 = vpow2.f32 %v2453_v53 }
 0x37d   :  { %v2593_v60 = vpop.eup %2592 }
 0x37e   :  { %v2595_v19 = vpop.eup %2594  ;;  %v886_v61 = vadd.f32 1.0, %v2593_v60 }
 0x37f   :  { %v906_v2 = vadd.f32 1.0, %v2595_v19 }
 0x380   :  { %2596 = vrcp.f32 %v886_v61  ;;  %v898_v63 = vand.u32 2147483648, %v886_v61  ;;  %v896_v1 = vand.u32 2147483647, %v886_v61  ;;  %vm892_vm15 = vweird.f32 %v886_v61 }
 0x381   :  { %2598 = vrcp.f32 %v906_v2  ;;  %v918_v13 = vand.u32 2147483648, %v906_v2  ;;  %vm912_vm4 = vweird.f32 %v906_v2  ;;  %v916_v14 = vand.u32 2147483647, %v906_v2 }
 0x382   :  { %v899_v7 = vor.u32 1.1754944e-38, %v898_v63  ;;  %vm897_vm1 = vcmp.eq.f32.partialorder %v896_v1, 8.507059e+37 }
 0x383   :  { %v919_v18 = vor.u32 1.1754944e-38, %v918_v13  ;;  %vm917_vm6 = vcmp.eq.f32.partialorder %v916_v14, 8.507059e+37 }
 0x386   :  { %v2597_v22 = vpop.eup %2596 }
 0x387   :  { %v2599_v21 = vpop.eup %2598  ;;  %v888_v38 = vmul.f32 %v2597_v22, %v886_v61  ;;  %vm893_vm14 = vweird.f32 %v2597_v22 }
 0x388   :  { %v908_v12 = vmul.f32 %v2599_v21, %v906_v2  ;;  %vm894_vm0 = vmor %vm892_vm15, %vm893_vm14  ;;  %vm913_vm3 = vweird.f32 %v2599_v21 }
 0x389   :  { %v889_v62 = vsub.f32 1.0, %v888_v38  ;;  %vm914_vm5 = vmor %vm912_vm4, %vm913_vm3 }
 0x38a   :  { %v909_v33 = vsub.f32 1.0, %v908_v12  ;;  %v932_v12 = vld [vmem:[#allocation4 + $0xa] sm:$0x3] }
 0x38b   :  { %v890_v0 = vmul.f32 %v2597_v22, %v889_v62 }
 0x38c   :  { %v910_v5 = vmul.f32 %v2599_v21, %v909_v33 }
 0x38d   :  { %v891_v6 = vadd.f32 %v2597_v22, %v890_v0 }
 0x38e   :  { %v911_v10 = vadd.f32 %v2599_v21, %v910_v5 }
 0x38f   :  { %v895_v8 = vsel %vm894_vm0, %v2597_v22, %v891_v6 }
 0x390   :  { %v900_v9 = vsel %vm897_vm1, %v899_v7, %v895_v8  ;;  %v915_v17 = vsel %vm914_vm5, %v2599_v21, %v911_v10  ;;  %v3222_v8 = vld [vmem:[#allocation5] sm:$0xff] }
 0x391   :  { %v922_v11 = vmul.f32 %v900_v9, %v880_v54  ;;  %v920_v20 = vsel %vm917_vm6, %v919_v18, %v915_v17  ;;  %v1044_v9 = vld [vmem:[#allocation2 + $0xc] sm:$0x3] }
 0x392   :  { %v925_v23 = vsub.f32 1.0, %v920_v20  ;;  %v927_v26 = vmul.f32 %v920_v20, %v3156_v47 }
 0x393   :  { %v923_v16 = vadd.f32 %v922_v11, %v818_v15  ;;  %v1045_v11 = vld [vmem:[#allocation3 + $0xc] sm:$0x3] }
 0x395   :  { %2600 = vtanh.f32 %v923_v16 }
 0x39b   :  { %v2601_v24 = vpop.eup %2600 }
 0x39c   :  { %v926_v25 = vmul.f32 %v2601_v24, %v925_v23 }
 0x39e   :  { %v3184_v27 = vadd.f32 %v927_v26, %v926_v25  ;;  %v3229_v25 = vld [vmem:[%s3634_s7] ss:$0 sm:$0xff] }
 0x3a0   :  { %929 = vst.msk [vmem:[#allocation5 + $0x8] sm:$0x3] %vm472_vm2, %v3184_v27  ;;  %2454 = vmatmul.msk.f32.vlgmr.msrb.gmra.mxu1 %vm241_vm9, %v3184_v27  ;;  %2455 = vmatmul.msk.f32.vlgmr.msrb.gmra.mxu2 %vm241_vm9, %v3184_v27 }
 0x3a1   :  { %2456 = vmatmul.msk.f32.vlgmr.msra.gmra.mxu3 %vm241_vm9, %v3184_v27  ;;  %1216 = vmatpush.msrb.mxu1 %v2988_v39  ;;  %v1277_v39 = vld [vmem:[%s3633_s5 + $0x18] sm:$0xff] }
 0x3a2   :  { %1300 = vmatpush.msrb.mxu2 %v1277_v39  ;;  %v2471_v39 = vld [vmem:[%s3633_s5 + $0x20] sm:$0xff] }
 0x3a3   :  { %1217 = vmatpush.msrb.mxu1 %v2993_v40  ;;  %v1276_v40 = vld [vmem:[%s3633_s5 + $0x10] sm:$0xff] }
 0x3a4   :  { %1301 = vmatpush.msrb.mxu2 %v1276_v40  ;;  %v2478_v40 = vld [vmem:[%s3633_s5 + $0x40] sm:$0xff] }
 0x3a5   :  { %1218 = vmatpush.msrb.mxu1 %v3006_v49 }
 0x3a7   :  { %1219 = vmatpush.msrb.mxu1 %v3015_v57  ;;  %v1275_v57 = vld [vmem:[%s3633_s5 + $0x8] sm:$0xff] }
 0x3a8   :  { %1302 = vmatpush.msrb.mxu2 %v1275_v57  ;;  %v3277_v57 = vld [vmem:[%s3635_s6] sm:$0xff] }
 0x3aa   :  { %1303 = vmatpush.msrb.mxu2 %v1274_v43 }
 0x41d   :  { %v953_v29 = vpop.f32.mrf.mxu1 }
 0x41e   :  { %v996_v30 = vadd.f32 %v953_v29, %v930_v28  ;;  %v2474_v28 = vld [vmem:[%s3633_s5 + $0x38] sm:$0xff] }
 0x41f   :  { %v2481_v29 = vld [vmem:[%s3633_s5 + $0x58] sm:$0xff]  ;;  %1335 = vmatpush.msra.mxu3 %v2474_v28 }
 0x420   :  { %v2457_v31 = vmul.f32 -1.442695, %v996_v30  ;;  %v3240_v30 = vld [vmem:[%s3635_s6 + $0x18] sm:$0xff] }
 0x422   :  { %2602 = vpow2.f32 %v2457_v31 }
 0x423   :  { %v973_v34 = vpop.f32.mrf.mxu2 }
 0x424   :  { %v1016_v35 = vadd.f32 %v973_v34, %v931_v32  ;;  %v993_v55 = vpop.f32.mrf.mxu3  ;;  %v2473_v32 = vld [vmem:[%s3633_s5 + $0x30] sm:$0xff] }
 0x425   :  { %v994_v60 = vadd.f32 %v3080_v45, %v993_v55  ;;  %v2480_v34 = vld [vmem:[%s3633_s5 + $0x50] sm:$0xff]  ;;  %1336 = vmatpush.msra.mxu3 %v2473_v32 }
 0x426   :  { %v2458_v36 = vmul.f32 -1.442695, %v1016_v35  ;;  %v3252_v35 = vld [vmem:[%s3635_s6 + $0x10] sm:$0xff] }
 0x427   :  { %v3360_v32 = vld [vmem:[%s3635_s6 + $0x50] sm:$0xff] }
 0x428   :  { %v2603_v37 = vpop.eup %2602  ;;  %2604 = vpow2.f32 %v2458_v36  ;;  %v2472_v36 = vld [vmem:[%s3633_s5 + $0x28] sm:$0xff] }
 0x429   :  { %v1000_v41 = vadd.f32 1.0, %v2603_v37  ;;  %v2479_v37 = vld [vmem:[%s3633_s5 + $0x48] sm:$0xff]  ;;  %1337 = vmatpush.msra.mxu3 %v2472_v36 }
 0x42b   :  { %2606 = vrcp.f32 %v1000_v41  ;;  %v1012_v50 = vand.u32 2147483648, %v1000_v41  ;;  %v1010_v51 = vand.u32 2147483647, %v1000_v41  ;;  %vm1006_vm8 = vweird.f32 %v1000_v41  ;;  %1338 = vmatpush.msra.mxu3 %v2471_v39 }
 0x42d   :  { %v1013_v59 = vor.u32 1.1754944e-38, %v1012_v50  ;;  %vm1011_vm11 = vcmp.eq.f32.partialorder %v1010_v51, 8.507059e+37 }
 0x42e   :  { %v2605_v49 = vpop.eup %2604 }
 0x42f   :  { %v1020_v42 = vadd.f32 1.0, %v2605_v49 }
 0x431   :  { %v2607_v46 = vpop.eup %2606  ;;  %2608 = vrcp.f32 %v1020_v42  ;;  %v1032_v22 = vand.u32 2147483648, %v1020_v42  ;;  %v1030_v38 = vand.u32 2147483647, %v1020_v42  ;;  %vm1026_vm13 = vweird.f32 %v1020_v42 }
 0x432   :  { %v1002_v47 = vmul.f32 %v2607_v46, %v1000_v41  ;;  %vm1007_vm7 = vweird.f32 %v2607_v46  ;;  %v3265_v41 = vld [vmem:[%s3635_s6 + $0x8] sm:$0xff] }
 0x433   :  { %vm1008_vm10 = vmor %vm1006_vm8, %vm1007_vm7  ;;  %v1033_v33 = vor.u32 1.1754944e-38, %v1032_v22  ;;  %vm1031_vm15 = vcmp.eq.f32.partialorder %v1030_v38, 8.507059e+37  ;;  %v1046_v22 = vld [vmem:[#allocation4 + $0xc] sm:$0x3] }
 0x434   :  { %v1003_v48 = vsub.f32 1.0, %v1002_v47 }
 0x436   :  { %v1004_v44 = vmul.f32 %v2607_v46, %v1003_v48 }
 0x437   :  { %v2609_v52 = vpop.eup %2608 }
 0x438   :  { %v1022_v56 = vmul.f32 %v2609_v52, %v1020_v42  ;;  %v1005_v58 = vadd.f32 %v2607_v46, %v1004_v44  ;;  %vm1027_vm12 = vweird.f32 %v2609_v52 }
 0x439   :  { %vm1028_vm14 = vmor %vm1026_vm13, %vm1027_vm12 }
 0x43a   :  { %v1023_v53 = vsub.f32 1.0, %v1022_v56  ;;  %v1009_v19 = vsel %vm1008_vm10, %v2607_v46, %v1005_v58 }
 0x43b   :  { %v1014_v61 = vsel %vm1011_vm11, %v1013_v59, %v1009_v19 }
 0x43c   :  { %v1024_v2 = vmul.f32 %v2609_v52, %v1023_v53  ;;  %v1036_v21 = vmul.f32 %v1014_v61, %v994_v60 }
 0x43e   :  { %v1025_v62 = vadd.f32 %v2609_v52, %v1024_v2  ;;  %v1037_v63 = vadd.f32 %v1036_v21, %v932_v12 }
 0x440   :  { %v1029_v0 = vsel %vm1028_vm14, %v2609_v52, %v1025_v62  ;;  %2610 = vtanh.f32 %v1037_v63 }
 0x441   :  { %v1034_v1 = vsel %vm1031_vm15, %v1033_v33, %v1029_v0 }
 0x442   :  { %v1039_v4 = vsub.f32 1.0, %v1034_v1  ;;  %v1041_v7 = vmul.f32 %v1034_v1, %v3184_v27 }
 0x446   :  { %v2611_v5 = vpop.eup %2610 }
 0x447   :  { %v1040_v6 = vmul.f32 %v2611_v5, %v1039_v4  ;;  %v3288_v4 = vld [vmem:[%s3635_s6 + $0x38] sm:$0xff]  ;;  %v3301_v5 = vld [vmem:[%s3635_s6 + $0x30] sm:$0xff] }
 0x449   :  { %v3212_v54 = vadd.f32 %v1041_v7, %v1040_v6  ;;  %v3309_v6 = vld [vmem:[%s3635_s6 + $0x28] sm:$0xff]  ;;  %v3320_v7 = vld [vmem:[%s3635_s6 + $0x20] sm:$0xff] }
 0x44b   :  { %1043 = vst.msk [vmem:[#allocation5 + $0xa] sm:$0x3] %vm472_vm2, %v3212_v54  ;;  %2459 = vmatmul.msk.f32.vlgmr.msrb.gmra.mxu0 %vm241_vm9, %v3212_v54  ;;  %2460 = vmatmul.msk.f32.vlgmr.msra.gmra.mxu1 %vm241_vm9, %v3212_v54 }
 0x44c   :  { %2461 = vmatmul.msk.f32.vlgmr.msra.gmra.mxu2 %vm241_vm9, %v3212_v54  ;;  %1370 = vmatpush.msrb.mxu0 %v2481_v29 }
 0x44d   :  { %1413 = vmatpush.msra.mxu1 %v3240_v30 }
 0x44e   :  { %1371 = vmatpush.msrb.mxu0 %v2480_v34 }
 0x44f   :  { %1414 = vmatpush.msra.mxu1 %v3252_v35 }
 0x450   :  { %1372 = vmatpush.msrb.mxu0 %v2479_v37 }
 0x451   :  { %1415 = vmatpush.msra.mxu1 %v3265_v41 }
 0x452   :  { %1373 = vmatpush.msrb.mxu0 %v2478_v40 }
 0x453   :  { %1416 = vmatpush.msra.mxu1 %v3277_v57 }
 0x454   :  { %2469 = vmatmul.msk.f32.vlgmr.msrb.gmra.mxu2 %vm241_vm9, %v3222_v8 }
 0x4c8   :  { %v1067_v10 = vpop.f32.mrf.mxu0  ;;  %v1087_v13 = vpop.f32.mrf.mxu1 }
 0x4c9   :  { %v1110_v14 = vadd.f32 %v1067_v10, %v1044_v9  ;;  %v1130_v15 = vadd.f32 %v1087_v13, %v1045_v11  ;;  %v3338_v11 = vld [vmem:[%s3634_s7 + $0x2] ss:$0 sm:$0xff]  ;;  %v1158_v13 = vld [vmem:[#allocation2 + $0xe] sm:$0x3] }
 0x4cb   :  { %v2462_v16 = vmul.f32 -1.442695, %v1110_v14  ;;  %v2463_v17 = vmul.f32 -1.442695, %v1130_v15 }
 0x4cd   :  { %2612 = vpow2.f32 %v2462_v16 }
 0x4ce   :  { %2614 = vpow2.f32 %v2463_v17 }
 0x4cf   :  { %v1107_v18 = vpop.f32.mrf.mxu2 }
 0x4d0   :  { %v1108_v58 = vadd.f32 %v3080_v45, %v1107_v18 }
 0x4d3   :  { %v2613_v20 = vpop.eup %2612 }
 0x4d4   :  { %v2615_v23 = vpop.eup %2614  ;;  %v1114_v24 = vadd.f32 1.0, %v2613_v20 }
 0x4d5   :  { %v1134_v26 = vadd.f32 1.0, %v2615_v23  ;;  %v3345_v23 = vld [vmem:[%s3634_s7 + $0x1] ss:$0 sm:$0xff] }
 0x4d6   :  { %2616 = vrcp.f32 %v1114_v24  ;;  %v1126_v50 = vand.u32 2147483648, %v1114_v24  ;;  %v1124_v51 = vand.u32 2147483647, %v1114_v24  ;;  %vm1120_vm1 = vweird.f32 %v1114_v24 }
 0x4d7   :  { %2618 = vrcp.f32 %v1134_v26  ;;  %v1305_v27 = vpop.f32.mrf.mxu2  ;;  %v1146_v19 = vand.u32 2147483648, %v1134_v26  ;;  %vm1140_vm6 = vweird.f32 %v1134_v26  ;;  %v1144_v2 = vand.u32 2147483647, %v1134_v26 }
 0x4d8   :  { %v1306_v31 = vadd.f32 %v3229_v25, %v1305_v27  ;;  %v1127_v56 = vor.u32 1.1754944e-38, %v1126_v50  ;;  %vm1125_vm4 = vcmp.eq.f32.partialorder %v1124_v51, 8.507059e+37 }
 0x4d9   :  { %v1147_v12 = vor.u32 1.1754944e-38, %v1146_v19  ;;  %vm1145_vm8 = vcmp.eq.f32.partialorder %v1144_v2, 8.507059e+37  ;;  %v1160_v2 = vld [vmem:[#allocation4 + $0xe] sm:$0x3] }
 0x4da   :  { %1311 = vst.msk [vmem:[#allocation2] sm:$0xff] %vm241_vm9, %v1306_v31  ;;  %v3355_v31 = vld [vmem:[%s3635_s6 + $0x58] sm:$0xff] }
 0x4db   :  { %1456 = vmatpush.msra.mxu2 %v3355_v31 }
 0x4dc   :  { %v2617_v49 = vpop.eup %2616 }
 0x4dd   :  { %v2619_v42 = vpop.eup %2618  ;;  %v1116_v43 = vmul.f32 %v2617_v49, %v1114_v24  ;;  %vm1121_vm0 = vweird.f32 %v2617_v49  ;;  %1457 = vmatpush.msra.mxu2 %v3360_v32 }
 0x4de   :  { %v1136_v46 = vmul.f32 %v2619_v42, %v1134_v26  ;;  %vm1122_vm3 = vmor %vm1120_vm1, %vm1121_vm0  ;;  %vm1141_vm5 = vweird.f32 %v2619_v42 }
 0x4df   :  { %v1117_v47 = vsub.f32 1.0, %v1116_v43  ;;  %vm1142_vm7 = vmor %vm1140_vm6, %vm1141_vm5  ;;  %v3377_v43 = vld [vmem:[%s3635_s6 + $0x40] sm:$0xff] }
 0x4e0   :  { %v1137_v48 = vsub.f32 1.0, %v1136_v46 }
 0x4e1   :  { %v1118_v44 = vmul.f32 %v2617_v49, %v1117_v47 }
 0x4e2   :  { %v1138_v52 = vmul.f32 %v2619_v42, %v1137_v48 }
 0x4e3   :  { %v1119_v55 = vadd.f32 %v2617_v49, %v1118_v44 }
 0x4e4   :  { %v1139_v53 = vadd.f32 %v2619_v42, %v1138_v52 }
 0x4e5   :  { %v1123_v59 = vsel %vm1122_vm3, %v2617_v49, %v1119_v55  ;;  %v2718_v55 = vld [vmem:[%s3632_s4] ss:$0 sm:$0xff] }
 0x4e6   :  { %v1128_v60 = vsel %vm1125_vm4, %v1127_v56, %v1123_v59  ;;  %v1143_v38 = vsel %vm1142_vm7, %v2619_v42, %v1139_v53  ;;  %v3372_v42 = vld [vmem:[%s3635_s6 + $0x48] sm:$0xff] }
 0x4e7   :  { %v1150_v61 = vmul.f32 %v1128_v60, %v1108_v58  ;;  %v1148_v62 = vsel %vm1145_vm8, %v1147_v12, %v1143_v38  ;;  %1458 = vmatpush.msra.mxu2 %v3372_v42 }
 0x4e8   :  { %v1153_v63 = vsub.f32 1.0, %v1148_v62  ;;  %v1155_v0 = vmul.f32 %v1148_v62, %v3212_v54  ;;  %v1159_v54 = vld [vmem:[#allocation3 + $0xe] sm:$0x3] }
 0x4e9   :  { %v1151_v21 = vadd.f32 %v1150_v61, %v1046_v22  ;;  %1459 = vmatpush.msra.mxu2 %v3377_v43 }
 0x4eb   :  { %2620 = vtanh.f32 %v1151_v21  ;;  %1644 = vmatpush.msrb.mxu2 %v3240_v30 }
 0x4ed   :  { %1645 = vmatpush.msrb.mxu2 %v3252_v35 }
 0x4ef   :  { %1646 = vmatpush.msrb.mxu2 %v3265_v41 }
 0x4f1   :  { %v2621_v33 = vpop.eup %2620  ;;  %1647 = vmatpush.msrb.mxu2 %v3277_v57 }
 0x4f2   :  { %v1154_v45 = vmul.f32 %v2621_v33, %v1153_v63 }
 0x4f4   :  { %v3283_v1 = vadd.f32 %v1155_v0, %v1154_v45 }
 0x4f6   :  { %1157 = vst.msk [vmem:[#allocation5 + $0xc] sm:$0x3] %vm472_vm2, %v3283_v1  ;;  %2464 = vmatmul.msk.f32.vlgmr.msrb.gmra.mxu3 %vm241_vm9, %v3283_v1  ;;  %2465 = vmatmul.msk.f32.vlgmr.msra.gmra.mxu0 %vm241_vm9, %v3283_v1 }
 0x4f7   :  { %2466 = vmatmul.msk.f32.vlgmr.msrb.gmra.mxu1 %vm241_vm9, %v3283_v1  ;;  %1530 = vmatpush.msrb.mxu3 %v3240_v30 }
 0x4f8   :  { %1433 = vmatpush.msrb.mxu1 %v3288_v4  ;;  %1550 = vmatpush.msra.mxu0 %v3288_v4 }
 0x4f9   :  { %1531 = vmatpush.msrb.mxu3 %v3252_v35 }
 0x4fa   :  { %1434 = vmatpush.msrb.mxu1 %v3301_v5  ;;  %1551 = vmatpush.msra.mxu0 %v3301_v5 }
 0x4fb   :  { %1532 = vmatpush.msrb.mxu3 %v3265_v41 }
 0x4fc   :  { %1435 = vmatpush.msrb.mxu1 %v3309_v6  ;;  %1552 = vmatpush.msra.mxu0 %v3309_v6 }
 0x4fd   :  { %1533 = vmatpush.msrb.mxu3 %v3277_v57 }
 0x4fe   :  { %2476 = vmatmul.msk.f32.vlgmr.msra.gmra.mxu3 %vm241_vm9, %v3222_v8  ;;  %2483 = vmatmul.msk.f32.vlgmr.msrb.gmra.mxu0 %vm241_vm9, %v3222_v8 }
 0x4ff   :  { %1417 = vmatmul.f32.vlgmr.msra.gmra.mxu1 %v2721_v3  ;;  %1553 = vmatpush.msra.mxu0 %v3320_v7 }
 0x500   :  { %1436 = vmatpush.msrb.mxu1 %v3320_v7  ;;  %1664 = vmatpush.msra.mxu3 %v3288_v4 }
 0x501   :  { %1684 = vmatpush.msrb.mxu0 %v3355_v31 }
 0x502   :  { %1665 = vmatpush.msra.mxu3 %v3301_v5  ;;  %1570 = vmatpush.msra.mxu1 %v3355_v31 }
 0x503   :  { %1685 = vmatpush.msrb.mxu0 %v3360_v32 }
 0x504   :  { %1666 = vmatpush.msra.mxu3 %v3309_v6  ;;  %1571 = vmatpush.msra.mxu1 %v3360_v32 }
 0x505   :  { %1686 = vmatpush.msrb.mxu0 %v3372_v42 }
 0x506   :  { %1667 = vmatpush.msra.mxu3 %v3320_v7  ;;  %1572 = vmatpush.msra.mxu1 %v3372_v42 }
 0x507   :  { %1437 = vmatmul.f32.vlgmr.msrb.gmra.mxu1 %v2721_v3  ;;  %1687 = vmatpush.msrb.mxu0 %v3377_v43 }
 0x508   :  { %1573 = vmatpush.msra.mxu1 %v3377_v43 }
 0x50a   :  { %1758 = vmatpush.msrb.mxu1 %v3240_v30 }
 0x50c   :  { %1759 = vmatpush.msrb.mxu1 %v3252_v35 }
 0x50e   :  { %1760 = vmatpush.msrb.mxu1 %v3265_v41 }
 0x510   :  { %1761 = vmatpush.msrb.mxu1 %v3277_v57 }
 0x573   :  { %v1201_v9 = vpop.f32.mrf.mxu0 }
 0x574   :  { %v1244_v10 = vadd.f32 %v1201_v9, %v1159_v54  ;;  %v1221_v44 = vpop.f32.mrf.mxu1  ;;  %v1398_v9 = vld [vmem:[#allocation2] sm:$0x3] }
 0x575   :  { %v1222_v56 = vadd.f32 %v2718_v55, %v1221_v44 }
 0x576   :  { %v2468_v8 = vmul.f32 -1.442695, %v1244_v10 }
 0x578   :  { %2622 = vpow2.f32 %v2468_v8 }
 0x579   :  { %v1181_v14 = vpop.f32.mrf.mxu3 }
 0x57a   :  { %v1224_v15 = vadd.f32 %v1181_v14, %v1158_v13 }
 0x57b   :  { %v1375_v16 = vpop.f32.mrf.mxu0 }
 0x57c   :  { %v2467_v17 = vmul.f32 -1.442695, %v1224_v15  ;;  %v1376_v18 = vadd.f32 %v3338_v11, %v1375_v16 }
 0x57e   :  { %v2623_v20 = vpop.eup %2622  ;;  %2624 = vpow2.f32 %v2467_v17  ;;  %1381 = vst.msk [vmem:[#allocation4] sm:$0xff] %vm241_vm9, %v1376_v18 }
 0x57f   :  { %v3347_v24 = vadd.f32 1.0, %v2623_v20 }
 0x581   :  { %v1340_v26 = vpop.f32.mrf.mxu3  ;;  %2626 = vrcp.f32 %v3347_v24  ;;  %v1260_v60 = vand.u32 2147483648, %v3347_v24  ;;  %vm1254_vm15 = vweird.f32 %v3347_v24  ;;  %v1258_v61 = vand.u32 2147483647, %v3347_v24 }
 0x582   :  { %v1341_v27 = vadd.f32 %v3345_v23, %v1340_v26 }
 0x583   :  { %v1261_v38 = vor.u32 1.1754944e-38, %v1260_v60  ;;  %vm1259_vm1 = vcmp.eq.f32.partialorder %v1258_v61, 8.507059e+37 }
 0x584   :  { %v2625_v28 = vpop.eup %2624  ;;  %1346 = vst.msk [vmem:[#allocation3] sm:$0xff] %vm241_vm9, %v1341_v27 }
 0x585   :  { %v1228_v29 = vadd.f32 1.0, %v2625_v28 }
 0x587   :  { %2628 = vrcp.f32 %v1228_v29  ;;  %v2627_v34 = vpop.eup %2626  ;;  %v1240_v46 = vand.u32 2147483648, %v1228_v29  ;;  %v1238_v48 = vand.u32 2147483647, %v1228_v29  ;;  %vm1234_vm11 = vweird.f32 %v1228_v29 }
 0x588   :  { %v1250_v36 = vmul.f32 %v2627_v34, %v3347_v24  ;;  %vm1255_vm14 = vweird.f32 %v2627_v34 }
 0x589   :  { %v1241_v52 = vor.u32 1.1754944e-38, %v1240_v46  ;;  %vm1239_vm13 = vcmp.eq.f32.partialorder %v1238_v48, 8.507059e+37  ;;  %vm1256_vm0 = vmor %vm1254_vm15, %vm1255_vm14 }
 0x58a   :  { %v1251_v40 = vsub.f32 1.0, %v1250_v36 }
 0x58b   :  { %v1399_v13 = vld [vmem:[#allocation3] sm:$0x3] }
 0x58c   :  { %v1252_v50 = vmul.f32 %v2627_v34, %v1251_v40 }
 0x58d   :  { %v2629_v37 = vpop.eup %2628 }
 0x58e   :  { %v1230_v39 = vmul.f32 %v2629_v37, %v1228_v29  ;;  %vm1235_vm10 = vweird.f32 %v2629_v37  ;;  %v1253_v59 = vadd.f32 %v2627_v34, %v1252_v50 }
 0x58f   :  { %vm1236_vm12 = vmor %vm1234_vm11, %vm1235_vm10 }
 0x590   :  { %v1231_v49 = vsub.f32 1.0, %v1230_v39  ;;  %v1257_v21 = vsel %vm1256_vm0, %v2627_v34, %v1253_v59 }
 0x591   :  { %v1262_v12 = vsel %vm1259_vm1, %v1261_v38, %v1257_v21 }
 0x592   :  { %v1232_v47 = vmul.f32 %v2629_v37, %v1231_v49  ;;  %v1267_v62 = vsub.f32 1.0, %v1262_v12  ;;  %v1269_v33 = vmul.f32 %v1262_v12, %v3283_v1  ;;  %v1418_v1 = vpop.f32.mrf.mxu1 }
 0x593   :  { %v1464_v10 = vadd.f32 %v1418_v1, %v1398_v9  ;;  %v1512_v9 = vld [vmem:[#allocation2 + $0x2] sm:$0x3] }
 0x594   :  { %v1233_v51 = vadd.f32 %v2629_v37, %v1232_v47 }
 0x595   :  { %v2493_v8 = vmul.f32 -1.442695, %v1464_v10 }
 0x596   :  { %v1237_v58 = vsel %vm1236_vm12, %v2629_v37, %v1233_v51 }
 0x597   :  { %v1242_v53 = vsel %vm1239_vm13, %v1241_v52, %v1237_v58 }
 0x598   :  { %v1264_v19 = vmul.f32 %v1242_v53, %v1222_v56 }
 0x59a   :  { %v1265_v22 = vadd.f32 %v1264_v19, %v1160_v2  ;;  %v1438_v14 = vpop.f32.mrf.mxu1  ;;  %v1400_v19 = vld [vmem:[#allocation4] sm:$0x3] }
 0x59b   :  { %v1484_v15 = vadd.f32 %v1438_v14, %v1399_v13 }
 0x59c   :  { %2630 = vtanh.f32 %v1265_v22 }
 0x59d   :  { %2632 = vpow2.f32 %v2493_v8  ;;  %v2494_v16 = vmul.f32 -1.442695, %v1484_v15 }
 0x59f   :  { %2634 = vpow2.f32 %v2494_v16 }
 0x5a2   :  { %v2631_v63 = vpop.eup %2630 }
 0x5a3   :  { %v1268_v45 = vmul.f32 %v2631_v63, %v1267_v62  ;;  %v2633_v17 = vpop.eup %2632 }
 0x5a5   :  { %v1270_v0 = vadd.f32 %v1269_v33, %v1268_v45  ;;  %v2635_v18 = vpop.eup %2634  ;;  %v1513_v45 = vld [vmem:[#allocation3 + $0x2] sm:$0x3] }
 0x5a6   :  { %v1488_v20 = vadd.f32 1.0, %v2635_v18 }
 0x5a7   :  { %1271 = vst.msk [vmem:[#allocation5 + $0xe] sm:$0x3] %vm472_vm2, %v1270_v0 }
 0x5a8   :  { %v1500_v59 = vand.u32 2147483648, %v1488_v20  ;;  %vm1494_vm8 = vweird.f32 %v1488_v20  ;;  %v1498_v60 = vand.u32 2147483647, %v1488_v20 }
 0x5aa   :  { %v1501_v22 = vor.u32 1.1754944e-38, %v1500_v59  ;;  %vm1499_vm11 = vcmp.eq.f32.partialorder %v1498_v60, 8.507059e+37 }
 0x5ae   :  { %v1273_v54 = vld [vmem:[#allocation5 + $0x8] sm:$0xff] }
 0x5af   :  { %2470 = vmatmul.msk.f32.gmra.mxu2 %vm241_vm9, %v1273_v54  ;;  %2477 = vmatmul.msk.f32.gmra.mxu3 %vm241_vm9, %v1273_v54 }
 0x5b0   :  { %2484 = vmatmul.msk.f32.gmra.mxu0 %vm241_vm9, %v1273_v54 }
 0x5b7   :  { %1460 = vmatmul.f32.vlgmr.msra.gmra.mxu2 %v2721_v3  ;;  %v1468_v3 = vadd.f32 1.0, %v2633_v17 }
 0x5b8   :  { %1778 = vmatpush.msra.mxu2 %v3288_v4 }
 0x5b9   :  { %2636 = vrcp.f32 %v1468_v3  ;;  %v1480_v50 = vand.u32 2147483648, %v1468_v3  ;;  %vm1474_vm4 = vweird.f32 %v1468_v3  ;;  %v1478_v44 = vand.u32 2147483647, %v1468_v3 }
 0x5ba   :  { %1779 = vmatpush.msra.mxu2 %v3301_v5  ;;  %2638 = vrcp.f32 %v1488_v20 }
 0x5bb   :  { %vm1479_vm6 = vcmp.eq.f32.partialorder %v1478_v44, 8.507059e+37 }
 0x5bc   :  { %1780 = vmatpush.msra.mxu2 %v3309_v6 }
 0x5be   :  { %1781 = vmatpush.msra.mxu2 %v3320_v7 }
 0x5bf   :  { %v2637_v24 = vpop.eup %2636 }
 0x5c0   :  { %v1470_v26 = vmul.f32 %v2637_v24, %v1468_v3  ;;  %v2639_v27 = vpop.eup %2638  ;;  %vm1475_vm3 = vweird.f32 %v2637_v24 }
 0x5c1   :  { %v1490_v36 = vmul.f32 %v2639_v27, %v1488_v20  ;;  %vm1476_vm5 = vmor %vm1474_vm4, %vm1475_vm3  ;;  %vm1495_vm7 = vweird.f32 %v2639_v27 }
 0x5c2   :  { %v1471_v29 = vsub.f32 1.0, %v1470_v26  ;;  %vm1496_vm10 = vmor %vm1494_vm8, %vm1495_vm7 }
 0x5c3   :  { %v1491_v47 = vsub.f32 1.0, %v1490_v36 }
 0x5c4   :  { %v1472_v37 = vmul.f32 %v2637_v24, %v1471_v29 }
 0x5c5   :  { %v1492_v51 = vmul.f32 %v2639_v27, %v1491_v47 }
 0x5c6   :  { %v1473_v48 = vadd.f32 %v2637_v24, %v1472_v37 }
 0x5c7   :  { %v1493_v56 = vadd.f32 %v2639_v27, %v1492_v51 }
 0x5c9   :  { %v1497_v2 = vsel %vm1496_vm10, %v2639_v27, %v1493_v56 }
 0x5ca   :  { %v1502_v21 = vsel %vm1499_vm11, %v1501_v22, %v1497_v2  ;;  %v1627_v22 = vld [vmem:[#allocation3 + $0x4] sm:$0x3] }
 0x5cb   :  { %v1507_v38 = vsub.f32 1.0, %v1502_v21  ;;  %v1509_v63 = vmul.f32 0.0, %v1502_v21 }
 0x62d   :  { %v1378_v28 = vpop.f32.mrf.mxu0 }
 0x62e   :  { %v1379_v34 = vadd.f32 %v3338_v11, %v1378_v28  ;;  %v3418_v11 = vld [vmem:[%s3636_s8] ss:$0 sm:$0xff] }
 0x630   :  { %1382 = vst.msk [vmem:[#allocation4 + $0x8] sm:$0xff] %vm241_vm9, %v1379_v34 }
 0x632   :  { %v1308_v39 = vpop.f32.mrf.mxu2  ;;  %v1343_v40 = vpop.f32.mrf.mxu3 }
 0x633   :  { %v1309_v49 = vadd.f32 %v3229_v25, %v1308_v39  ;;  %v1344_v46 = vadd.f32 %v3345_v23, %v1343_v40  ;;  %v1477_v25 = vsel %vm1476_vm5, %v2637_v24, %v1473_v48  ;;  %v1481_v23 = vor.u32 1.1754944e-38, %v1480_v50 }
 0x635   :  { %1312 = vst.msk [vmem:[#allocation2 + $0x8] sm:$0xff] %vm241_vm9, %v1309_v49  ;;  %v1482_v58 = vsel %vm1479_vm6, %v1481_v23, %v1477_v25  ;;  %v1514_v25 = vld [vmem:[#allocation4 + $0x2] sm:$0x3] }
 0x636   :  { %1347 = vst.msk [vmem:[#allocation3 + $0x8] sm:$0xff] %vm241_vm9, %v1344_v46 }
 0x63a   :  { %v1461_v52 = vpop.f32.mrf.mxu2 }
 0x63b   :  { %v1462_v55 = vadd.f32 %v3418_v11, %v1461_v52 }
 0x63d   :  { %v1504_v53 = vmul.f32 %v1482_v58, %v1462_v55 }
 0x63f   :  { %v1505_v61 = vadd.f32 %v1504_v53, %v1400_v19 }
 0x641   :  { %2640 = vtanh.f32 %v1505_v61  ;;  %v1626_v61 = vld [vmem:[#allocation2 + $0x4] sm:$0x3] }
 0x647   :  { %v2641_v12 = vpop.eup %2640 }
 0x648   :  { %v1508_v62 = vmul.f32 %v2641_v12, %v1507_v38 }
 0x64a   :  { %v3421_v33 = vadd.f32 %v1509_v63, %v1508_v62 }
 0x64c   :  { %1511 = vst.msk [vmem:[#allocation6] sm:$0x3] %vm472_vm2, %v3421_v33  ;;  %2495 = vmatmul.msk.f32.vlgmr.msrb.gmra.mxu3 %vm241_vm9, %v3421_v33  ;;  %2496 = vmatmul.msk.f32.vlgmr.msra.gmra.mxu0 %vm241_vm9, %v3421_v33 }
 0x64d   :  { %2497 = vmatmul.msk.f32.vlgmr.msra.gmra.mxu1 %vm241_vm9, %v3421_v33  ;;  %1798 = vmatpush.msrb.mxu3 %v3355_v31 }
 0x64e   :  { %1872 = vmatpush.msra.mxu0 %v3240_v30  ;;  %1892 = vmatpush.msra.mxu1 %v3288_v4 }
 0x64f   :  { %1799 = vmatpush.msrb.mxu3 %v3360_v32 }
 0x650   :  { %1873 = vmatpush.msra.mxu0 %v3252_v35  ;;  %1893 = vmatpush.msra.mxu1 %v3301_v5 }
 0x651   :  { %1800 = vmatpush.msrb.mxu3 %v3372_v42 }
 0x652   :  { %1874 = vmatpush.msra.mxu0 %v3265_v41  ;;  %1894 = vmatpush.msra.mxu1 %v3309_v6 }
 0x653   :  { %1801 = vmatpush.msrb.mxu3 %v3377_v43 }
 0x654   :  { %1875 = vmatpush.msra.mxu0 %v3277_v57  ;;  %1895 = vmatpush.msra.mxu1 %v3320_v7 }
 0x6c9   :  { %v1555_v0 = vpop.f32.mrf.mxu0 }
 0x6ca   :  { %v1598_v54 = vadd.f32 %v1555_v0, %v1513_v45  ;;  %v1575_v37 = vpop.f32.mrf.mxu1 }
 0x6cb   :  { %v1576_v49 = vadd.f32 %v3418_v11, %v1575_v37 }
 0x6cc   :  { %v2499_v1 = vmul.f32 -1.442695, %v1598_v54 }
 0x6ce   :  { %2642 = vpow2.f32 %v2499_v1 }
 0x6cf   :  { %v1535_v10 = vpop.f32.mrf.mxu3 }
 0x6d0   :  { %v1578_v8 = vadd.f32 %v1535_v10, %v1512_v9 }
 0x6d2   :  { %v2498_v13 = vmul.f32 -1.442695, %v1578_v8 }
 0x6d4   :  { %v2643_v14 = vpop.eup %2642  ;;  %2644 = vpow2.f32 %v2498_v13 }
 0x6d5   :  { %v1602_v15 = vadd.f32 1.0, %v2643_v14 }
 0x6d7   :  { %2646 = vrcp.f32 %v1602_v15  ;;  %v1614_v50 = vand.u32 2147483648, %v1602_v15  ;;  %vm1608_vm1 = vweird.f32 %v1602_v15  ;;  %v1612_v51 = vand.u32 2147483647, %v1602_v15 }
 0x6d9   :  { %v1615_v55 = vor.u32 1.1754944e-38, %v1614_v50  ;;  %vm1613_vm4 = vcmp.eq.f32.partialorder %v1612_v51, 8.507059e+37 }
 0x6da   :  { %v2645_v16 = vpop.eup %2644 }
 0x6db   :  { %v1582_v17 = vadd.f32 1.0, %v2645_v16 }
 0x6dd   :  { %2648 = vrcp.f32 %v1582_v17  ;;  %v2647_v3 = vpop.eup %2646  ;;  %v1594_v28 = vand.u32 2147483648, %v1582_v17  ;;  %v1592_v34 = vand.u32 2147483647, %v1582_v17  ;;  %vm1588_vm13 = vweird.f32 %v1582_v17 }
 0x6de   :  { %v1604_v18 = vmul.f32 %v2647_v3, %v1602_v15  ;;  %vm1609_vm0 = vweird.f32 %v2647_v3 }
 0x6df   :  { %v1595_v40 = vor.u32 1.1754944e-38, %v1594_v28  ;;  %vm1593_vm15 = vcmp.eq.f32.partialorder %v1592_v34, 8.507059e+37  ;;  %vm1610_vm3 = vmor %vm1608_vm1, %vm1609_vm0 }
 0x6e0   :  { %v1605_v26 = vsub.f32 1.0, %v1604_v18 }
 0x6e2   :  { %v1606_v36 = vmul.f32 %v2647_v3, %v1605_v26 }
 0x6e3   :  { %v2649_v20 = vpop.eup %2648 }
 0x6e4   :  { %v1584_v24 = vmul.f32 %v2649_v20, %v1582_v17  ;;  %vm1589_vm12 = vweird.f32 %v2649_v20  ;;  %v1607_v47 = vadd.f32 %v2647_v3, %v1606_v36 }
 0x6e5   :  { %vm1590_vm14 = vmor %vm1588_vm13, %vm1589_vm12 }
 0x6e6   :  { %v1585_v27 = vsub.f32 1.0, %v1584_v24  ;;  %v1611_v23 = vsel %vm1610_vm3, %v2647_v3, %v1607_v47 }
 0x6e7   :  { %v1616_v56 = vsel %vm1613_vm4, %v1615_v55, %v1611_v23 }
 0x6e8   :  { %v1586_v29 = vmul.f32 %v2649_v20, %v1585_v27  ;;  %v1621_v58 = vsub.f32 1.0, %v1616_v56  ;;  %v1623_v60 = vmul.f32 %v1616_v56, %v3421_v33 }
 0x6ea   :  { %v1587_v39 = vadd.f32 %v2649_v20, %v1586_v29 }
 0x6ec   :  { %v1591_v46 = vsel %vm1590_vm14, %v2649_v20, %v1587_v39  ;;  %v1628_v39 = vld [vmem:[#allocation4 + $0x4] sm:$0x3] }
 0x6ed   :  { %v1596_v48 = vsel %vm1593_vm15, %v1595_v40, %v1591_v46 }
 0x6ee   :  { %v1618_v44 = vmul.f32 %v1596_v48, %v1576_v49 }
 0x6f0   :  { %v1619_v52 = vadd.f32 %v1618_v44, %v1514_v25 }
 0x6f2   :  { %2650 = vtanh.f32 %v1619_v52  ;;  %v1740_v52 = vld [vmem:[#allocation2 + $0x6] sm:$0x3] }
 0x6f8   :  { %v2651_v59 = vpop.eup %2650 }
 0x6f9   :  { %v1622_v53 = vmul.f32 %v2651_v59, %v1621_v58  ;;  %v1741_v58 = vld [vmem:[#allocation3 + $0x6] sm:$0x3] }
 0x6fb   :  { %v3445_v19 = vadd.f32 %v1623_v60, %v1622_v53 }
 0x6fd   :  { %1625 = vst.msk [vmem:[#allocation6 + $0x2] sm:$0x3] %vm472_vm2, %v3445_v19  ;;  %2500 = vmatmul.msk.f32.vlgmr.msrb.gmra.mxu2 %vm241_vm9, %v3445_v19  ;;  %2501 = vmatmul.msk.f32.vlgmr.msra.gmra.mxu3 %vm241_vm9, %v3445_v19 }
 0x6fe   :  { %2502 = vmatmul.msk.f32.vlgmr.msrb.gmra.mxu0 %vm241_vm9, %v3445_v19  ;;  %1912 = vmatpush.msrb.mxu2 %v3355_v31 }
 0x6ff   :  { %1986 = vmatpush.msra.mxu3 %v3240_v30  ;;  %2006 = vmatpush.msrb.mxu0 %v3288_v4 }
 0x700   :  { %1913 = vmatpush.msrb.mxu2 %v3360_v32 }
 0x701   :  { %1987 = vmatpush.msra.mxu3 %v3252_v35  ;;  %2007 = vmatpush.msrb.mxu0 %v3301_v5 }
 0x702   :  { %1914 = vmatpush.msrb.mxu2 %v3372_v42 }
 0x703   :  { %1988 = vmatpush.msra.mxu3 %v3265_v41  ;;  %2008 = vmatpush.msrb.mxu0 %v3309_v6 }
 0x704   :  { %1915 = vmatpush.msrb.mxu2 %v3377_v43 }
 0x705   :  { %1989 = vmatpush.msra.mxu3 %v3277_v57  ;;  %2009 = vmatpush.msrb.mxu0 %v3320_v7 }
 0x77b   :  { %v1689_v3 = vpop.f32.mrf.mxu0 }
 0x77c   :  { %v1690_v26 = vadd.f32 %v3418_v11, %v1689_v3 }
 0x780   :  { %v1649_v2 = vpop.f32.mrf.mxu2  ;;  %v1669_v21 = vpop.f32.mrf.mxu3 }
 0x781   :  { %v1692_v38 = vadd.f32 %v1649_v2, %v1626_v61  ;;  %v1712_v12 = vadd.f32 %v1669_v21, %v1627_v22 }
 0x783   :  { %v2503_v62 = vmul.f32 -1.442695, %v1692_v38  ;;  %v2504_v63 = vmul.f32 -1.442695, %v1712_v12 }
 0x785   :  { %2652 = vpow2.f32 %v2503_v62 }
 0x786   :  { %2654 = vpow2.f32 %v2504_v63 }
 0x78b   :  { %v2653_v33 = vpop.eup %2652 }
 0x78c   :  { %v2655_v45 = vpop.eup %2654  ;;  %v1696_v0 = vadd.f32 1.0, %v2653_v33 }
 0x78d   :  { %v1716_v54 = vadd.f32 1.0, %v2655_v45 }
 0x78e   :  { %2656 = vrcp.f32 %v1696_v0  ;;  %v1708_v14 = vand.u32 2147483648, %v1696_v0  ;;  %v1706_v17 = vand.u32 2147483647, %v1696_v0  ;;  %vm1702_vm6 = vweird.f32 %v1696_v0 }
 0x78f   :  { %2658 = vrcp.f32 %v1716_v54  ;;  %v1728_v36 = vand.u32 2147483648, %v1716_v54  ;;  %vm1722_vm11 = vweird.f32 %v1716_v54  ;;  %v1726_v37 = vand.u32 2147483647, %v1716_v54 }
 0x790   :  { %v1709_v24 = vor.u32 1.1754944e-38, %v1708_v14  ;;  %vm1707_vm8 = vcmp.eq.f32.partialorder %v1706_v17, 8.507059e+37 }
 0x791   :  { %v1729_v46 = vor.u32 1.1754944e-38, %v1728_v36  ;;  %vm1727_vm13 = vcmp.eq.f32.partialorder %v1726_v37, 8.507059e+37 }
 0x794   :  { %v2657_v1 = vpop.eup %2656 }
 0x795   :  { %v2659_v9 = vpop.eup %2658  ;;  %v1698_v10 = vmul.f32 %v2657_v1, %v1696_v0  ;;  %vm1703_vm5 = vweird.f32 %v2657_v1 }
 0x796   :  { %v1718_v8 = vmul.f32 %v2659_v9, %v1716_v54  ;;  %vm1704_vm7 = vmor %vm1702_vm6, %vm1703_vm5  ;;  %vm1723_vm10 = vweird.f32 %v2659_v9 }
 0x797   :  { %v1699_v13 = vsub.f32 1.0, %v1698_v10  ;;  %vm1724_vm12 = vmor %vm1722_vm11, %vm1723_vm10 }
 0x798   :  { %v1719_v15 = vsub.f32 1.0, %v1718_v8 }
 0x799   :  { %v1700_v16 = vmul.f32 %v2657_v1, %v1699_v13 }
 0x79a   :  { %v1720_v18 = vmul.f32 %v2659_v9, %v1719_v15 }
 0x79b   :  { %v1701_v20 = vadd.f32 %v2657_v1, %v1700_v16 }
 0x79c   :  { %v1721_v29 = vadd.f32 %v2659_v9, %v1720_v18  ;;  %v1742_v18 = vld [vmem:[#allocation4 + $0x6] sm:$0x3] }
 0x79d   :  { %v1705_v27 = vsel %vm1704_vm7, %v2657_v1, %v1701_v20 }
 0x79e   :  { %v1710_v28 = vsel %vm1707_vm8, %v1709_v24, %v1705_v27  ;;  %v1725_v49 = vsel %vm1724_vm12, %v2659_v9, %v1721_v29 }
 0x79f   :  { %v1732_v34 = vmul.f32 %v1710_v28, %v1690_v26  ;;  %v1730_v47 = vsel %vm1727_vm13, %v1729_v46, %v1725_v49 }
 0x7a0   :  { %v1735_v48 = vsub.f32 1.0, %v1730_v47  ;;  %v1737_v51 = vmul.f32 %v1730_v47, %v3445_v19 }
 0x7a1   :  { %v1733_v40 = vadd.f32 %v1732_v34, %v1628_v39 }
 0x7a3   :  { %2660 = vtanh.f32 %v1733_v40  ;;  %v1855_v40 = vld [vmem:[#allocation3 + $0x8] sm:$0x3] }
 0x7a9   :  { %v2661_v50 = vpop.eup %2660 }
 0x7aa   :  { %v1736_v44 = vmul.f32 %v2661_v50, %v1735_v48 }
 0x7ac   :  { %v3469_v25 = vadd.f32 %v1737_v51, %v1736_v44 }
 0x7ae   :  { %1739 = vst.msk [vmem:[#allocation6 + $0x4] sm:$0x3] %vm472_vm2, %v3469_v25  ;;  %2505 = vmatmul.msk.f32.vlgmr.msrb.gmra.mxu1 %vm241_vm9, %v3469_v25  ;;  %2506 = vmatmul.msk.f32.vlgmr.msra.gmra.mxu2 %vm241_vm9, %v3469_v25 }
 0x7af   :  { %2507 = vmatmul.msk.f32.vlgmr.msrb.gmra.mxu3 %vm241_vm9, %v3469_v25  ;;  %2026 = vmatpush.msrb.mxu1 %v3355_v31 }
 0x7b0   :  { %2100 = vmatpush.msra.mxu2 %v3240_v30  ;;  %2120 = vmatpush.msrb.mxu3 %v3288_v4 }
 0x7b1   :  { %2027 = vmatpush.msrb.mxu1 %v3360_v32 }
 0x7b2   :  { %2101 = vmatpush.msra.mxu2 %v3252_v35  ;;  %2121 = vmatpush.msrb.mxu3 %v3301_v5 }
 0x7b3   :  { %2028 = vmatpush.msrb.mxu1 %v3372_v42 }
 0x7b4   :  { %2102 = vmatpush.msra.mxu2 %v3265_v41  ;;  %2122 = vmatpush.msrb.mxu3 %v3309_v6 }
 0x7b5   :  { %2029 = vmatpush.msrb.mxu1 %v3377_v43 }
 0x7b6   :  { %2103 = vmatpush.msra.mxu2 %v3277_v57  ;;  %2123 = vmatpush.msrb.mxu3 %v3320_v7 }
 0x82b   :  { %v1763_v23 = vpop.f32.mrf.mxu1 }
 0x82c   :  { %v1806_v55 = vadd.f32 %v1763_v23, %v1740_v52 }
 0x82e   :  { %v2508_v56 = vmul.f32 -1.442695, %v1806_v55 }
 0x830   :  { %2662 = vpow2.f32 %v2508_v56 }
 0x831   :  { %v1783_v59 = vpop.f32.mrf.mxu2 }
 0x832   :  { %v1826_v53 = vadd.f32 %v1783_v59, %v1741_v58  ;;  %v1803_v0 = vpop.f32.mrf.mxu3 }
 0x833   :  { %v1804_v8 = vadd.f32 %v3418_v11, %v1803_v0 }
 0x834   :  { %v2509_v60 = vmul.f32 -1.442695, %v1826_v53 }
 0x836   :  { %v2663_v19 = vpop.eup %2662  ;;  %2664 = vpow2.f32 %v2509_v60 }
 0x837   :  { %v1810_v61 = vadd.f32 1.0, %v2663_v19 }
 0x839   :  { %2666 = vrcp.f32 %v1810_v61  ;;  %v1822_v62 = vand.u32 2147483648, %v1810_v61  ;;  %v1820_v33 = vand.u32 2147483647, %v1810_v61  ;;  %vm1816_vm15 = vweird.f32 %v1810_v61 }
 0x83b   :  { %v1823_v9 = vor.u32 1.1754944e-38, %v1822_v62  ;;  %vm1821_vm1 = vcmp.eq.f32.partialorder %v1820_v33, 8.507059e+37  ;;  %v1856_v62 = vld [vmem:[#allocation4 + $0x8] sm:$0x3] }
 0x83c   :  { %v2665_v2 = vpop.eup %2664 }
 0x83d   :  { %v1830_v22 = vadd.f32 1.0, %v2665_v2 }
 0x83f   :  { %v2667_v21 = vpop.eup %2666  ;;  %2668 = vrcp.f32 %v1830_v22  ;;  %v1842_v16 = vand.u32 2147483648, %v1830_v22  ;;  %v1840_v3 = vand.u32 2147483647, %v1830_v22  ;;  %vm1836_vm4 = vweird.f32 %v1830_v22 }
 0x840   :  { %v1812_v38 = vmul.f32 %v2667_v21, %v1810_v61  ;;  %vm1817_vm14 = vweird.f32 %v2667_v21 }
 0x841   :  { %vm1818_vm0 = vmor %vm1816_vm15, %vm1817_vm14  ;;  %v1843_v26 = vor.u32 1.1754944e-38, %v1842_v16  ;;  %vm1841_vm6 = vcmp.eq.f32.partialorder %v1840_v3, 8.507059e+37 }
 0x842   :  { %v1813_v12 = vsub.f32 1.0, %v1812_v38 }
 0x844   :  { %v1814_v63 = vmul.f32 %v2667_v21, %v1813_v12 }
 0x845   :  { %v2669_v45 = vpop.eup %2668 }
 0x846   :  { %v1832_v54 = vmul.f32 %v2669_v45, %v1830_v22  ;;  %v1815_v1 = vadd.f32 %v2667_v21, %v1814_v63  ;;  %vm1837_vm3 = vweird.f32 %v2669_v45 }
 0x847   :  { %vm1838_vm5 = vmor %vm1836_vm4, %vm1837_vm3 }
 0x848   :  { %v1833_v10 = vsub.f32 1.0, %v1832_v54  ;;  %v1819_v13 = vsel %vm1818_vm0, %v2667_v21, %v1815_v1 }
 0x849   :  { %v1824_v14 = vsel %vm1821_vm1, %v1823_v9, %v1819_v13  ;;  %v1969_v13 = vld [vmem:[#allocation3 + $0xa] sm:$0x3] }
 0x84a   :  { %v1834_v15 = vmul.f32 %v2669_v45, %v1833_v10  ;;  %v1846_v17 = vmul.f32 %v1824_v14, %v1804_v8 }
 0x84c   :  { %v1835_v20 = vadd.f32 %v2669_v45, %v1834_v15  ;;  %v1847_v24 = vadd.f32 %v1846_v17, %v1742_v18  ;;  %v1968_v17 = vld [vmem:[#allocation2 + $0xa] sm:$0x3] }
 0x84e   :  { %v1839_v27 = vsel %vm1838_vm5, %v2669_v45, %v1835_v20  ;;  %2670 = vtanh.f32 %v1847_v24 }
 0x84f   :  { %v1844_v28 = vsel %vm1841_vm6, %v1843_v26, %v1839_v27 }
 0x850   :  { %v1849_v29 = vsub.f32 1.0, %v1844_v28  ;;  %v1851_v37 = vmul.f32 %v1844_v28, %v3469_v25  ;;  %v2313_v28 = vld [vmem:[%s3637_s9 + $0x8] sm:$0xff] }
 0x854   :  { %v2671_v34 = vpop.eup %2670 }
 0x855   :  { %v1850_v36 = vmul.f32 %v2671_v34, %v1849_v29  ;;  %v2312_v34 = vld [vmem:[%s3637_s9] sm:$0xff] }
 0x857   :  { %v3493_v39 = vadd.f32 %v1851_v37, %v1850_v36 }
 0x859   :  { %1853 = vst.msk [vmem:[#allocation6 + $0x6] sm:$0x3] %vm472_vm2, %v3493_v39  ;;  %2510 = vmatmul.msk.f32.vlgmr.msra.gmra.mxu0 %vm241_vm9, %v3493_v39  ;;  %2511 = vmatmul.msk.f32.vlgmr.msra.gmra.mxu1 %vm241_vm9, %v3493_v39 }
 0x85a   :  { %2512 = vmatmul.msk.f32.vlgmr.msrb.gmra.mxu2 %vm241_vm9, %v3493_v39  ;;  %2140 = vmatpush.msra.mxu0 %v3355_v31 }
 0x85b   :  { %2214 = vmatpush.msra.mxu1 %v3240_v30  ;;  %2234 = vmatpush.msrb.mxu2 %v3288_v4  ;;  %v1854_v30 = vld [vmem:[#allocation2 + $0x8] sm:$0x3] }
 0x85c   :  { %2141 = vmatpush.msra.mxu0 %v3360_v32 }
 0x85d   :  { %2215 = vmatpush.msra.mxu1 %v3252_v35  ;;  %2235 = vmatpush.msrb.mxu2 %v3301_v5 }
 0x85e   :  { %2142 = vmatpush.msra.mxu0 %v3372_v42 }
 0x85f   :  { %2216 = vmatpush.msra.mxu1 %v3265_v41  ;;  %2236 = vmatpush.msrb.mxu2 %v3309_v6 }
 0x860   :  { %2143 = vmatpush.msra.mxu0 %v3377_v43 }
 0x861   :  { %2217 = vmatpush.msra.mxu1 %v3277_v57  ;;  %2237 = vmatpush.msrb.mxu2 %v3320_v7 }
 0x8d6   :  { %v1877_v4 = vpop.f32.mrf.mxu0  ;;  %v1897_v49 = vpop.f32.mrf.mxu1 }
 0x8d7   :  { %v1920_v46 = vadd.f32 %v1877_v4, %v1854_v30  ;;  %v1940_v35 = vadd.f32 %v1897_v49, %v1855_v40 }
 0x8d9   :  { %v2513_v47 = vmul.f32 -1.442695, %v1920_v46  ;;  %v2514_v5 = vmul.f32 -1.442695, %v1940_v35 }
 0x8db   :  { %2672 = vpow2.f32 %v2513_v47 }
 0x8dc   :  { %2674 = vpow2.f32 %v2514_v5 }
 0x8dd   :  { %v1917_v59 = vpop.f32.mrf.mxu2 }
 0x8de   :  { %v1918_v19 = vadd.f32 %v3418_v11, %v1917_v59 }
 0x8e1   :  { %v2673_v48 = vpop.eup %2672 }
 0x8e2   :  { %v2675_v41 = vpop.eup %2674  ;;  %v1924_v50 = vadd.f32 1.0, %v2673_v48 }
 0x8e3   :  { %v1944_v6 = vadd.f32 1.0, %v2675_v41 }
 0x8e4   :  { %2676 = vrcp.f32 %v1924_v50  ;;  %v1936_v23 = vand.u32 2147483648, %v1924_v50  ;;  %v1934_v56 = vand.u32 2147483647, %v1924_v50  ;;  %vm1930_vm8 = vweird.f32 %v1924_v50 }
 0x8e5   :  { %2678 = vrcp.f32 %v1944_v6  ;;  %v1956_v21 = vand.u32 2147483648, %v1944_v6  ;;  %vm1950_vm13 = vweird.f32 %v1944_v6  ;;  %v1954_v12 = vand.u32 2147483647, %v1944_v6 }
 0x8e6   :  { %v1937_v60 = vor.u32 1.1754944e-38, %v1936_v23  ;;  %vm1935_vm11 = vcmp.eq.f32.partialorder %v1934_v56, 8.507059e+37 }
 0x8e7   :  { %v1957_v45 = vor.u32 1.1754944e-38, %v1956_v21  ;;  %vm1955_vm15 = vcmp.eq.f32.partialorder %v1954_v12, 8.507059e+37 }
 0x8ea   :  { %v2677_v44 = vpop.eup %2676 }
 0x8eb   :  { %v2679_v57 = vpop.eup %2678  ;;  %v1926_v51 = vmul.f32 %v2677_v44, %v1924_v50  ;;  %vm1931_vm7 = vweird.f32 %v2677_v44 }
 0x8ec   :  { %v1946_v7 = vmul.f32 %v2679_v57, %v1944_v6  ;;  %vm1932_vm10 = vmor %vm1930_vm8, %vm1931_vm7  ;;  %vm1951_vm12 = vweird.f32 %v2679_v57 }
 0x8ed   :  { %v1927_v25 = vsub.f32 1.0, %v1926_v51  ;;  %vm1952_vm14 = vmor %vm1950_vm13, %vm1951_vm12 }
 0x8ee   :  { %v1947_v52 = vsub.f32 1.0, %v1946_v7  ;;  %v1970_v7 = vld [vmem:[#allocation4 + $0xa] sm:$0x3] }
 0x8ef   :  { %v1928_v55 = vmul.f32 %v2677_v44, %v1927_v25 }
 0x8f0   :  { %v1948_v58 = vmul.f32 %v2679_v57, %v1947_v52 }
 0x8f1   :  { %v1929_v53 = vadd.f32 %v2677_v44, %v1928_v55 }
 0x8f2   :  { %v1949_v2 = vadd.f32 %v2679_v57, %v1948_v58 }
 0x8f3   :  { %v1933_v61 = vsel %vm1932_vm10, %v2677_v44, %v1929_v53 }
 0x8f4   :  { %v1938_v22 = vsel %vm1935_vm11, %v1937_v60, %v1933_v61  ;;  %v1953_v33 = vsel %vm1952_vm14, %v2679_v57, %v1949_v2  ;;  %v2358_v61 = vld [vmem:[%s3639_s11 + $0x38] sm:$0xff]  ;;  %v2357_v2 = vld [vmem:[%s3639_s11 + $0x30] sm:$0xff] }
 0x8f5   :  { %v1960_v38 = vmul.f32 %v1938_v22, %v1918_v19  ;;  %v1958_v0 = vsel %vm1955_vm15, %v1957_v45, %v1953_v33  ;;  %v2310_v19 = vld [vmem:[#allocation6] sm:$0xff]  ;;  %v2082_v22 = vld [vmem:[#allocation2 + $0xc] sm:$0x3] }
 0x8f6   :  { %v1963_v54 = vsub.f32 1.0, %v1958_v0  ;;  %v1965_v10 = vmul.f32 %v1958_v0, %v3493_v39  ;;  %v2356_v33 = vld [vmem:[%s3639_s11 + $0x28] sm:$0xff] }
 0x8f7   :  { %v1961_v63 = vadd.f32 %v1960_v38, %v1856_v62  ;;  %v2083_v38 = vld [vmem:[#allocation3 + $0xc] sm:$0x3] }
 0x8f9   :  { %2680 = vtanh.f32 %v1961_v63 }
 0x8ff   :  { %v2681_v1 = vpop.eup %2680 }
 0x900   :  { %v1964_v9 = vmul.f32 %v2681_v1, %v1963_v54  ;;  %v2355_v54 = vld [vmem:[%s3639_s11 + $0x20] sm:$0xff] }
 0x902   :  { %v3517_v8 = vadd.f32 %v1965_v10, %v1964_v9 }
 0x904   :  { %1967 = vst.msk [vmem:[#allocation6 + $0x8] sm:$0x3] %vm472_vm2, %v3517_v8  ;;  %2515 = vmatmul.msk.f32.vlgmr.msra.gmra.mxu3 %vm241_vm9, %v3517_v8  ;;  %2516 = vmatmul.msk.f32.vlgmr.msrb.gmra.mxu0 %vm241_vm9, %v3517_v8 }
 0x905   :  { %2517 = vmatmul.msk.f32.vlgmr.msrb.gmra.mxu1 %vm241_vm9, %v3517_v8  ;;  %2254 = vmatpush.msra.mxu3 %v3355_v31 }
 0x906   :  { %2378 = vmatpush.msrb.mxu1 %v2358_v61 }
 0x907   :  { %2255 = vmatpush.msra.mxu3 %v3360_v32 }
 0x908   :  { %2379 = vmatpush.msrb.mxu1 %v2357_v2 }
 0x909   :  { %2256 = vmatpush.msra.mxu3 %v3372_v42  ;;  %v2315_v42 = vld [vmem:[%s3637_s9 + $0x18] sm:$0xff] }
 0x90a   :  { %2338 = vmatpush.msrb.mxu0 %v2315_v42  ;;  %2380 = vmatpush.msrb.mxu1 %v2356_v33 }
 0x90b   :  { %2257 = vmatpush.msra.mxu3 %v3377_v43  ;;  %v2314_v43 = vld [vmem:[%s3637_s9 + $0x10] sm:$0xff] }
 0x90c   :  { %2339 = vmatpush.msrb.mxu0 %v2314_v43  ;;  %2381 = vmatpush.msrb.mxu1 %v2355_v54 }
 0x90e   :  { %2340 = vmatpush.msrb.mxu0 %v2313_v28 }
 0x910   :  { %2341 = vmatpush.msrb.mxu0 %v2312_v34 }
 0x981   :  { %v2011_v14 = vpop.f32.mrf.mxu0 }
 0x982   :  { %v2054_v15 = vadd.f32 %v2011_v14, %v1969_v13  ;;  %v2031_v35 = vpop.f32.mrf.mxu1  ;;  %v2354_v13 = vld [vmem:[%s3639_s11 + $0x18] sm:$0xff]  ;;  %v2353_v14 = vld [vmem:[%s3639_s11 + $0x10] sm:$0xff] }
 0x983   :  { %v2032_v48 = vadd.f32 %v3418_v11, %v2031_v35  ;;  %2382 = vmatpush.msrb.mxu1 %v2354_v13 }
 0x984   :  { %v2519_v16 = vmul.f32 -1.442695, %v2054_v15  ;;  %v2352_v15 = vld [vmem:[%s3639_s11 + $0x8] sm:$0xff] }
 0x985   :  { %2383 = vmatpush.msrb.mxu1 %v2353_v14 }
 0x986   :  { %2682 = vpow2.f32 %v2519_v16  ;;  %v2351_v16 = vld [vmem:[%s3639_s11] sm:$0xff] }
 0x987   :  { %v1991_v3 = vpop.f32.mrf.mxu3  ;;  %2384 = vmatpush.msrb.mxu1 %v2352_v15 }
 0x988   :  { %v2034_v18 = vadd.f32 %v1991_v3, %v1968_v17 }
 0x989   :  { %2385 = vmatpush.msrb.mxu1 %v2351_v16 }
 0x98a   :  { %v2518_v20 = vmul.f32 -1.442695, %v2034_v18 }
 0x98c   :  { %v2683_v24 = vpop.eup %2682  ;;  %2684 = vpow2.f32 %v2518_v20 }
 0x98d   :  { %v2058_v26 = vadd.f32 1.0, %v2683_v24 }
 0x98f   :  { %2686 = vrcp.f32 %v2058_v26  ;;  %v2070_v44 = vand.u32 2147483648, %v2058_v26  ;;  %vm2064_vm6 = vweird.f32 %v2058_v26  ;;  %v2068_v51 = vand.u32 2147483647, %v2058_v26 }
 0x991   :  { %v2071_v23 = vor.u32 1.1754944e-38, %v2070_v44  ;;  %vm2069_vm8 = vcmp.eq.f32.partialorder %v2068_v51, 8.507059e+37 }
 0x992   :  { %v2685_v31 = vpop.eup %2684 }
 0x993   :  { %v2038_v27 = vadd.f32 1.0, %v2685_v31 }
 0x995   :  { %2688 = vrcp.f32 %v2038_v27  ;;  %v2687_v32 = vpop.eup %2686  ;;  %v2050_v4 = vand.u32 2147483648, %v2038_v27  ;;  %v2048_v49 = vand.u32 2147483647, %v2038_v27  ;;  %vm2044_vm1 = vweird.f32 %v2038_v27 }
 0x996   :  { %v2060_v29 = vmul.f32 %v2687_v32, %v2058_v26  ;;  %vm2065_vm5 = vweird.f32 %v2687_v32 }
 0x997   :  { %v2051_v5 = vor.u32 1.1754944e-38, %v2050_v4  ;;  %vm2049_vm4 = vcmp.eq.f32.partialorder %v2048_v49, 8.507059e+37  ;;  %vm2066_vm7 = vmor %vm2064_vm6, %vm2065_vm5  ;;  %v2084_v49 = vld [vmem:[#allocation4 + $0xc] sm:$0x3] }
 0x998   :  { %v2061_v39 = vsub.f32 1.0, %v2060_v29 }
 0x99a   :  { %v2062_v46 = vmul.f32 %v2687_v32, %v2061_v39 }
 0x99b   :  { %v2689_v36 = vpop.eup %2688 }
 0x99c   :  { %v2040_v37 = vmul.f32 %v2689_v36, %v2038_v27  ;;  %vm2045_vm0 = vweird.f32 %v2689_v36  ;;  %v2063_v50 = vadd.f32 %v2687_v32, %v2062_v46 }
 0x99d   :  { %vm2046_vm3 = vmor %vm2044_vm1, %vm2045_vm0 }
 0x99e   :  { %v2041_v30 = vsub.f32 1.0, %v2040_v37  ;;  %v2067_v52 = vsel %vm2066_vm7, %v2687_v32, %v2063_v50 }
 0x99f   :  { %v2072_v55 = vsel %vm2069_vm8, %v2071_v23, %v2067_v52 }
 0x9a0   :  { %v2042_v40 = vmul.f32 %v2689_v36, %v2041_v30  ;;  %v2077_v56 = vsub.f32 1.0, %v2072_v55  ;;  %v2079_v53 = vmul.f32 %v2072_v55, %v3517_v8 }
 0x9a2   :  { %v2043_v47 = vadd.f32 %v2689_v36, %v2042_v40 }
 0x9a4   :  { %v2047_v41 = vsel %vm2046_vm3, %v2689_v36, %v2043_v47  ;;  %vm2363_vm3 = vcmask 523264  }
 0x9a5   :  { %v2052_v6 = vsel %vm2049_vm4, %v2051_v5, %v2047_v41 }
 0x9a6   :  { %v2074_v57 = vmul.f32 %v2052_v6, %v2032_v48  ;;  %v3585_v6 = vld [vmem:[%s3638_s10] ss:$0 sm:$0xff] }
 0x9a8   :  { %v2075_v25 = vadd.f32 %v2074_v57, %v1970_v7 }
 0x9aa   :  { %2690 = vtanh.f32 %v2075_v25  ;;  %v2196_v25 = vld [vmem:[#allocation2 + $0xe] sm:$0x3] }
 0x9b0   :  { %v2691_v58 = vpop.eup %2690 }
 0x9b1   :  { %v2078_v59 = vmul.f32 %v2691_v58, %v2077_v56  ;;  %v3602_v56 = vld [vmem:[%s3640_s12] ss:$0 sm:$0xff]  ;;  %v2393_v58 = vlaneseq }
 0x9b3   :  { %v3545_v60 = vadd.f32 %v2079_v53, %v2078_v59  ;;  %v2197_v59 = vld [vmem:[#allocation3 + $0xe] sm:$0x3] }
 0x9b5   :  { %2081 = vst.msk [vmem:[#allocation6 + $0xa] sm:$0x3] %vm472_vm2, %v3545_v60  ;;  %2520 = vmatmul.msk.f32.vlgmr.msra.gmra.mxu2 %vm241_vm9, %v3545_v60  ;;  %2521 = vmatmul.msk.f32.vlgmr.msrb.gmra.mxu3 %vm241_vm9, %v3545_v60 }
 0x9b6   :  { %2522 = vmatmul.msk.f32.vlgmr.msra.gmra.mxu0 %vm241_vm9, %v3545_v60 }
 0x9be   :  { %2530 = vmatmul.msk.f32.vlgmr.msrb.gmra.mxu0 %vm241_vm9, %v2310_v19 }
 0xa33   :  { %v2145_v42 = vpop.f32.mrf.mxu0 }
 0xa34   :  { %v2146_v34 = vadd.f32 %v3418_v11, %v2145_v42 }
 0xa38   :  { %v2105_v21 = vpop.f32.mrf.mxu2  ;;  %v2125_v12 = vpop.f32.mrf.mxu3 }
 0xa39   :  { %v2148_v62 = vadd.f32 %v2105_v21, %v2082_v22  ;;  %v2168_v63 = vadd.f32 %v2125_v12, %v2083_v38  ;;  %v2394_v22 = vand.u32 127, %v2393_v58 }
 0xa3b   :  { %v2523_v45 = vmul.f32 -1.442695, %v2148_v62  ;;  %v2524_v0 = vmul.f32 -1.442695, %v2168_v63  ;;  %v2343_v57 = vpop.f32.mrf.mxu0  ;;  %vm2395_vm4 = vcmp.ge.s32.totalorder %v2394_v22, 12  ;;  %vm2396_vm5 = vcmp.lt.s32.totalorder %v2394_v22, 48 }
 0xa3c   :  { %v2344_v51 = vadd.f32 %v3585_v6, %v2343_v57  ;;  %vm3605_vm6 = vmand %vm2395_vm4, %vm2396_vm5 }
 0xa3d   :  { %2692 = vpow2.f32 %v2523_v45 }
 0xa3e   :  { %2694 = vpow2.f32 %v2524_v0  ;;  %v2349_v7 = vmax.f32 %v2344_v51, 0.0 }
 0xa43   :  { %v2693_v1 = vpop.eup %2692 }
 0xa44   :  { %v2695_v9 = vpop.eup %2694  ;;  %v2152_v10 = vadd.f32 1.0, %v2693_v1 }
 0xa45   :  { %v2172_v8 = vadd.f32 1.0, %v2695_v9 }
 0xa46   :  { %2696 = vrcp.f32 %v2152_v10  ;;  %v2164_v26 = vand.u32 2147483648, %v2152_v10  ;;  %v2162_v32 = vand.u32 2147483647, %v2152_v10  ;;  %vm2158_vm11 = vweird.f32 %v2152_v10 }
 0xa47   :  { %2698 = vrcp.f32 %v2172_v8  ;;  %v2184_v4 = vand.u32 2147483648, %v2172_v8  ;;  %vm2178_vm15 = vweird.f32 %v2172_v8  ;;  %v2182_v40 = vand.u32 2147483647, %v2172_v8 }
 0xa48   :  { %v2165_v29 = vor.u32 1.1754944e-38, %v2164_v26  ;;  %vm2163_vm13 = vcmp.eq.f32.partialorder %v2162_v32, 8.507059e+37 }
 0xa49   :  { %v2185_v47 = vor.u32 1.1754944e-38, %v2184_v4  ;;  %vm2183_vm1 = vcmp.eq.f32.partialorder %v2182_v40, 8.507059e+37 }
 0xa4c   :  { %v2697_v17 = vpop.eup %2696 }
 0xa4d   :  { %v2699_v3 = vpop.eup %2698  ;;  %v2154_v18 = vmul.f32 %v2697_v17, %v2152_v10  ;;  %vm2159_vm10 = vweird.f32 %v2697_v17 }
 0xa4e   :  { %v2174_v20 = vmul.f32 %v2699_v3, %v2172_v8  ;;  %vm2160_vm12 = vmor %vm2158_vm11, %vm2159_vm10  ;;  %vm2179_vm14 = vweird.f32 %v2699_v3 }
 0xa4f   :  { %v2155_v24 = vsub.f32 1.0, %v2154_v18  ;;  %vm2180_vm0 = vmor %vm2178_vm15, %vm2179_vm14  ;;  %v2719_v18 = vld [vmem:[%s3636_s8] ss:$0 sm:$0xff] }
 0xa50   :  { %v2175_v31 = vsub.f32 1.0, %v2174_v20 }
 0xa51   :  { %v2156_v27 = vmul.f32 %v2697_v17, %v2155_v24 }
 0xa52   :  { %v2176_v43 = vmul.f32 %v2699_v3, %v2175_v31 }
 0xa53   :  { %v2157_v28 = vadd.f32 %v2697_v17, %v2156_v27 }
 0xa54   :  { %v2177_v39 = vadd.f32 %v2699_v3, %v2176_v43  ;;  %v2198_v43 = vld [vmem:[#allocation4 + $0xe] sm:$0x3] }
 0xa55   :  { %v2161_v36 = vsel %vm2160_vm12, %v2697_v17, %v2157_v28 }
 0xa56   :  { %v2166_v37 = vsel %vm2163_vm13, %v2165_v29, %v2161_v36  ;;  %v2181_v35 = vsel %vm2180_vm0, %v2699_v3, %v2177_v39 }
 0xa57   :  { %v2188_v30 = vmul.f32 %v2166_v37, %v2146_v34  ;;  %v2186_v5 = vsel %vm2183_vm1, %v2185_v47, %v2181_v35 }
 0xa58   :  { %v2191_v48 = vsub.f32 1.0, %v2186_v5  ;;  %v2193_v50 = vmul.f32 %v2186_v5, %v3545_v60 }
 0xa59   :  { %v2189_v46 = vadd.f32 %v2188_v30, %v2084_v49 }
 0xa5b   :  { %2700 = vtanh.f32 %v2189_v46 }
 0xa61   :  { %v2701_v41 = vpop.eup %2700 }
 0xa62   :  { %v2192_v11 = vmul.f32 %v2701_v41, %v2191_v48 }
 0xa64   :  { %v3587_v44 = vadd.f32 %v2193_v50, %v2192_v11 }
 0xa66   :  { %2195 = vst.msk [vmem:[#allocation6 + $0xc] sm:$0x3] %vm472_vm2, %v3587_v44  ;;  %2525 = vmatmul.msk.f32.vlgmr.msra.gmra.mxu1 %vm241_vm9, %v3587_v44  ;;  %2526 = vmatmul.msk.f32.vlgmr.msrb.gmra.mxu2 %vm241_vm9, %v3587_v44 }
 0xa67   :  { %2527 = vmatmul.msk.f32.vlgmr.msra.gmra.mxu3 %vm241_vm9, %v3587_v44 }
 0xa6e   :  { %2532 = vmatmul.msk.f32.vlgmr.msrb.gmra.mxu1 %vm2363_vm3, %v2349_v7 }
 0xae3   :  { %v2219_v52 = vpop.f32.mrf.mxu1 }
 0xae4   :  { %v2262_v23 = vadd.f32 %v2219_v52, %v2196_v25 }
 0xae6   :  { %v2528_v55 = vmul.f32 -1.442695, %v2262_v23 }
 0xae8   :  { %2702 = vpow2.f32 %v2528_v55 }
 0xae9   :  { %v2239_v53 = vpop.f32.mrf.mxu2 }
 0xaea   :  { %v2282_v60 = vadd.f32 %v2239_v53, %v2197_v59  ;;  %v2259_v14 = vpop.f32.mrf.mxu3 }
 0xaeb   :  { %v2387_v19 = vpop.f32.mrf.mxu1  ;;  %v2260_v20 = vadd.f32 %v2719_v18, %v2259_v14 }
 0xaec   :  { %v2529_v61 = vmul.f32 -1.442695, %v2282_v60  ;;  %v2388_v2 = vadd.f32 %v3602_v56, %v2387_v19 }
 0xaee   :  { %v2703_v21 = vpop.eup %2702  ;;  %2704 = vpow2.f32 %v2529_v61 }
 0xaef   :  { %v2266_v38 = vadd.f32 1.0, %v2703_v21  ;;  %2706 = vtanh.f32 %v2388_v2 }
 0xaf1   :  { %2708 = vrcp.f32 %v2266_v38  ;;  %v2278_v9 = vand.u32 2147483648, %v2266_v38  ;;  %v2276_v8 = vand.u32 2147483647, %v2266_v38  ;;  %vm2272_vm8 = vweird.f32 %v2266_v38 }
 0xaf3   :  { %v2279_v17 = vor.u32 1.1754944e-38, %v2278_v9  ;;  %vm2277_vm11 = vcmp.eq.f32.partialorder %v2276_v8, 8.507059e+37 }
 0xaf4   :  { %v2705_v62 = vpop.eup %2704 }
 0xaf5   :  { %v2707_v63 = vpop.eup %2706  ;;  %v2286_v33 = vadd.f32 1.0, %v2705_v62 }
 0xaf6   :  { %v2400_v45 = vsel %vm3605_vm6, %v2707_v63, %v2388_v2 }
 0xaf7   :  { %v2709_v0 = vpop.eup %2708  ;;  %2710 = vrcp.f32 %v2286_v33  ;;  %2402 = vst [vmem:[%s3641_s13] sm:$0xff] %v2400_v45  ;;  %v2298_v27 = vand.u32 2147483648, %v2286_v33  ;;  %v2296_v42 = vand.u32 2147483647, %v2286_v33  ;;  %vm2292_vm13 = vweird.f32 %v2286_v33 }
 0xaf8   :  { %v2268_v54 = vmul.f32 %v2709_v0, %v2266_v38  ;;  %vm2273_vm7 = vweird.f32 %v2709_v0 }
 0xaf9   :  { %vm2274_vm10 = vmor %vm2272_vm8, %vm2273_vm7  ;;  %v2299_v34 = vor.u32 1.1754944e-38, %v2298_v27  ;;  %vm2297_vm15 = vcmp.eq.f32.partialorder %v2296_v42, 8.507059e+37 }
 0xafa   :  { %v2269_v1 = vsub.f32 1.0, %v2268_v54 }
 0xafc   :  { %v2270_v10 = vmul.f32 %v2709_v0, %v2269_v1 }
 0xafd   :  { %v2711_v13 = vpop.eup %2710 }
 0xafe   :  { %v2288_v15 = vmul.f32 %v2711_v13, %v2286_v33  ;;  %v2271_v16 = vadd.f32 %v2709_v0, %v2270_v10  ;;  %vm2293_vm12 = vweird.f32 %v2711_v13 }
 0xaff   :  { %vm2294_vm14 = vmor %vm2292_vm13, %vm2293_vm12 }
 0xb00   :  { %v2289_v3 = vsub.f32 1.0, %v2288_v15  ;;  %v2275_v24 = vsel %vm2274_vm10, %v2709_v0, %v2271_v16 }
 0xb01   :  { %v2280_v26 = vsel %vm2277_vm11, %v2279_v17, %v2275_v24 }
 0xb02   :  { %v2290_v31 = vmul.f32 %v2711_v13, %v2289_v3  ;;  %v2302_v32 = vmul.f32 %v2280_v26, %v2260_v20 }
 0xb04   :  { %v2291_v28 = vadd.f32 %v2711_v13, %v2290_v31  ;;  %v2303_v29 = vadd.f32 %v2302_v32, %v2198_v43 }
 0xb06   :  { %v2295_v36 = vsel %vm2294_vm14, %v2711_v13, %v2291_v28  ;;  %2712 = vtanh.f32 %v2303_v29 }
 0xb07   :  { %v2300_v37 = vsel %vm2297_vm15, %v2299_v34, %v2295_v36 }
 0xb08   :  { %v2305_v39 = vsub.f32 1.0, %v2300_v37  ;;  %v2307_v40 = vmul.f32 %v2300_v37, %v3587_v44 }
 0xb0c   :  { %v2713_v30 = vpop.eup %2712 }
 0xb0d   :  { %v2306_v4 = vmul.f32 %v2713_v30, %v2305_v39 }
 0xb0f   :  { %v2308_v49 = vadd.f32 %v2307_v40, %v2306_v4 }
 0xb11   :  { %2309 = vst.msk [vmem:[#allocation6 + $0xe] sm:$0x3] %vm472_vm2, %v2308_v49 }
 0xb18   :  { %v2311_v46 = vld [vmem:[#allocation6 + $0x8] sm:$0xff] }
 0xb19   :  { %2531 = vmatmul.msk.f32.gmra.mxu0 %vm241_vm9, %v2311_v46 }
 0xb96   :  { %v2346_v35 = vpop.f32.mrf.mxu0 }
 0xb97   :  { %v2347_v47 = vadd.f32 %v3585_v6, %v2346_v35 }
 0xb99   :  { %v2350_v5 = vmax.f32 %v2347_v47, 0.0 }
 0xb9b   :  { %2533 = vmatmul.msk.f32.gmra.mxu1 %vm2363_vm3, %v2350_v5 }
 0xc18   :  { %v2390_v48 = vpop.f32.mrf.mxu1 }
 0xc19   :  { %v2391_v41 = vadd.f32 %v3602_v56, %v2390_v48 }
 0xc1b   :  { %2714 = vtanh.f32 %v2391_v41 }
 0xc21   :  { %v2715_v11 = vpop.eup %2714 }
 0xc22   :  { %v2401_v50 = vsel %vm3605_vm6, %v2715_v11, %v2391_v41 }
 0xc23   :  { %2403 = vst [vmem:[%s3641_s13 + $0x8] sm:$0xff] %v2401_v50 }

</bundles_post_ra>
